<compile_context>
chip_gen: v5e
topology: v5e:2x2
jax: 0.10.0
libtpu: 0.0.40
codegen_flags: <defaults>
</compile_context>

<pallas_src>
import jax
import jax.numpy as jnp
from jax import lax
from jax.experimental import pallas as pl
from jax.experimental.pallas import tpu as pltpu


# ----------------------------------------------------------------------------
# layout helpers + banded (Toeplitz-over-width) conv weights
# ----------------------------------------------------------------------------

def _to_lane_merged(x_nchw):
    """(N, C, H, W) -> lane-merged NHWC (N, H, W*C), f32."""
    n, c, h, w = x_nchw.shape
    return jnp.transpose(x_nchw, (0, 2, 3, 1)).reshape(n, h, w * c).astype(jnp.float32)


def _from_lane_merged(x_lm, width):
    """(N, H, W*C) -> (N, C, H, W)."""
    n, h, wc = x_lm.shape
    c = wc // width
    return jnp.transpose(x_lm.reshape(n, h, width, c), (0, 3, 1, 2))


def _band_weights(w_hwio, w_in, pad, dtype=jnp.bfloat16):
    """Banded weight matrices for a stride-1 conv in lane-merged layout.

    Returns B of shape (KH, W_in*Cin, W_out*Cout) so that, for kernel row kh, input row r
    contributes  x_row @ B[kh]  to output row (r - kh + pad).  Width padding is encoded in
    the band structure (out-of-range taps have no entry)."""
    kh_, kw_, cin, cout = w_hwio.shape
    w_out = w_in + 2 * pad - kw_ + 1
    wi = jnp.arange(w_in)[None, :, None]
    wo = jnp.arange(w_out)[None, None, :]
    kw = jnp.arange(kw_)[:, None, None]
    sel = (wi == wo + kw - pad).astype(jnp.float32)            # (KW, W_in, W_out)
    band = jnp.einsum("xio,hxcd->hicod", sel, w_hwio.astype(jnp.float32))
    return band.reshape(kh_, w_in * cin, w_out * cout).astype(dtype)


def _tile_row(vec, width):
    """Per-channel (C,) vector -> lane-dense (1, W*C) row matching the lane-merged layout."""
    return jnp.tile(vec.astype(jnp.float32), width).reshape(1, width * vec.shape[0])


def _pick_batch_tile(n, h):
    """Images packed per grid step: fill ~256 MXU rows but keep >=2 grid steps (v7x TCs)."""
    target = max(1, 256 // max(h, 1))
    bt = 1
    for cand in range(1, n + 1):
        if n % cand == 0 and cand <= target:
            bt = cand
    if n > 1 and n // bt < 2:
        for cand in range(bt - 1, 0, -1):
            if n % cand == 0 and n // cand >= 2:
                bt = cand
                break
    return bt


# ----------------------------------------------------------------------------
# in-kernel slab conv core (shared by the single- and double-conv kernels)
# ----------------------------------------------------------------------------

def _shift_slab(t, s, h, hidx):
    """shifted[r] = t[r + s] within each packed image; rows outside the image are zero."""
    if s == 0:
        return t
    m, wc = t.shape
    zeros = jnp.zeros((abs(s), wc), t.dtype)
    shifted = (jnp.concatenate([t[s:, :], zeros], axis=0) if s > 0
               else jnp.concatenate([zeros, t[:s, :]], axis=0))
    # Mask rows whose source row falls outside [0, H) of its own image; this also zeroes
    # rows that leaked across image boundaries inside the batch-packed slab.
    keep = (hidx + s >= 0) & (hidx + s < h)
    return jnp.where(keep, shifted, 0.0)


def _conv_slab(slabs, wband_refs, bias_row, kh_taps, pad, h):
    """Stride-1 'same' conv of a batch-packed slab.

    slabs      : list of bf16 (M, W*Ci) values (constituents of the implicit channel concat)
    wband_refs : matching list of (KH, W*Ci, W*Cout) band-weight refs (bf16)
    Returns the f32 (M, W*Cout) conv output (+ bias).  Requires KH == 2*pad + 1."""
    m = slabs[0].shape[0]
    wc_out = wband_refs[0].shape[2]
    hidx = lax.broadcasted_iota(jnp.int32, (m, wc_out), 0) % h   # hoisted intra-image row idx
    acc = jnp.zeros((m, wc_out), jnp.float32)
    for kh in range(kh_taps):                                    # static unroll over taps
        t = None
        for x, wref in zip(slabs, wband_refs):                   # conv(cat) == sum of convs
            part = jnp.dot(x, wref[kh], preferred_element_type=jnp.float32)
            t = part if t is None else t + part
        acc = acc + _shift_slab(t, kh - pad, h, hidx)
    return acc + bias_row


# ----------------------------------------------------------------------------
# fused conv kernel: implicit concat + in-kernel BN affine of inputs + bias
#                    + LeakyReLU + residual + lane-dense BN partial stats
# ----------------------------------------------------------------------------

def fused_conv(inputs, w_hwio, bias, *, width, pad, leaky_slope=None,
               with_stats=False, residual=None, out_dtype=jnp.bfloat16):
    """Stride-1 conv over the (implicit) channel-concat of `inputs`.

    inputs : list of entries, each either x or (x, scale, shift) where x is lane-merged
             (N, H, W*Ci).  If (scale, shift) per-channel vectors are given, the BatchNorm
             affine x*scale + shift is applied in-kernel before the conv.
    Returns y (N, H, W*Cout) [, stats (steps, 8, W*Cout): row 0 = sum, row 1 = sum(x^2)]."""
    norm = [e if isinstance(e, tuple) else (e, None, None) for e in inputs]
    n, h, _ = norm[0][0].shape
    kh_, kw_, cin_total, cout = w_hwio.shape
    assert kh_ == 2 * pad + 1, "only 'same'-height stride-1 convs are supported"
    cins = [x.shape[-1] // width for (x, _, _) in norm]
    assert sum(cins) == cin_total
    wc_out = (width + 2 * pad - kw_ + 1) * cout
    assert wc_out == width * cout, "only 'same'-width stride-1 convs are supported"
    if residual is not None:
        assert residual.shape == (n, h, wc_out)
    b_tile = _pick_batch_tile(n, h)
    steps = n // b_tile
    n_in = len(norm)
    with_residual = residual is not None
    has_affine = [sc is not None for (_, sc, _) in norm]

    # Per-constituent band weights in concat order (the concat itself is never built).
    wbands, off = [], 0
    for ci in cins:
        wbands.append(_band_weights(w_hwio[:, :, off:off + ci, :], width, pad))
        off += ci
    bias_row = _tile_row(bias, width)                           # (1, W*Cout)

    in_specs, operands = [], []
    for (x, sc, sh), ci in zip(norm, cins):
        wci = width * ci
        in_specs.append(pl.BlockSpec((b_tile, h, wci), lambda i: (i, 0, 0)))
        operands.append(x)
        if sc is not None:
            in_specs += [pl.BlockSpec((1, wci), lambda i: (0, 0))] * 2
            operands += [_tile_row(sc, width), _tile_row(sh, width)]
    for wb in wbands:
        in_specs.append(pl.BlockSpec(wb.shape, lambda i: (0, 0, 0)))
        operands.append(wb)
    in_specs.append(pl.BlockSpec((1, wc_out), lambda i: (0, 0)))
    operands.append(bias_row)
    if with_residual:
        in_specs.append(pl.BlockSpec((b_tile, h, wc_out), lambda i: (i, 0, 0)))
        operands.append(residual)

    out_shapes = [jax.ShapeDtypeStruct((n, h, wc_out), out_dtype)]
    out_specs = [pl.BlockSpec((b_tile, h, wc_out), lambda i: (i, 0, 0))]
    if with_stats:
        out_shapes.append(jax.ShapeDtypeStruct((steps, 8, wc_out), jnp.float32))
        out_specs.append(pl.BlockSpec((1, 8, wc_out), lambda i: (i, 0, 0)))

    def kernel(*refs):
        it = iter(refs)
        slabs = []
        for aff in has_affine:
            x = next(it)[...].reshape(b_tile * h, -1)           # merge leading dims (layout-free)
            if aff:                                              # fused BatchNorm affine (f32)
                sc_row = next(it)[...]
                sh_row = next(it)[...]
                x = x.astype(jnp.float32) * sc_row + sh_row
            slabs.append(x.astype(jnp.bfloat16))                 # MXU operands in bf16
        wrefs = [next(it) for _ in range(n_in)]
        brow = next(it)[...]
        res_ref = next(it) if with_residual else None
        y_ref = next(it)
        stats_ref = next(it) if with_stats else None

        acc = _conv_slab(slabs, wrefs, brow, kh_, pad, h)        # f32 (M, W*Cout)
        if leaky_slope is not None:
            acc = jnp.where(acc >= 0, acc, leaky_slope * acc)
        if with_stats:                                           # lane-dense BN partials
            srow = jnp.sum(acc, axis=0, keepdims=True)
            qrow = jnp.sum(acc * acc, axis=0, keepdims=True)
            stats_ref[0] = jnp.concatenate(
                [srow, qrow, jnp.zeros((6, wc_out), jnp.float32)], axis=0)
        if with_residual:
            acc = acc + res_ref[...].reshape(b_tile * h, wc_out).astype(jnp.float32)
        y_ref[...] = acc.reshape(b_tile, h, wc_out).astype(y_ref.dtype)

    flops = 2 * n * h * width * cout * kh_ * kw_ * cin_total     # real conv FLOPs
    bytes_accessed = (sum(int(x.size) * x.dtype.itemsize for (x, _, _) in norm)
                      + sum(int(wb.size) * 2 for wb in wbands)
                      + int(n * h * wc_out) * jnp.dtype(out_dtype).itemsize
                      + (int(residual.size) * 4 if with_residual else 0)
                      + (steps * 8 * wc_out * 4 if with_stats else 0))
    cost = pl.CostEstimate(flops=int(flops), transcendentals=0,
                           bytes_accessed=int(bytes_accessed))

    return pl.pallas_call(
        kernel,
        out_shape=tuple(out_shapes) if len(out_shapes) > 1 else out_shapes[0],
        grid_spec=pltpu.PrefetchScalarGridSpec(
            num_scalar_prefetch=0,
            grid=(steps,),
            in_specs=in_specs,
            out_specs=tuple(out_specs) if len(out_specs) > 1 else out_specs[0]),
        # No cross-step carry (stats are per-step partials) -> batch axis stays parallel.
        compiler_params=pltpu.CompilerParams(dimension_semantics=("parallel",)),
        cost_estimate=cost,
    )(*operands)


# ----------------------------------------------------------------------------
# conv1 chain: two 'same' 3x3 convs in one kernel (intermediate stays in VMEM)
# ----------------------------------------------------------------------------

def fused_double_conv(x, w1_hwio, b1, w2_hwio, b2, *, width, out_dtype=jnp.bfloat16):
    n, h, wc_in = x.shape
    kh1, kw1, _, cmid = w1_hwio.shape
    kh2, kw2, _, cout = w2_hwio.shape
    pad1, pad2 = (kh1 - 1) // 2, (kh2 - 1) // 2
    assert kw1 == kh1 and kw2 == kh2
    wband1 = _band_weights(w1_hwio, width, pad1)
    wband2 = _band_weights(w2_hwio, width, pad2)
    b1_row = _tile_row(b1, width)
    b2_row = _tile_row(b2, width)
    wc_mid, wc_out = width * cmid, width * cout
    b_tile = _pick_batch_tile(n, h)
    steps = n // b_tile

    def kernel(x_ref, w1_ref, b1_ref, w2_ref, b2_ref, y_ref):
        xb = x_ref[...].reshape(b_tile * h, wc_in).astype(jnp.bfloat16)
        t = _conv_slab([xb], [w1_ref], b1_ref[...], kh1, pad1, h)      # f32 intermediate
        d = _conv_slab([t.astype(jnp.bfloat16)], [w2_ref], b2_ref[...], kh2, pad2, h)
        y_ref[...] = d.reshape(b_tile, h, wc_out).astype(y_ref.dtype)

    cin1 = wc_in // width
    flops = 2 * n * h * width * (cmid * kh1 * kw1 * cin1 + cout * kh2 * kw2 * cmid)
    bytes_accessed = (int(x.size) * x.dtype.itemsize + int(wband1.size) * 2
                      + int(wband2.size) * 2
                      + int(n * h * wc_out) * jnp.dtype(out_dtype).itemsize)
    cost = pl.CostEstimate(flops=int(flops), transcendentals=0,
                           bytes_accessed=int(bytes_accessed))

    return pl.pallas_call(
        kernel,
        out_shape=jax.ShapeDtypeStruct((n, h, wc_out), out_dtype),
        grid_spec=pltpu.PrefetchScalarGridSpec(
            num_scalar_prefetch=0,
            grid=(steps,),
            in_specs=[pl.BlockSpec((b_tile, h, wc_in), lambda i: (i, 0, 0)),
                      pl.BlockSpec(wband1.shape, lambda i: (0, 0, 0)),
                      pl.BlockSpec((1, wc_mid), lambda i: (0, 0)),
                      pl.BlockSpec(wband2.shape, lambda i: (0, 0, 0)),
                      pl.BlockSpec((1, wc_out), lambda i: (0, 0))],
            out_specs=pl.BlockSpec((b_tile, h, wc_out), lambda i: (i, 0, 0))),
        compiler_params=pltpu.CompilerParams(dimension_semantics=("parallel",)),
        cost_estimate=cost,
    )(x, wband1, b1_row, wband2, b2_row)


# ----------------------------------------------------------------------------
# BatchNorm (training-mode batch statistics) from the lane-dense partials
# ----------------------------------------------------------------------------

def _bn_scale_shift(stats, gamma, beta, count, width, eps):
    cout = gamma.shape[0]
    s = jnp.sum(stats[:, 0, :], axis=0).reshape(width, cout).sum(axis=0)
    q = jnp.sum(stats[:, 1, :], axis=0).reshape(width, cout).sum(axis=0)
    mean = s / count
    var = jnp.maximum(q / count - mean * mean, 0.0)   # clamp the single-pass cancellation
    scale = gamma * lax.rsqrt(var + eps)
    shift = beta - mean * scale
    return scale, shift


# ----------------------------------------------------------------------------
# DenseEncoder.forward
# ----------------------------------------------------------------------------

def dense_encoder_forward(image_nchw, data_nchw, params, *, eps=1e-5, slope=0.01):
    n, _, h, w = image_nchw.shape
    img = _to_lane_merged(image_nchw)            # (N, H, W*3) f32: conv input + residual
    dat = _to_lane_merged(data_nchw)             # (N, H, W*D) f32
    count = float(n * h * w)

    # conv1: fold the two pointwise 1x1 (pad 0) convs into the first 3x3 (exact), then run
    # the remaining 3x3 -> 3x3 chain as ONE kernel.
    mix_b = params["c1b_w"][0, 0]                # (out_ch, out_ch)
    mix_c = params["c1c_w"][0, 0]
    mix = mix_b @ mix_c
    w1 = jnp.einsum("hwio,oc->hwic", params["c1a_w"], mix)
    b1 = params["c1a_b"] @ mix + params["c1b_b"] @ mix_c + params["c1c_b"]
    d = fused_double_conv(dat, w1, b1, params["c1d_w"], params["c1d_b"], width=w)

    # features: conv3x3 + LeakyReLU (+ BN batch stats); the BN affine is applied inside the
    # consuming convs, never materialized in HBM.
    y1, st = fused_conv([img], params["f_w"], params["f_b"], width=w, pad=1,
                        leaky_slope=slope, with_stats=True)
    x1 = (y1,) + _bn_scale_shift(st, params["f_g"], params["f_be"], count, w, eps)

    # conv2 on cat([x1, data])
    y2, st = fused_conv([x1, d], params["c2_w"], params["c2_b"], width=w, pad=1,
                        leaky_slope=slope, with_stats=True)
    x2 = (y2,) + _bn_scale_shift(st, params["c2_g"], params["c2_be"], count, w, eps)

    # conv3 on cat([x1, x2, data])
    y3, st = fused_conv([x1, x2, d], params["c3_w"], params["c3_b"], width=w, pad=1,
                        leaky_slope=slope, with_stats=True)
    x3 = (y3,) + _bn_scale_shift(st, params["c3_g"], params["c3_be"], count, w, eps)

    # conv4 on cat([x1, x2, x3, data]) with the residual `image +` fused into the kernel
    out = fused_conv([x1, x2, x3, d], params["c4_w"], params["c4_b"], width=w, pad=1,
                     residual=img, out_dtype=jnp.float32)
    return _from_lane_merged(out, w)             # back to NCHW


# ----------------------------------------------------------------------------
# pure-JAX reference (for the sanity check)
# ----------------------------------------------------------------------------

def _reference_forward(image_nchw, data_nchw, params, *, eps=1e-5, slope=0.01):
    def conv(x, wgt, b, pad):
        return lax.conv_general_dilated(
            x, wgt, (1, 1), [(pad, pad), (pad, pad)],
            dimension_numbers=("NHWC", "HWIO", "NHWC")) + b

    def bn(x, g, b):
        m = x.mean(axis=(0, 1, 2))
        v = x.var(axis=(0, 1, 2))
        return (x - m) / jnp.sqrt(v + eps) * g + b

    lrelu = lambda x: jnp.where(x >= 0, x, slope * x)
    img = jnp.transpose(image_nchw, (0, 2, 3, 1)).astype(jnp.float32)
    dat = jnp.transpose(data_nchw, (0, 2, 3, 1)).astype(jnp.float32)

    d = conv(dat, params["c1a_w"], params["c1a_b"], 1)
    d = conv(d, params["c1b_w"], params["c1b_b"], 0)
    d = conv(d, params["c1c_w"], params["c1c_b"], 0)
    d = conv(d, params["c1d_w"], params["c1d_b"], 1)

    x1 = bn(lrelu(conv(img, params["f_w"], params["f_b"], 1)), params["f_g"], params["f_be"])
    x2 = bn(lrelu(conv(jnp.concatenate([x1, d], -1), params["c2_w"], params["c2_b"], 1)),
            params["c2_g"], params["c2_be"])
    x3 = bn(lrelu(conv(jnp.concatenate([x1, x2, d], -1), params["c3_w"], params["c3_b"], 1)),
            params["c3_g"], params["c3_be"])
    out = conv(jnp.concatenate([x1, x2, x3, d], -1), params["c4_w"], params["c4_b"], 1) + img
    return jnp.transpose(out, (0, 3, 1, 2))


if __name__ == "__main__":
    # DenseEncoder(bpp=1, k1=1, k2=1, hidden_size=8, out_ch=4) at a small test size.
    # (k1 = k2 = 1 is the only configuration for which the PyTorch forward's torch.cat is
    #  shape-consistent.)
    N, H, W = 2, 16, 16
    hidden, out_ch, data_depth = 8, 4, 1
    k1 = k2 = 1

    key = jax.random.PRNGKey(0)
    keys = iter(jax.random.split(key, 32))

    def conv_params(cin, cout, k):
        bound = 1.0 / (cin * k * k) ** 0.5     # nn.Conv2d kaiming-uniform bound
        wgt = jax.random.uniform(next(keys), (k, k, cin, cout), jnp.float32, -bound, bound)
        b = jax.random.uniform(next(keys), (cout,), jnp.float32, -bound, bound)
        return wgt, b

    params = {}
    params["c1a_w"], params["c1a_b"] = conv_params(data_depth, out_ch, 3)
    params["c1b_w"], params["c1b_b"] = conv_params(out_ch, out_ch, k1)
    params["c1c_w"], params["c1c_b"] = conv_params(out_ch, out_ch, k2)
    params["c1d_w"], params["c1d_b"] = conv_params(out_ch, data_depth, 3)
    params["f_w"],  params["f_b"]  = conv_params(3, hidden, 3)
    params["c2_w"], params["c2_b"] = conv_params(hidden + data_depth, hidden, 3)
    params["c3_w"], params["c3_b"] = conv_params(2 * hidden + data_depth, hidden, 3)
    params["c4_w"], params["c4_b"] = conv_params(3 * hidden + data_depth, 3, 3)
    for name in ("f", "c2", "c3"):
        params[name + "_g"] = 1.0 + 0.1 * jax.random.normal(next(keys), (hidden,), jnp.float32)
        params[name + "_be"] = 0.1 * jax.random.normal(next(keys), (hidden,), jnp.float32)

    image = jax.random.normal(next(keys), (N, 3, H, W), jnp.float32)
    data = jax.random.normal(next(keys), (N, data_depth, H, W), jnp.float32)

    fwd = jax.jit(dense_encoder_forward)
    out = jax.block_until_ready(fwd(image, data, params))
    ref = jax.block_until_ready(_reference_forward(image, data, params))

    assert out.shape == (N, 3, H, W)
    assert bool(jnp.all(jnp.isfinite(out)))
    max_err = float(jnp.max(jnp.abs(out - ref)))
    # bf16 MXU operands + bf16 inter-layer activations bound the achievable agreement.
    assert max_err < 1e-1, f"mismatch vs JAX reference: {max_err}"

    print("KERNEL_OK")
</pallas_src>

<mosaic_0001>
module attributes {stable_mosaic.version = 11 : i64} {
  func.func @kernel(%arg0: i32, %arg1: memref<1x16x48xf32, #tpu.memory_space<vmem>>, %arg2: memref<3x48x128xbf16, #tpu.memory_space<vmem>>, %arg3: memref<1x128xf32, #tpu.memory_space<vmem>>, %arg4: memref<1x16x128xbf16, #tpu.memory_space<vmem>>, %arg5: memref<1x8x128xf32, #tpu.memory_space<vmem>>) attributes {dimension_semantics = [#tpu.dimension_semantics<parallel>], iteration_bounds = array<i64: 2>, scalar_prefetch = 0 : i64, scratch_operands = 0 : i64, tpu.core_type = #tpu.core_type<tc>, window_params = [{transform_indices = @transform_0, window_bounds = array<i64: 1, 16, 48>}, {pipeline_mode = #tpu.pipeline_mode<synchronous>, transform_indices = @transform_1, window_bounds = array<i64: 3, 48, 128>}, {pipeline_mode = #tpu.pipeline_mode<synchronous>, transform_indices = @transform_2, window_bounds = array<i64: 1, 128>}, {transform_indices = @transform_3, window_bounds = array<i64: 1, 16, 128>}, {transform_indices = @transform_4, window_bounds = array<i64: 1, 8, 128>}]} {
    %c0 = arith.constant 0 : index
    %c0_0 = arith.constant 0 : index
    %c0_1 = arith.constant 0 : index
    %0 = vector.load %arg1[%c0, %c0_0, %c0_1] : memref<1x16x48xf32, #tpu.memory_space<vmem>>, vector<1x16x48xf32>
    %1 = vector.shape_cast %0 : vector<1x16x48xf32> to vector<16x48xf32>
    %2 = arith.truncf %1 : vector<16x48xf32> to vector<16x48xbf16>
    %c0_2 = arith.constant 0 : index
    %c0_3 = arith.constant 0 : index
    %3 = vector.load %arg3[%c0_2, %c0_3] : memref<1x128xf32, #tpu.memory_space<vmem>>, vector<1x128xf32>
    %4 = tpu.iota {dimensions = array<i32: 0>} : vector<16x128xi32>
    %c16_i32 = arith.constant 16 : i32
    %c0_i32 = arith.constant 0 : i32
    %5 = arith.cmpi eq, %c16_i32, %c0_i32 : i32
    %c1_i32 = arith.constant 1 : i32
    %6 = arith.select %5, %c1_i32, %c16_i32 : i32
    %7 = vector.broadcast %6 : i32 to vector<16x128xi32>
    %8 = arith.remsi %4, %7 : vector<16x128xi32>
    %c0_i32_4 = arith.constant 0 : i32
    %9 = vector.broadcast %c0_i32_4 : i32 to vector<16x128xi32>
    %10 = arith.cmpi ne, %8, %9 : vector<16x128xi32>
    %c0_i32_5 = arith.constant 0 : i32
    %11 = vector.broadcast %c0_i32_5 : i32 to vector<16x128xi32>
    %12 = arith.cmpi slt, %8, %11 : vector<16x128xi32>
    %c0_i32_6 = arith.constant 0 : i32
    %13 = arith.cmpi slt, %6, %c0_i32_6 : i32
    %14 = vector.broadcast %13 : i1 to vector<16x128xi1>
    %15 = vector.broadcast %14 : vector<16x128xi1> to vector<16x128xi1>
    %16 = arith.xori %12, %15 : vector<16x128xi1>
    %17 = arith.andi %16, %10 : vector<16x128xi1>
    %18 = vector.broadcast %6 : i32 to vector<16x128xi32>
    %19 = arith.addi %8, %18 : vector<16x128xi32>
    %20 = arith.select %17, %19, %8 : vector<16x128xi1>, vector<16x128xi32>
    %cst = arith.constant 0.000000e+00 : f32
    %21 = vector.broadcast %cst : f32 to vector<16x128xf32>
    %c0_7 = arith.constant 0 : index
    %c0_8 = arith.constant 0 : index
    %c0_9 = arith.constant 0 : index
    %22 = vector.load %arg2[%c0_7, %c0_8, %c0_9] : memref<3x48x128xbf16, #tpu.memory_space<vmem>>, vector<1x48x128xbf16>
    %23 = vector.shape_cast %22 : vector<1x48x128xbf16> to vector<48x128xbf16>
    %cst_10 = arith.constant dense<0.000000e+00> : vector<16x128xf32>
    %24 = tpu.matmul %2, %23, %cst_10 {dimension_numbers = #tpu.dot_dimension_numbers<[1], [0], [0], [1], [0, 0, 1, 1], [], []>} : vector<16x48xbf16>, vector<48x128xbf16>, vector<16x128xf32> -> vector<16x128xf32>
    %cst_11 = arith.constant 0.000000e+00 : f32
    %25 = vector.broadcast %cst_11 : f32 to vector<1x128xf32>
    %26 = vector.extract_strided_slice %24 {offsets = [0, 0], sizes = [15, 128], strides = [1, 1]} : vector<16x128xf32> to vector<15x128xf32>
    %27 = tpu.concatenate %25, %26 in 0 : vector<1x128xf32>, vector<15x128xf32> -> vector<16x128xf32>
    %c-1_i32 = arith.constant -1 : i32
    %28 = vector.broadcast %c-1_i32 : i32 to vector<16x128xi32>
    %29 = arith.addi %20, %28 : vector<16x128xi32>
    %c0_i32_12 = arith.constant 0 : i32
    %30 = vector.broadcast %c0_i32_12 : i32 to vector<16x128xi32>
    %31 = arith.cmpi sge, %29, %30 : vector<16x128xi32>
    %c-1_i32_13 = arith.constant -1 : i32
    %32 = vector.broadcast %c-1_i32_13 : i32 to vector<16x128xi32>
    %33 = arith.addi %20, %32 : vector<16x128xi32>
    %c16_i32_14 = arith.constant 16 : i32
    %34 = vector.broadcast %c16_i32_14 : i32 to vector<16x128xi32>
    %35 = arith.cmpi slt, %33, %34 : vector<16x128xi32>
    %36 = arith.andi %31, %35 : vector<16x128xi1>
    %cst_15 = arith.constant 0.000000e+00 : f32
    %37 = vector.broadcast %cst_15 : f32 to vector<16x128xf32>
    %38 = arith.select %36, %27, %37 : vector<16x128xi1>, vector<16x128xf32>
    %39 = arith.addf %21, %38 : vector<16x128xf32>
    %c1 = arith.constant 1 : index
    %c0_16 = arith.constant 0 : index
    %c0_17 = arith.constant 0 : index
    %40 = vector.load %arg2[%c1, %c0_16, %c0_17] : memref<3x48x128xbf16, #tpu.memory_space<vmem>>, vector<1x48x128xbf16>
    %41 = vector.shape_cast %40 : vector<1x48x128xbf16> to vector<48x128xbf16>
    %cst_18 = arith.constant dense<0.000000e+00> : vector<16x128xf32>
    %42 = tpu.matmul %2, %41, %cst_18 {dimension_numbers = #tpu.dot_dimension_numbers<[1], [0], [0], [1], [0, 0, 1, 1], [], []>} : vector<16x48xbf16>, vector<48x128xbf16>, vector<16x128xf32> -> vector<16x128xf32>
    %43 = arith.addf %39, %42 : vector<16x128xf32>
    %c2 = arith.constant 2 : index
    %c0_19 = arith.constant 0 : index
    %c0_20 = arith.constant 0 : index
    %44 = vector.load %arg2[%c2, %c0_19, %c0_20] : memref<3x48x128xbf16, #tpu.memory_space<vmem>>, vector<1x48x128xbf16>
    %45 = vector.shape_cast %44 : vector<1x48x128xbf16> to vector<48x128xbf16>
    %cst_21 = arith.constant dense<0.000000e+00> : vector<16x128xf32>
    %46 = tpu.matmul %2, %45, %cst_21 {dimension_numbers = #tpu.dot_dimension_numbers<[1], [0], [0], [1], [0, 0, 1, 1], [], []>} : vector<16x48xbf16>, vector<48x128xbf16>, vector<16x128xf32> -> vector<16x128xf32>
    %cst_22 = arith.constant 0.000000e+00 : f32
    %47 = vector.broadcast %cst_22 : f32 to vector<1x128xf32>
    %48 = vector.extract_strided_slice %46 {offsets = [1, 0], sizes = [15, 128], strides = [1, 1]} : vector<16x128xf32> to vector<15x128xf32>
    %49 = tpu.concatenate %48, %47 in 0 : vector<15x128xf32>, vector<1x128xf32> -> vector<16x128xf32>
    %c1_i32_23 = arith.constant 1 : i32
    %50 = vector.broadcast %c1_i32_23 : i32 to vector<16x128xi32>
    %51 = arith.addi %20, %50 : vector<16x128xi32>
    %c0_i32_24 = arith.constant 0 : i32
    %52 = vector.broadcast %c0_i32_24 : i32 to vector<16x128xi32>
    %53 = arith.cmpi sge, %51, %52 : vector<16x128xi32>
    %c1_i32_25 = arith.constant 1 : i32
    %54 = vector.broadcast %c1_i32_25 : i32 to vector<16x128xi32>
    %55 = arith.addi %20, %54 : vector<16x128xi32>
    %c16_i32_26 = arith.constant 16 : i32
    %56 = vector.broadcast %c16_i32_26 : i32 to vector<16x128xi32>
    %57 = arith.cmpi slt, %55, %56 : vector<16x128xi32>
    %58 = arith.andi %53, %57 : vector<16x128xi1>
    %cst_27 = arith.constant 0.000000e+00 : f32
    %59 = vector.broadcast %cst_27 : f32 to vector<16x128xf32>
    %60 = arith.select %58, %49, %59 : vector<16x128xi1>, vector<16x128xf32>
    %61 = arith.addf %43, %60 : vector<16x128xf32>
    %62 = vector.broadcast %3 : vector<1x128xf32> to vector<16x128xf32>
    %63 = arith.addf %61, %62 : vector<16x128xf32>
    %cst_28 = arith.constant 0.000000e+00 : f32
    %64 = vector.broadcast %cst_28 : f32 to vector<16x128xf32>
    %65 = arith.cmpf oge, %63, %64 : vector<16x128xf32>
    %cst_29 = arith.constant 0.00999999977 : f32
    %66 = vector.broadcast %cst_29 : f32 to vector<16x128xf32>
    %67 = arith.mulf %66, %63 : vector<16x128xf32>
    %68 = arith.select %65, %63, %67 : vector<16x128xi1>, vector<16x128xf32>
    %cst_30 = arith.constant dense<0.000000e+00> : vector<128xf32>
    %69 = vector.multi_reduction <add>, %68, %cst_30 [0] : vector<16x128xf32> to vector<128xf32>
    %70 = vector.shape_cast %69 : vector<128xf32> to vector<1x128xf32>
    %71 = arith.mulf %68, %68 : vector<16x128xf32>
    %cst_31 = arith.constant dense<0.000000e+00> : vector<128xf32>
    %72 = vector.multi_reduction <add>, %71, %cst_31 [0] : vector<16x128xf32> to vector<128xf32>
    %73 = vector.shape_cast %72 : vector<128xf32> to vector<1x128xf32>
    %cst_32 = arith.constant 0.000000e+00 : f32
    %74 = vector.broadcast %cst_32 : f32 to vector<6x128xf32>
    %75 = tpu.concatenate %70, %73, %74 in 0 : vector<1x128xf32>, vector<1x128xf32>, vector<6x128xf32> -> vector<8x128xf32>
    %c0_33 = arith.constant 0 : index
    %c0_34 = arith.constant 0 : index
    %c0_35 = arith.constant 0 : index
    %76 = vector.load %arg5[%c0_33, %c0_34, %c0_35] : memref<1x8x128xf32, #tpu.memory_space<vmem>>, vector<1x8x128xf32>
    %77 = vector.shape_cast %76 : vector<1x8x128xf32> to vector<8x128xf32>
    %78 = vector.shape_cast %75 : vector<8x128xf32> to vector<1x8x128xf32>
    tpu.vector_store %arg5[%c0_33, %c0_34, %c0_35], %78 {strides = array<i32>} : memref<1x8x128xf32, #tpu.memory_space<vmem>>, vector<1x8x128xf32>,
    %79 = vector.shape_cast %68 : vector<16x128xf32> to vector<1x16x128xf32>
    %80 = arith.truncf %79 : vector<1x16x128xf32> to vector<1x16x128xbf16>
    %c0_36 = arith.constant 0 : index
    %c0_37 = arith.constant 0 : index
    %c0_38 = arith.constant 0 : index
    %81 = vector.load %arg4[%c0_36, %c0_37, %c0_38] : memref<1x16x128xbf16, #tpu.memory_space<vmem>>, vector<1x16x128xbf16>
    tpu.vector_store %arg4[%c0_36, %c0_37, %c0_38], %80 {strides = array<i32>} : memref<1x16x128xbf16, #tpu.memory_space<vmem>>, vector<1x16x128xbf16>,
    return
  }
  func.func @transform_0(%arg0: i32) -> (i32, i32, i32) {
    %c0_i32 = arith.constant 0 : i32
    %c0_i32_0 = arith.constant 0 : i32
    %c0_i32_1 = arith.constant 0 : i32
    return %arg0, %c0_i32, %c0_i32_0 : i32, i32, i32
  }
  func.func @transform_1(%arg0: i32) -> (i32, i32, i32) {
    %c0_i32 = arith.constant 0 : i32
    %c0_i32_0 = arith.constant 0 : i32
    %c0_i32_1 = arith.constant 0 : i32
    %c0_i32_2 = arith.constant 0 : i32
    return %c0_i32, %c0_i32_0, %c0_i32_1 : i32, i32, i32
  }
  func.func @transform_2(%arg0: i32) -> (i32, i32) {
    %c0_i32 = arith.constant 0 : i32
    %c0_i32_0 = arith.constant 0 : i32
    %c0_i32_1 = arith.constant 0 : i32
    return %c0_i32, %c0_i32_0 : i32, i32
  }
  func.func @transform_3(%arg0: i32) -> (i32, i32, i32) {
    %c0_i32 = arith.constant 0 : i32
    %c0_i32_0 = arith.constant 0 : i32
    %c0_i32_1 = arith.constant 0 : i32
    return %arg0, %c0_i32, %c0_i32_0 : i32, i32, i32
  }
  func.func @transform_4(%arg0: i32) -> (i32, i32, i32) {
    %c0_i32 = arith.constant 0 : i32
    %c0_i32_0 = arith.constant 0 : i32
    %c0_i32_1 = arith.constant 0 : i32
    return %arg0, %c0_i32, %c0_i32_0 : i32, i32, i32
  }
}

module attributes {stable_mosaic.version = 11 : i64} {
  func.func @kernel(%arg0: i32, %arg1: memref<1x16x16xf32, #tpu.memory_space<vmem>>, %arg2: memref<3x16x64xbf16, #tpu.memory_space<vmem>>, %arg3: memref<1x64xf32, #tpu.memory_space<vmem>>, %arg4: memref<3x64x16xbf16, #tpu.memory_space<vmem>>, %arg5: memref<1x16xf32, #tpu.memory_space<vmem>>, %arg6: memref<1x16x16xbf16, #tpu.memory_space<vmem>>) attributes {dimension_semantics = [#tpu.dimension_semantics<parallel>], iteration_bounds = array<i64: 2>, scalar_prefetch = 0 : i64, scratch_operands = 0 : i64, tpu.core_type = #tpu.core_type<tc>, window_params = [{transform_indices = @transform_0, window_bounds = array<i64: 1, 16, 16>}, {pipeline_mode = #tpu.pipeline_mode<synchronous>, transform_indices = @transform_1, window_bounds = array<i64: 3, 16, 64>}, {pipeline_mode = #tpu.pipeline_mode<synchronous>, transform_indices = @transform_2, window_bounds = array<i64: 1, 64>}, {pipeline_mode = #tpu.pipeline_mode<synchronous>, transform_indices = @transform_3, window_bounds = array<i64: 3, 64, 16>}, {pipeline_mode = #tpu.pipeline_mode<synchronous>, transform_indices = @transform_4, window_bounds = array<i64: 1, 16>}, {transform_indices = @transform_5, window_bounds = array<i64: 1, 16, 16>}]} {
    %c0 = arith.constant 0 : index
    %c0_0 = arith.constant 0 : index
    %c0_1 = arith.constant 0 : index
    %0 = vector.load %arg1[%c0, %c0_0, %c0_1] : memref<1x16x16xf32, #tpu.memory_space<vmem>>, vector<1x16x16xf32>
    %1 = vector.shape_cast %0 : vector<1x16x16xf32> to vector<16x16xf32>
    %2 = arith.truncf %1 : vector<16x16xf32> to vector<16x16xbf16>
    %c0_2 = arith.constant 0 : index
    %c0_3 = arith.constant 0 : index
    %3 = vector.load %arg3[%c0_2, %c0_3] : memref<1x64xf32, #tpu.memory_space<vmem>>, vector<1x64xf32>
    %4 = tpu.iota {dimensions = array<i32: 0>} : vector<16x64xi32>
    %c16_i32 = arith.constant 16 : i32
    %c0_i32 = arith.constant 0 : i32
    %5 = arith.cmpi eq, %c16_i32, %c0_i32 : i32
    %c1_i32 = arith.constant 1 : i32
    %6 = arith.select %5, %c1_i32, %c16_i32 : i32
    %7 = vector.broadcast %6 : i32 to vector<16x64xi32>
    %8 = arith.remsi %4, %7 : vector<16x64xi32>
    %c0_i32_4 = arith.constant 0 : i32
    %9 = vector.broadcast %c0_i32_4 : i32 to vector<16x64xi32>
    %10 = arith.cmpi ne, %8, %9 : vector<16x64xi32>
    %c0_i32_5 = arith.constant 0 : i32
    %11 = vector.broadcast %c0_i32_5 : i32 to vector<16x64xi32>
    %12 = arith.cmpi slt, %8, %11 : vector<16x64xi32>
    %c0_i32_6 = arith.constant 0 : i32
    %13 = arith.cmpi slt, %6, %c0_i32_6 : i32
    %14 = vector.broadcast %13 : i1 to vector<16x64xi1>
    %15 = vector.broadcast %14 : vector<16x64xi1> to vector<16x64xi1>
    %16 = arith.xori %12, %15 : vector<16x64xi1>
    %17 = arith.andi %16, %10 : vector<16x64xi1>
    %18 = vector.broadcast %6 : i32 to vector<16x64xi32>
    %19 = arith.addi %8, %18 : vector<16x64xi32>
    %20 = arith.select %17, %19, %8 : vector<16x64xi1>, vector<16x64xi32>
    %cst = arith.constant 0.000000e+00 : f32
    %21 = vector.broadcast %cst : f32 to vector<16x64xf32>
    %c0_7 = arith.constant 0 : index
    %c0_8 = arith.constant 0 : index
    %c0_9 = arith.constant 0 : index
    %22 = vector.load %arg2[%c0_7, %c0_8, %c0_9] : memref<3x16x64xbf16, #tpu.memory_space<vmem>>, vector<1x16x64xbf16>
    %23 = vector.shape_cast %22 : vector<1x16x64xbf16> to vector<16x64xbf16>
    %cst_10 = arith.constant dense<0.000000e+00> : vector<16x64xf32>
    %24 = tpu.matmul %2, %23, %cst_10 {dimension_numbers = #tpu.dot_dimension_numbers<[1], [0], [0], [1], [0, 0, 1, 1], [], []>} : vector<16x16xbf16>, vector<16x64xbf16>, vector<16x64xf32> -> vector<16x64xf32>
    %cst_11 = arith.constant 0.000000e+00 : f32
    %25 = vector.broadcast %cst_11 : f32 to vector<1x64xf32>
    %26 = vector.extract_strided_slice %24 {offsets = [0, 0], sizes = [15, 64], strides = [1, 1]} : vector<16x64xf32> to vector<15x64xf32>
    %27 = tpu.concatenate %25, %26 in 0 : vector<1x64xf32>, vector<15x64xf32> -> vector<16x64xf32>
    %c-1_i32 = arith.constant -1 : i32
    %28 = vector.broadcast %c-1_i32 : i32 to vector<16x64xi32>
    %29 = arith.addi %20, %28 : vector<16x64xi32>
    %c0_i32_12 = arith.constant 0 : i32
    %30 = vector.broadcast %c0_i32_12 : i32 to vector<16x64xi32>
    %31 = arith.cmpi sge, %29, %30 : vector<16x64xi32>
    %c-1_i32_13 = arith.constant -1 : i32
    %32 = vector.broadcast %c-1_i32_13 : i32 to vector<16x64xi32>
    %33 = arith.addi %20, %32 : vector<16x64xi32>
    %c16_i32_14 = arith.constant 16 : i32
    %34 = vector.broadcast %c16_i32_14 : i32 to vector<16x64xi32>
    %35 = arith.cmpi slt, %33, %34 : vector<16x64xi32>
    %36 = arith.andi %31, %35 : vector<16x64xi1>
    %cst_15 = arith.constant 0.000000e+00 : f32
    %37 = vector.broadcast %cst_15 : f32 to vector<16x64xf32>
    %38 = arith.select %36, %27, %37 : vector<16x64xi1>, vector<16x64xf32>
    %39 = arith.addf %21, %38 : vector<16x64xf32>
    %c1 = arith.constant 1 : index
    %c0_16 = arith.constant 0 : index
    %c0_17 = arith.constant 0 : index
    %40 = vector.load %arg2[%c1, %c0_16, %c0_17] : memref<3x16x64xbf16, #tpu.memory_space<vmem>>, vector<1x16x64xbf16>
    %41 = vector.shape_cast %40 : vector<1x16x64xbf16> to vector<16x64xbf16>
    %cst_18 = arith.constant dense<0.000000e+00> : vector<16x64xf32>
    %42 = tpu.matmul %2, %41, %cst_18 {dimension_numbers = #tpu.dot_dimension_numbers<[1], [0], [0], [1], [0, 0, 1, 1], [], []>} : vector<16x16xbf16>, vector<16x64xbf16>, vector<16x64xf32> -> vector<16x64xf32>
    %43 = arith.addf %39, %42 : vector<16x64xf32>
    %c2 = arith.constant 2 : index
    %c0_19 = arith.constant 0 : index
    %c0_20 = arith.constant 0 : index
    %44 = vector.load %arg2[%c2, %c0_19, %c0_20] : memref<3x16x64xbf16, #tpu.memory_space<vmem>>, vector<1x16x64xbf16>
    %45 = vector.shape_cast %44 : vector<1x16x64xbf16> to vector<16x64xbf16>
    %cst_21 = arith.constant dense<0.000000e+00> : vector<16x64xf32>
    %46 = tpu.matmul %2, %45, %cst_21 {dimension_numbers = #tpu.dot_dimension_numbers<[1], [0], [0], [1], [0, 0, 1, 1], [], []>} : vector<16x16xbf16>, vector<16x64xbf16>, vector<16x64xf32> -> vector<16x64xf32>
    %cst_22 = arith.constant 0.000000e+00 : f32
    %47 = vector.broadcast %cst_22 : f32 to vector<1x64xf32>
    %48 = vector.extract_strided_slice %46 {offsets = [1, 0], sizes = [15, 64], strides = [1, 1]} : vector<16x64xf32> to vector<15x64xf32>
    %49 = tpu.concatenate %48, %47 in 0 : vector<15x64xf32>, vector<1x64xf32> -> vector<16x64xf32>
    %c1_i32_23 = arith.constant 1 : i32
    %50 = vector.broadcast %c1_i32_23 : i32 to vector<16x64xi32>
    %51 = arith.addi %20, %50 : vector<16x64xi32>
    %c0_i32_24 = arith.constant 0 : i32
    %52 = vector.broadcast %c0_i32_24 : i32 to vector<16x64xi32>
    %53 = arith.cmpi sge, %51, %52 : vector<16x64xi32>
    %c1_i32_25 = arith.constant 1 : i32
    %54 = vector.broadcast %c1_i32_25 : i32 to vector<16x64xi32>
    %55 = arith.addi %20, %54 : vector<16x64xi32>
    %c16_i32_26 = arith.constant 16 : i32
    %56 = vector.broadcast %c16_i32_26 : i32 to vector<16x64xi32>
    %57 = arith.cmpi slt, %55, %56 : vector<16x64xi32>
    %58 = arith.andi %53, %57 : vector<16x64xi1>
    %cst_27 = arith.constant 0.000000e+00 : f32
    %59 = vector.broadcast %cst_27 : f32 to vector<16x64xf32>
    %60 = arith.select %58, %49, %59 : vector<16x64xi1>, vector<16x64xf32>
    %61 = arith.addf %43, %60 : vector<16x64xf32>
    %62 = vector.broadcast %3 : vector<1x64xf32> to vector<16x64xf32>
    %63 = arith.addf %61, %62 : vector<16x64xf32>
    %64 = arith.truncf %63 : vector<16x64xf32> to vector<16x64xbf16>
    %c0_28 = arith.constant 0 : index
    %c0_29 = arith.constant 0 : index
    %65 = vector.load %arg5[%c0_28, %c0_29] : memref<1x16xf32, #tpu.memory_space<vmem>>, vector<1x16xf32>
    %66 = tpu.iota {dimensions = array<i32: 0>} : vector<16x16xi32>
    %c16_i32_30 = arith.constant 16 : i32
    %c0_i32_31 = arith.constant 0 : i32
    %67 = arith.cmpi eq, %c16_i32_30, %c0_i32_31 : i32
    %c1_i32_32 = arith.constant 1 : i32
    %68 = arith.select %67, %c1_i32_32, %c16_i32_30 : i32
    %69 = vector.broadcast %68 : i32 to vector<16x16xi32>
    %70 = arith.remsi %66, %69 : vector<16x16xi32>
    %c0_i32_33 = arith.constant 0 : i32
    %71 = vector.broadcast %c0_i32_33 : i32 to vector<16x16xi32>
    %72 = arith.cmpi ne, %70, %71 : vector<16x16xi32>
    %c0_i32_34 = arith.constant 0 : i32
    %73 = vector.broadcast %c0_i32_34 : i32 to vector<16x16xi32>
    %74 = arith.cmpi slt, %70, %73 : vector<16x16xi32>
    %c0_i32_35 = arith.constant 0 : i32
    %75 = arith.cmpi slt, %68, %c0_i32_35 : i32
    %76 = vector.broadcast %75 : i1 to vector<16x16xi1>
    %77 = vector.broadcast %76 : vector<16x16xi1> to vector<16x16xi1>
    %78 = arith.xori %74, %77 : vector<16x16xi1>
    %79 = arith.andi %78, %72 : vector<16x16xi1>
    %80 = vector.broadcast %68 : i32 to vector<16x16xi32>
    %81 = arith.addi %70, %80 : vector<16x16xi32>
    %82 = arith.select %79, %81, %70 : vector<16x16xi1>, vector<16x16xi32>
    %cst_36 = arith.constant 0.000000e+00 : f32
    %83 = vector.broadcast %cst_36 : f32 to vector<16x16xf32>
    %c0_37 = arith.constant 0 : index
    %c0_38 = arith.constant 0 : index
    %c0_39 = arith.constant 0 : index
    %84 = vector.load %arg4[%c0_37, %c0_38, %c0_39] : memref<3x64x16xbf16, #tpu.memory_space<vmem>>, vector<1x64x16xbf16>
    %85 = vector.shape_cast %84 : vector<1x64x16xbf16> to vector<64x16xbf16>
    %cst_40 = arith.constant dense<0.000000e+00> : vector<16x16xf32>
    %86 = tpu.matmul %64, %85, %cst_40 {dimension_numbers = #tpu.dot_dimension_numbers<[1], [0], [0], [1], [0, 0, 1, 1], [], []>} : vector<16x64xbf16>, vector<64x16xbf16>, vector<16x16xf32> -> vector<16x16xf32>
    %cst_41 = arith.constant 0.000000e+00 : f32
    %87 = vector.broadcast %cst_41 : f32 to vector<1x16xf32>
    %88 = vector.extract_strided_slice %86 {offsets = [0, 0], sizes = [15, 16], strides = [1, 1]} : vector<16x16xf32> to vector<15x16xf32>
    %89 = tpu.concatenate %87, %88 in 0 : vector<1x16xf32>, vector<15x16xf32> -> vector<16x16xf32>
    %c-1_i32_42 = arith.constant -1 : i32
    %90 = vector.broadcast %c-1_i32_42 : i32 to vector<16x16xi32>
    %91 = arith.addi %82, %90 : vector<16x16xi32>
    %c0_i32_43 = arith.constant 0 : i32
    %92 = vector.broadcast %c0_i32_43 : i32 to vector<16x16xi32>
    %93 = arith.cmpi sge, %91, %92 : vector<16x16xi32>
    %c-1_i32_44 = arith.constant -1 : i32
    %94 = vector.broadcast %c-1_i32_44 : i32 to vector<16x16xi32>
    %95 = arith.addi %82, %94 : vector<16x16xi32>
    %c16_i32_45 = arith.constant 16 : i32
    %96 = vector.broadcast %c16_i32_45 : i32 to vector<16x16xi32>
    %97 = arith.cmpi slt, %95, %96 : vector<16x16xi32>
    %98 = arith.andi %93, %97 : vector<16x16xi1>
    %cst_46 = arith.constant 0.000000e+00 : f32
    %99 = vector.broadcast %cst_46 : f32 to vector<16x16xf32>
    %100 = arith.select %98, %89, %99 : vector<16x16xi1>, vector<16x16xf32>
    %101 = arith.addf %83, %100 : vector<16x16xf32>
    %c1_47 = arith.constant 1 : index
    %c0_48 = arith.constant 0 : index
    %c0_49 = arith.constant 0 : index
    %102 = vector.load %arg4[%c1_47, %c0_48, %c0_49] : memref<3x64x16xbf16, #tpu.memory_space<vmem>>, vector<1x64x16xbf16>
    %103 = vector.shape_cast %102 : vector<1x64x16xbf16> to vector<64x16xbf16>
    %cst_50 = arith.constant dense<0.000000e+00> : vector<16x16xf32>
    %104 = tpu.matmul %64, %103, %cst_50 {dimension_numbers = #tpu.dot_dimension_numbers<[1], [0], [0], [1], [0, 0, 1, 1], [], []>} : vector<16x64xbf16>, vector<64x16xbf16>, vector<16x16xf32> -> vector<16x16xf32>
    %105 = arith.addf %101, %104 : vector<16x16xf32>
    %c2_51 = arith.constant 2 : index
    %c0_52 = arith.constant 0 : index
    %c0_53 = arith.constant 0 : index
    %106 = vector.load %arg4[%c2_51, %c0_52, %c0_53] : memref<3x64x16xbf16, #tpu.memory_space<vmem>>, vector<1x64x16xbf16>
    %107 = vector.shape_cast %106 : vector<1x64x16xbf16> to vector<64x16xbf16>
    %cst_54 = arith.constant dense<0.000000e+00> : vector<16x16xf32>
    %108 = tpu.matmul %64, %107, %cst_54 {dimension_numbers = #tpu.dot_dimension_numbers<[1], [0], [0], [1], [0, 0, 1, 1], [], []>} : vector<16x64xbf16>, vector<64x16xbf16>, vector<16x16xf32> -> vector<16x16xf32>
    %cst_55 = arith.constant 0.000000e+00 : f32
    %109 = vector.broadcast %cst_55 : f32 to vector<1x16xf32>
    %110 = vector.extract_strided_slice %108 {offsets = [1, 0], sizes = [15, 16], strides = [1, 1]} : vector<16x16xf32> to vector<15x16xf32>
    %111 = tpu.concatenate %110, %109 in 0 : vector<15x16xf32>, vector<1x16xf32> -> vector<16x16xf32>
    %c1_i32_56 = arith.constant 1 : i32
    %112 = vector.broadcast %c1_i32_56 : i32 to vector<16x16xi32>
    %113 = arith.addi %82, %112 : vector<16x16xi32>
    %c0_i32_57 = arith.constant 0 : i32
    %114 = vector.broadcast %c0_i32_57 : i32 to vector<16x16xi32>
    %115 = arith.cmpi sge, %113, %114 : vector<16x16xi32>
    %c1_i32_58 = arith.constant 1 : i32
    %116 = vector.broadcast %c1_i32_58 : i32 to vector<16x16xi32>
    %117 = arith.addi %82, %116 : vector<16x16xi32>
    %c16_i32_59 = arith.constant 16 : i32
    %118 = vector.broadcast %c16_i32_59 : i32 to vector<16x16xi32>
    %119 = arith.cmpi slt, %117, %118 : vector<16x16xi32>
    %120 = arith.andi %115, %119 : vector<16x16xi1>
    %cst_60 = arith.constant 0.000000e+00 : f32
    %121 = vector.broadcast %cst_60 : f32 to vector<16x16xf32>
    %122 = arith.select %120, %111, %121 : vector<16x16xi1>, vector<16x16xf32>
    %123 = arith.addf %105, %122 : vector<16x16xf32>
    %124 = vector.broadcast %65 : vector<1x16xf32> to vector<16x16xf32>
    %125 = arith.addf %123, %124 : vector<16x16xf32>
    %126 = vector.shape_cast %125 : vector<16x16xf32> to vector<1x16x16xf32>
    %127 = arith.truncf %126 : vector<1x16x16xf32> to vector<1x16x16xbf16>
    %c0_61 = arith.constant 0 : index
    %c0_62 = arith.constant 0 : index
    %c0_63 = arith.constant 0 : index
    %128 = vector.load %arg6[%c0_61, %c0_62, %c0_63] : memref<1x16x16xbf16, #tpu.memory_space<vmem>>, vector<1x16x16xbf16>
    tpu.vector_store %arg6[%c0_61, %c0_62, %c0_63], %127 {strides = array<i32>} : memref<1x16x16xbf16, #tpu.memory_space<vmem>>, vector<1x16x16xbf16>,
    return
  }
  func.func @transform_0(%arg0: i32) -> (i32, i32, i32) {
    %c0_i32 = arith.constant 0 : i32
    %c0_i32_0 = arith.constant 0 : i32
    %c0_i32_1 = arith.constant 0 : i32
    return %arg0, %c0_i32, %c0_i32_0 : i32, i32, i32
  }
  func.func @transform_1(%arg0: i32) -> (i32, i32, i32) {
    %c0_i32 = arith.constant 0 : i32
    %c0_i32_0 = arith.constant 0 : i32
    %c0_i32_1 = arith.constant 0 : i32
    %c0_i32_2 = arith.constant 0 : i32
    return %c0_i32, %c0_i32_0, %c0_i32_1 : i32, i32, i32
  }
  func.func @transform_2(%arg0: i32) -> (i32, i32) {
    %c0_i32 = arith.constant 0 : i32
    %c0_i32_0 = arith.constant 0 : i32
    %c0_i32_1 = arith.constant 0 : i32
    return %c0_i32, %c0_i32_0 : i32, i32
  }
  func.func @transform_3(%arg0: i32) -> (i32, i32, i32) {
    %c0_i32 = arith.constant 0 : i32
    %c0_i32_0 = arith.constant 0 : i32
    %c0_i32_1 = arith.constant 0 : i32
    %c0_i32_2 = arith.constant 0 : i32
    return %c0_i32, %c0_i32_0, %c0_i32_1 : i32, i32, i32
  }
  func.func @transform_4(%arg0: i32) -> (i32, i32) {
    %c0_i32 = arith.constant 0 : i32
    %c0_i32_0 = arith.constant 0 : i32
    %c0_i32_1 = arith.constant 0 : i32
    return %c0_i32, %c0_i32_0 : i32, i32
  }
  func.func @transform_5(%arg0: i32) -> (i32, i32, i32) {
    %c0_i32 = arith.constant 0 : i32
    %c0_i32_0 = arith.constant 0 : i32
    %c0_i32_1 = arith.constant 0 : i32
    return %arg0, %c0_i32, %c0_i32_0 : i32, i32, i32
  }
}

module attributes {stable_mosaic.version = 11 : i64} {
  func.func @kernel(%arg0: i32, %arg1: memref<1x16x128xbf16, #tpu.memory_space<vmem>>, %arg2: memref<1x128xf32, #tpu.memory_space<vmem>>, %arg3: memref<1x128xf32, #tpu.memory_space<vmem>>, %arg4: memref<1x16x16xbf16, #tpu.memory_space<vmem>>, %arg5: memref<3x128x128xbf16, #tpu.memory_space<vmem>>, %arg6: memref<3x16x128xbf16, #tpu.memory_space<vmem>>, %arg7: memref<1x128xf32, #tpu.memory_space<vmem>>, %arg8: memref<1x16x128xbf16, #tpu.memory_space<vmem>>, %arg9: memref<1x8x128xf32, #tpu.memory_space<vmem>>) attributes {dimension_semantics = [#tpu.dimension_semantics<parallel>], iteration_bounds = array<i64: 2>, scalar_prefetch = 0 : i64, scratch_operands = 0 : i64, tpu.core_type = #tpu.core_type<tc>, window_params = [{transform_indices = @transform_0, window_bounds = array<i64: 1, 16, 128>}, {pipeline_mode = #tpu.pipeline_mode<synchronous>, transform_indices = @transform_1, window_bounds = array<i64: 1, 128>}, {pipeline_mode = #tpu.pipeline_mode<synchronous>, transform_indices = @transform_2, window_bounds = array<i64: 1, 128>}, {transform_indices = @transform_3, window_bounds = array<i64: 1, 16, 16>}, {pipeline_mode = #tpu.pipeline_mode<synchronous>, transform_indices = @transform_4, window_bounds = array<i64: 3, 128, 128>}, {pipeline_mode = #tpu.pipeline_mode<synchronous>, transform_indices = @transform_5, window_bounds = array<i64: 3, 16, 128>}, {pipeline_mode = #tpu.pipeline_mode<synchronous>, transform_indices = @transform_6, window_bounds = array<i64: 1, 128>}, {transform_indices = @transform_7, window_bounds = array<i64: 1, 16, 128>}, {transform_indices = @transform_8, window_bounds = array<i64: 1, 8, 128>}]} {
    %c0 = arith.constant 0 : index
    %c0_0 = arith.constant 0 : index
    %c0_1 = arith.constant 0 : index
    %0 = vector.load %arg1[%c0, %c0_0, %c0_1] : memref<1x16x128xbf16, #tpu.memory_space<vmem>>, vector<1x16x128xbf16>
    %1 = vector.shape_cast %0 : vector<1x16x128xbf16> to vector<16x128xbf16>
    %c0_2 = arith.constant 0 : index
    %c0_3 = arith.constant 0 : index
    %2 = vector.load %arg2[%c0_2, %c0_3] : memref<1x128xf32, #tpu.memory_space<vmem>>, vector<1x128xf32>
    %c0_4 = arith.constant 0 : index
    %c0_5 = arith.constant 0 : index
    %3 = vector.load %arg3[%c0_4, %c0_5] : memref<1x128xf32, #tpu.memory_space<vmem>>, vector<1x128xf32>
    %4 = arith.extf %1 : vector<16x128xbf16> to vector<16x128xf32>
    %5 = vector.broadcast %2 : vector<1x128xf32> to vector<16x128xf32>
    %6 = arith.mulf %4, %5 : vector<16x128xf32>
    %7 = vector.broadcast %3 : vector<1x128xf32> to vector<16x128xf32>
    %8 = arith.addf %6, %7 : vector<16x128xf32>
    %9 = arith.truncf %8 : vector<16x128xf32> to vector<16x128xbf16>
    %c0_6 = arith.constant 0 : index
    %c0_7 = arith.constant 0 : index
    %c0_8 = arith.constant 0 : index
    %10 = vector.load %arg4[%c0_6, %c0_7, %c0_8] : memref<1x16x16xbf16, #tpu.memory_space<vmem>>, vector<1x16x16xbf16>
    %11 = vector.shape_cast %10 : vector<1x16x16xbf16> to vector<16x16xbf16>
    %c0_9 = arith.constant 0 : index
    %c0_10 = arith.constant 0 : index
    %12 = vector.load %arg7[%c0_9, %c0_10] : memref<1x128xf32, #tpu.memory_space<vmem>>, vector<1x128xf32>
    %13 = tpu.iota {dimensions = array<i32: 0>} : vector<16x128xi32>
    %c16_i32 = arith.constant 16 : i32
    %c0_i32 = arith.constant 0 : i32
    %14 = arith.cmpi eq, %c16_i32, %c0_i32 : i32
    %c1_i32 = arith.constant 1 : i32
    %15 = arith.select %14, %c1_i32, %c16_i32 : i32
    %16 = vector.broadcast %15 : i32 to vector<16x128xi32>
    %17 = arith.remsi %13, %16 : vector<16x128xi32>
    %c0_i32_11 = arith.constant 0 : i32
    %18 = vector.broadcast %c0_i32_11 : i32 to vector<16x128xi32>
    %19 = arith.cmpi ne, %17, %18 : vector<16x128xi32>
    %c0_i32_12 = arith.constant 0 : i32
    %20 = vector.broadcast %c0_i32_12 : i32 to vector<16x128xi32>
    %21 = arith.cmpi slt, %17, %20 : vector<16x128xi32>
    %c0_i32_13 = arith.constant 0 : i32
    %22 = arith.cmpi slt, %15, %c0_i32_13 : i32
    %23 = vector.broadcast %22 : i1 to vector<16x128xi1>
    %24 = vector.broadcast %23 : vector<16x128xi1> to vector<16x128xi1>
    %25 = arith.xori %21, %24 : vector<16x128xi1>
    %26 = arith.andi %25, %19 : vector<16x128xi1>
    %27 = vector.broadcast %15 : i32 to vector<16x128xi32>
    %28 = arith.addi %17, %27 : vector<16x128xi32>
    %29 = arith.select %26, %28, %17 : vector<16x128xi1>, vector<16x128xi32>
    %cst = arith.constant 0.000000e+00 : f32
    %30 = vector.broadcast %cst : f32 to vector<16x128xf32>
    %c0_14 = arith.constant 0 : index
    %c0_15 = arith.constant 0 : index
    %c0_16 = arith.constant 0 : index
    %31 = vector.load %arg5[%c0_14, %c0_15, %c0_16] : memref<3x128x128xbf16, #tpu.memory_space<vmem>>, vector<1x128x128xbf16>
    %32 = vector.shape_cast %31 : vector<1x128x128xbf16> to vector<128x128xbf16>
    %cst_17 = arith.constant dense<0.000000e+00> : vector<16x128xf32>
    %33 = tpu.matmul %9, %32, %cst_17 {dimension_numbers = #tpu.dot_dimension_numbers<[1], [0], [0], [1], [0, 0, 1, 1], [], []>} : vector<16x128xbf16>, vector<128x128xbf16>, vector<16x128xf32> -> vector<16x128xf32>
    %c0_18 = arith.constant 0 : index
    %c0_19 = arith.constant 0 : index
    %c0_20 = arith.constant 0 : index
    %34 = vector.load %arg6[%c0_18, %c0_19, %c0_20] : memref<3x16x128xbf16, #tpu.memory_space<vmem>>, vector<1x16x128xbf16>
    %35 = vector.shape_cast %34 : vector<1x16x128xbf16> to vector<16x128xbf16>
    %cst_21 = arith.constant dense<0.000000e+00> : vector<16x128xf32>
    %36 = tpu.matmul %11, %35, %cst_21 {dimension_numbers = #tpu.dot_dimension_numbers<[1], [0], [0], [1], [0, 0, 1, 1], [], []>} : vector<16x16xbf16>, vector<16x128xbf16>, vector<16x128xf32> -> vector<16x128xf32>
    %37 = arith.addf %33, %36 : vector<16x128xf32>
    %cst_22 = arith.constant 0.000000e+00 : f32
    %38 = vector.broadcast %cst_22 : f32 to vector<1x128xf32>
    %39 = vector.extract_strided_slice %37 {offsets = [0, 0], sizes = [15, 128], strides = [1, 1]} : vector<16x128xf32> to vector<15x128xf32>
    %40 = tpu.concatenate %38, %39 in 0 : vector<1x128xf32>, vector<15x128xf32> -> vector<16x128xf32>
    %c-1_i32 = arith.constant -1 : i32
    %41 = vector.broadcast %c-1_i32 : i32 to vector<16x128xi32>
    %42 = arith.addi %29, %41 : vector<16x128xi32>
    %c0_i32_23 = arith.constant 0 : i32
    %43 = vector.broadcast %c0_i32_23 : i32 to vector<16x128xi32>
    %44 = arith.cmpi sge, %42, %43 : vector<16x128xi32>
    %c-1_i32_24 = arith.constant -1 : i32
    %45 = vector.broadcast %c-1_i32_24 : i32 to vector<16x128xi32>
    %46 = arith.addi %29, %45 : vector<16x128xi32>
    %c16_i32_25 = arith.constant 16 : i32
    %47 = vector.broadcast %c16_i32_25 : i32 to vector<16x128xi32>
    %48 = arith.cmpi slt, %46, %47 : vector<16x128xi32>
    %49 = arith.andi %44, %48 : vector<16x128xi1>
    %cst_26 = arith.constant 0.000000e+00 : f32
    %50 = vector.broadcast %cst_26 : f32 to vector<16x128xf32>
    %51 = arith.select %49, %40, %50 : vector<16x128xi1>, vector<16x128xf32>
    %52 = arith.addf %30, %51 : vector<16x128xf32>
    %c1 = arith.constant 1 : index
    %c0_27 = arith.constant 0 : index
    %c0_28 = arith.constant 0 : index
    %53 = vector.load %arg5[%c1, %c0_27, %c0_28] : memref<3x128x128xbf16, #tpu.memory_space<vmem>>, vector<1x128x128xbf16>
    %54 = vector.shape_cast %53 : vector<1x128x128xbf16> to vector<128x128xbf16>
    %cst_29 = arith.constant dense<0.000000e+00> : vector<16x128xf32>
    %55 = tpu.matmul %9, %54, %cst_29 {dimension_numbers = #tpu.dot_dimension_numbers<[1], [0], [0], [1], [0, 0, 1, 1], [], []>} : vector<16x128xbf16>, vector<128x128xbf16>, vector<16x128xf32> -> vector<16x128xf32>
    %c1_30 = arith.constant 1 : index
    %c0_31 = arith.constant 0 : index
    %c0_32 = arith.constant 0 : index
    %56 = vector.load %arg6[%c1_30, %c0_31, %c0_32] : memref<3x16x128xbf16, #tpu.memory_space<vmem>>, vector<1x16x128xbf16>
    %57 = vector.shape_cast %56 : vector<1x16x128xbf16> to vector<16x128xbf16>
    %cst_33 = arith.constant dense<0.000000e+00> : vector<16x128xf32>
    %58 = tpu.matmul %11, %57, %cst_33 {dimension_numbers = #tpu.dot_dimension_numbers<[1], [0], [0], [1], [0, 0, 1, 1], [], []>} : vector<16x16xbf16>, vector<16x128xbf16>, vector<16x128xf32> -> vector<16x128xf32>
    %59 = arith.addf %55, %58 : vector<16x128xf32>
    %60 = arith.addf %52, %59 : vector<16x128xf32>
    %c2 = arith.constant 2 : index
    %c0_34 = arith.constant 0 : index
    %c0_35 = arith.constant 0 : index
    %61 = vector.load %arg5[%c2, %c0_34, %c0_35] : memref<3x128x128xbf16, #tpu.memory_space<vmem>>, vector<1x128x128xbf16>
    %62 = vector.shape_cast %61 : vector<1x128x128xbf16> to vector<128x128xbf16>
    %cst_36 = arith.constant dense<0.000000e+00> : vector<16x128xf32>
    %63 = tpu.matmul %9, %62, %cst_36 {dimension_numbers = #tpu.dot_dimension_numbers<[1], [0], [0], [1], [0, 0, 1, 1], [], []>} : vector<16x128xbf16>, vector<128x128xbf16>, vector<16x128xf32> -> vector<16x128xf32>
    %c2_37 = arith.constant 2 : index
    %c0_38 = arith.constant 0 : index
    %c0_39 = arith.constant 0 : index
    %64 = vector.load %arg6[%c2_37, %c0_38, %c0_39] : memref<3x16x128xbf16, #tpu.memory_space<vmem>>, vector<1x16x128xbf16>
    %65 = vector.shape_cast %64 : vector<1x16x128xbf16> to vector<16x128xbf16>
    %cst_40 = arith.constant dense<0.000000e+00> : vector<16x128xf32>
    %66 = tpu.matmul %11, %65, %cst_40 {dimension_numbers = #tpu.dot_dimension_numbers<[1], [0], [0], [1], [0, 0, 1, 1], [], []>} : vector<16x16xbf16>, vector<16x128xbf16>, vector<16x128xf32> -> vector<16x128xf32>
    %67 = arith.addf %63, %66 : vector<16x128xf32>
    %cst_41 = arith.constant 0.000000e+00 : f32
    %68 = vector.broadcast %cst_41 : f32 to vector<1x128xf32>
    %69 = vector.extract_strided_slice %67 {offsets = [1, 0], sizes = [15, 128], strides = [1, 1]} : vector<16x128xf32> to vector<15x128xf32>
    %70 = tpu.concatenate %69, %68 in 0 : vector<15x128xf32>, vector<1x128xf32> -> vector<16x128xf32>
    %c1_i32_42 = arith.constant 1 : i32
    %71 = vector.broadcast %c1_i32_42 : i32 to vector<16x128xi32>
    %72 = arith.addi %29, %71 : vector<16x128xi32>
    %c0_i32_43 = arith.constant 0 : i32
    %73 = vector.broadcast %c0_i32_43 : i32 to vector<16x128xi32>
    %74 = arith.cmpi sge, %72, %73 : vector<16x128xi32>
    %c1_i32_44 = arith.constant 1 : i32
    %75 = vector.broadcast %c1_i32_44 : i32 to vector<16x128xi32>
    %76 = arith.addi %29, %75 : vector<16x128xi32>
    %c16_i32_45 = arith.constant 16 : i32
    %77 = vector.broadcast %c16_i32_45 : i32 to vector<16x128xi32>
    %78 = arith.cmpi slt, %76, %77 : vector<16x128xi32>
    %79 = arith.andi %74, %78 : vector<16x128xi1>
    %cst_46 = arith.constant 0.000000e+00 : f32
    %80 = vector.broadcast %cst_46 : f32 to vector<16x128xf32>
    %81 = arith.select %79, %70, %80 : vector<16x128xi1>, vector<16x128xf32>
    %82 = arith.addf %60, %81 : vector<16x128xf32>
    %83 = vector.broadcast %12 : vector<1x128xf32> to vector<16x128xf32>
    %84 = arith.addf %82, %83 : vector<16x128xf32>
    %cst_47 = arith.constant 0.000000e+00 : f32
    %85 = vector.broadcast %cst_47 : f32 to vector<16x128xf32>
    %86 = arith.cmpf oge, %84, %85 : vector<16x128xf32>
    %cst_48 = arith.constant 0.00999999977 : f32
    %87 = vector.broadcast %cst_48 : f32 to vector<16x128xf32>
    %88 = arith.mulf %87, %84 : vector<16x128xf32>
    %89 = arith.select %86, %84, %88 : vector<16x128xi1>, vector<16x128xf32>
    %cst_49 = arith.constant dense<0.000000e+00> : vector<128xf32>
    %90 = vector.multi_reduction <add>, %89, %cst_49 [0] : vector<16x128xf32> to vector<128xf32>
    %91 = vector.shape_cast %90 : vector<128xf32> to vector<1x128xf32>
    %92 = arith.mulf %89, %89 : vector<16x128xf32>
    %cst_50 = arith.constant dense<0.000000e+00> : vector<128xf32>
    %93 = vector.multi_reduction <add>, %92, %cst_50 [0] : vector<16x128xf32> to vector<128xf32>
    %94 = vector.shape_cast %93 : vector<128xf32> to vector<1x128xf32>
    %cst_51 = arith.constant 0.000000e+00 : f32
    %95 = vector.broadcast %cst_51 : f32 to vector<6x128xf32>
    %96 = tpu.concatenate %91, %94, %95 in 0 : vector<1x128xf32>, vector<1x128xf32>, vector<6x128xf32> -> vector<8x128xf32>
    %c0_52 = arith.constant 0 : index
    %c0_53 = arith.constant 0 : index
    %c0_54 = arith.constant 0 : index
    %97 = vector.load %arg9[%c0_52, %c0_53, %c0_54] : memref<1x8x128xf32, #tpu.memory_space<vmem>>, vector<1x8x128xf32>
    %98 = vector.shape_cast %97 : vector<1x8x128xf32> to vector<8x128xf32>
    %99 = vector.shape_cast %96 : vector<8x128xf32> to vector<1x8x128xf32>
    tpu.vector_store %arg9[%c0_52, %c0_53, %c0_54], %99 {strides = array<i32>} : memref<1x8x128xf32, #tpu.memory_space<vmem>>, vector<1x8x128xf32>,
    %100 = vector.shape_cast %89 : vector<16x128xf32> to vector<1x16x128xf32>
    %101 = arith.truncf %100 : vector<1x16x128xf32> to vector<1x16x128xbf16>
    %c0_55 = arith.constant 0 : index
    %c0_56 = arith.constant 0 : index
    %c0_57 = arith.constant 0 : index
    %102 = vector.load %arg8[%c0_55, %c0_56, %c0_57] : memref<1x16x128xbf16, #tpu.memory_space<vmem>>, vector<1x16x128xbf16>
    tpu.vector_store %arg8[%c0_55, %c0_56, %c0_57], %101 {strides = array<i32>} : memref<1x16x128xbf16, #tpu.memory_space<vmem>>, vector<1x16x128xbf16>,
    return
  }
  func.func @transform_0(%arg0: i32) -> (i32, i32, i32) {
    %c0_i32 = arith.constant 0 : i32
    %c0_i32_0 = arith.constant 0 : i32
    %c0_i32_1 = arith.constant 0 : i32
    return %arg0, %c0_i32, %c0_i32_0 : i32, i32, i32
  }
  func.func @transform_1(%arg0: i32) -> (i32, i32) {
    %c0_i32 = arith.constant 0 : i32
    %c0_i32_0 = arith.constant 0 : i32
    %c0_i32_1 = arith.constant 0 : i32
    return %c0_i32, %c0_i32_0 : i32, i32
  }
  func.func @transform_2(%arg0: i32) -> (i32, i32) {
    %c0_i32 = arith.constant 0 : i32
    %c0_i32_0 = arith.constant 0 : i32
    %c0_i32_1 = arith.constant 0 : i32
    return %c0_i32, %c0_i32_0 : i32, i32
  }
  func.func @transform_3(%arg0: i32) -> (i32, i32, i32) {
    %c0_i32 = arith.constant 0 : i32
    %c0_i32_0 = arith.constant 0 : i32
    %c0_i32_1 = arith.constant 0 : i32
    return %arg0, %c0_i32, %c0_i32_0 : i32, i32, i32
  }
  func.func @transform_4(%arg0: i32) -> (i32, i32, i32) {
    %c0_i32 = arith.constant 0 : i32
    %c0_i32_0 = arith.constant 0 : i32
    %c0_i32_1 = arith.constant 0 : i32
    %c0_i32_2 = arith.constant 0 : i32
    return %c0_i32, %c0_i32_0, %c0_i32_1 : i32, i32, i32
  }
  func.func @transform_5(%arg0: i32) -> (i32, i32, i32) {
    %c0_i32 = arith.constant 0 : i32
    %c0_i32_0 = arith.constant 0 : i32
    %c0_i32_1 = arith.constant 0 : i32
    %c0_i32_2 = arith.constant 0 : i32
    return %c0_i32, %c0_i32_0, %c0_i32_1 : i32, i32, i32
  }
  func.func @transform_6(%arg0: i32) -> (i32, i32) {
    %c0_i32 = arith.constant 0 : i32
    %c0_i32_0 = arith.constant 0 : i32
    %c0_i32_1 = arith.constant 0 : i32
    return %c0_i32, %c0_i32_0 : i32, i32
  }
  func.func @transform_7(%arg0: i32) -> (i32, i32, i32) {
    %c0_i32 = arith.constant 0 : i32
    %c0_i32_0 = arith.constant 0 : i32
    %c0_i32_1 = arith.constant 0 : i32
    return %arg0, %c0_i32, %c0_i32_0 : i32, i32, i32
  }
  func.func @transform_8(%arg0: i32) -> (i32, i32, i32) {
    %c0_i32 = arith.constant 0 : i32
    %c0_i32_0 = arith.constant 0 : i32
    %c0_i32_1 = arith.constant 0 : i32
    return %arg0, %c0_i32, %c0_i32_0 : i32, i32, i32
  }
}

module attributes {stable_mosaic.version = 11 : i64} {
  func.func @kernel(%arg0: i32, %arg1: memref<1x16x128xbf16, #tpu.memory_space<vmem>>, %arg2: memref<1x128xf32, #tpu.memory_space<vmem>>, %arg3: memref<1x128xf32, #tpu.memory_space<vmem>>, %arg4: memref<1x16x128xbf16, #tpu.memory_space<vmem>>, %arg5: memref<1x128xf32, #tpu.memory_space<vmem>>, %arg6: memref<1x128xf32, #tpu.memory_space<vmem>>, %arg7: memref<1x16x16xbf16, #tpu.memory_space<vmem>>, %arg8: memref<3x128x128xbf16, #tpu.memory_space<vmem>>, %arg9: memref<3x128x128xbf16, #tpu.memory_space<vmem>>, %arg10: memref<3x16x128xbf16, #tpu.memory_space<vmem>>, %arg11: memref<1x128xf32, #tpu.memory_space<vmem>>, %arg12: memref<1x16x128xbf16, #tpu.memory_space<vmem>>, %arg13: memref<1x8x128xf32, #tpu.memory_space<vmem>>) attributes {dimension_semantics = [#tpu.dimension_semantics<parallel>], iteration_bounds = array<i64: 2>, scalar_prefetch = 0 : i64, scratch_operands = 0 : i64, tpu.core_type = #tpu.core_type<tc>, window_params = [{transform_indices = @transform_0, window_bounds = array<i64: 1, 16, 128>}, {pipeline_mode = #tpu.pipeline_mode<synchronous>, transform_indices = @transform_1, window_bounds = array<i64: 1, 128>}, {pipeline_mode = #tpu.pipeline_mode<synchronous>, transform_indices = @transform_2, window_bounds = array<i64: 1, 128>}, {transform_indices = @transform_3, window_bounds = array<i64: 1, 16, 128>}, {pipeline_mode = #tpu.pipeline_mode<synchronous>, transform_indices = @transform_4, window_bounds = array<i64: 1, 128>}, {pipeline_mode = #tpu.pipeline_mode<synchronous>, transform_indices = @transform_5, window_bounds = array<i64: 1, 128>}, {transform_indices = @transform_6, window_bounds = array<i64: 1, 16, 16>}, {pipeline_mode = #tpu.pipeline_mode<synchronous>, transform_indices = @transform_7, window_bounds = array<i64: 3, 128, 128>}, {pipeline_mode = #tpu.pipeline_mode<synchronous>, transform_indices = @transform_8, window_bounds = array<i64: 3, 128, 128>}, {pipeline_mode = #tpu.pipeline_mode<synchronous>, transform_indices = @transform_9, window_bounds = array<i64: 3, 16, 128>}, {pipeline_mode = #tpu.pipeline_mode<synchronous>, transform_indices = @transform_10, window_bounds = array<i64: 1, 128>}, {transform_indices = @transform_11, window_bounds = array<i64: 1, 16, 128>}, {transform_indices = @transform_12, window_bounds = array<i64: 1, 8, 128>}]} {
    %c0 = arith.constant 0 : index
    %c0_0 = arith.constant 0 : index
    %c0_1 = arith.constant 0 : index
    %0 = vector.load %arg1[%c0, %c0_0, %c0_1] : memref<1x16x128xbf16, #tpu.memory_space<vmem>>, vector<1x16x128xbf16>
    %1 = vector.shape_cast %0 : vector<1x16x128xbf16> to vector<16x128xbf16>
    %c0_2 = arith.constant 0 : index
    %c0_3 = arith.constant 0 : index
    %2 = vector.load %arg2[%c0_2, %c0_3] : memref<1x128xf32, #tpu.memory_space<vmem>>, vector<1x128xf32>
    %c0_4 = arith.constant 0 : index
    %c0_5 = arith.constant 0 : index
    %3 = vector.load %arg3[%c0_4, %c0_5] : memref<1x128xf32, #tpu.memory_space<vmem>>, vector<1x128xf32>
    %4 = arith.extf %1 : vector<16x128xbf16> to vector<16x128xf32>
    %5 = vector.broadcast %2 : vector<1x128xf32> to vector<16x128xf32>
    %6 = arith.mulf %4, %5 : vector<16x128xf32>
    %7 = vector.broadcast %3 : vector<1x128xf32> to vector<16x128xf32>
    %8 = arith.addf %6, %7 : vector<16x128xf32>
    %9 = arith.truncf %8 : vector<16x128xf32> to vector<16x128xbf16>
    %c0_6 = arith.constant 0 : index
    %c0_7 = arith.constant 0 : index
    %c0_8 = arith.constant 0 : index
    %10 = vector.load %arg4[%c0_6, %c0_7, %c0_8] : memref<1x16x128xbf16, #tpu.memory_space<vmem>>, vector<1x16x128xbf16>
    %11 = vector.shape_cast %10 : vector<1x16x128xbf16> to vector<16x128xbf16>
    %c0_9 = arith.constant 0 : index
    %c0_10 = arith.constant 0 : index
    %12 = vector.load %arg5[%c0_9, %c0_10] : memref<1x128xf32, #tpu.memory_space<vmem>>, vector<1x128xf32>
    %c0_11 = arith.constant 0 : index
    %c0_12 = arith.constant 0 : index
    %13 = vector.load %arg6[%c0_11, %c0_12] : memref<1x128xf32, #tpu.memory_space<vmem>>, vector<1x128xf32>
    %14 = arith.extf %11 : vector<16x128xbf16> to vector<16x128xf32>
    %15 = vector.broadcast %12 : vector<1x128xf32> to vector<16x128xf32>
    %16 = arith.mulf %14, %15 : vector<16x128xf32>
    %17 = vector.broadcast %13 : vector<1x128xf32> to vector<16x128xf32>
    %18 = arith.addf %16, %17 : vector<16x128xf32>
    %19 = arith.truncf %18 : vector<16x128xf32> to vector<16x128xbf16>
    %c0_13 = arith.constant 0 : index
    %c0_14 = arith.constant 0 : index
    %c0_15 = arith.constant 0 : index
    %20 = vector.load %arg7[%c0_13, %c0_14, %c0_15] : memref<1x16x16xbf16, #tpu.memory_space<vmem>>, vector<1x16x16xbf16>
    %21 = vector.shape_cast %20 : vector<1x16x16xbf16> to vector<16x16xbf16>
    %c0_16 = arith.constant 0 : index
    %c0_17 = arith.constant 0 : index
    %22 = vector.load %arg11[%c0_16, %c0_17] : memref<1x128xf32, #tpu.memory_space<vmem>>, vector<1x128xf32>
    %23 = tpu.iota {dimensions = array<i32: 0>} : vector<16x128xi32>
    %c16_i32 = arith.constant 16 : i32
    %c0_i32 = arith.constant 0 : i32
    %24 = arith.cmpi eq, %c16_i32, %c0_i32 : i32
    %c1_i32 = arith.constant 1 : i32
    %25 = arith.select %24, %c1_i32, %c16_i32 : i32
    %26 = vector.broadcast %25 : i32 to vector<16x128xi32>
    %27 = arith.remsi %23, %26 : vector<16x128xi32>
    %c0_i32_18 = arith.constant 0 : i32
    %28 = vector.broadcast %c0_i32_18 : i32 to vector<16x128xi32>
    %29 = arith.cmpi ne, %27, %28 : vector<16x128xi32>
    %c0_i32_19 = arith.constant 0 : i32
    %30 = vector.broadcast %c0_i32_19 : i32 to vector<16x128xi32>
    %31 = arith.cmpi slt, %27, %30 : vector<16x128xi32>
    %c0_i32_20 = arith.constant 0 : i32
    %32 = arith.cmpi slt, %25, %c0_i32_20 : i32
    %33 = vector.broadcast %32 : i1 to vector<16x128xi1>
    %34 = vector.broadcast %33 : vector<16x128xi1> to vector<16x128xi1>
    %35 = arith.xori %31, %34 : vector<16x128xi1>
    %36 = arith.andi %35, %29 : vector<16x128xi1>
    %37 = vector.broadcast %25 : i32 to vector<16x128xi32>
    %38 = arith.addi %27, %37 : vector<16x128xi32>
    %39 = arith.select %36, %38, %27 : vector<16x128xi1>, vector<16x128xi32>
    %cst = arith.constant 0.000000e+00 : f32
    %40 = vector.broadcast %cst : f32 to vector<16x128xf32>
    %c0_21 = arith.constant 0 : index
    %c0_22 = arith.constant 0 : index
    %c0_23 = arith.constant 0 : index
    %41 = vector.load %arg8[%c0_21, %c0_22, %c0_23] : memref<3x128x128xbf16, #tpu.memory_space<vmem>>, vector<1x128x128xbf16>
    %42 = vector.shape_cast %41 : vector<1x128x128xbf16> to vector<128x128xbf16>
    %cst_24 = arith.constant dense<0.000000e+00> : vector<16x128xf32>
    %43 = tpu.matmul %9, %42, %cst_24 {dimension_numbers = #tpu.dot_dimension_numbers<[1], [0], [0], [1], [0, 0, 1, 1], [], []>} : vector<16x128xbf16>, vector<128x128xbf16>, vector<16x128xf32> -> vector<16x128xf32>
    %c0_25 = arith.constant 0 : index
    %c0_26 = arith.constant 0 : index
    %c0_27 = arith.constant 0 : index
    %44 = vector.load %arg9[%c0_25, %c0_26, %c0_27] : memref<3x128x128xbf16, #tpu.memory_space<vmem>>, vector<1x128x128xbf16>
    %45 = vector.shape_cast %44 : vector<1x128x128xbf16> to vector<128x128xbf16>
    %cst_28 = arith.constant dense<0.000000e+00> : vector<16x128xf32>
    %46 = tpu.matmul %19, %45, %cst_28 {dimension_numbers = #tpu.dot_dimension_numbers<[1], [0], [0], [1], [0, 0, 1, 1], [], []>} : vector<16x128xbf16>, vector<128x128xbf16>, vector<16x128xf32> -> vector<16x128xf32>
    %47 = arith.addf %43, %46 : vector<16x128xf32>
    %c0_29 = arith.constant 0 : index
    %c0_30 = arith.constant 0 : index
    %c0_31 = arith.constant 0 : index
    %48 = vector.load %arg10[%c0_29, %c0_30, %c0_31] : memref<3x16x128xbf16, #tpu.memory_space<vmem>>, vector<1x16x128xbf16>
    %49 = vector.shape_cast %48 : vector<1x16x128xbf16> to vector<16x128xbf16>
    %cst_32 = arith.constant dense<0.000000e+00> : vector<16x128xf32>
    %50 = tpu.matmul %21, %49, %cst_32 {dimension_numbers = #tpu.dot_dimension_numbers<[1], [0], [0], [1], [0, 0, 1, 1], [], []>} : vector<16x16xbf16>, vector<16x128xbf16>, vector<16x128xf32> -> vector<16x128xf32>
    %51 = arith.addf %47, %50 : vector<16x128xf32>
    %cst_33 = arith.constant 0.000000e+00 : f32
    %52 = vector.broadcast %cst_33 : f32 to vector<1x128xf32>
    %53 = vector.extract_strided_slice %51 {offsets = [0, 0], sizes = [15, 128], strides = [1, 1]} : vector<16x128xf32> to vector<15x128xf32>
    %54 = tpu.concatenate %52, %53 in 0 : vector<1x128xf32>, vector<15x128xf32> -> vector<16x128xf32>
    %c-1_i32 = arith.constant -1 : i32
    %55 = vector.broadcast %c-1_i32 : i32 to vector<16x128xi32>
    %56 = arith.addi %39, %55 : vector<16x128xi32>
    %c0_i32_34 = arith.constant 0 : i32
    %57 = vector.broadcast %c0_i32_34 : i32 to vector<16x128xi32>
    %58 = arith.cmpi sge, %56, %57 : vector<16x128xi32>
    %c-1_i32_35 = arith.constant -1 : i32
    %59 = vector.broadcast %c-1_i32_35 : i32 to vector<16x128xi32>
    %60 = arith.addi %39, %59 : vector<16x128xi32>
    %c16_i32_36 = arith.constant 16 : i32
    %61 = vector.broadcast %c16_i32_36 : i32 to vector<16x128xi32>
    %62 = arith.cmpi slt, %60, %61 : vector<16x128xi32>
    %63 = arith.andi %58, %62 : vector<16x128xi1>
    %cst_37 = arith.constant 0.000000e+00 : f32
    %64 = vector.broadcast %cst_37 : f32 to vector<16x128xf32>
    %65 = arith.select %63, %54, %64 : vector<16x128xi1>, vector<16x128xf32>
    %66 = arith.addf %40, %65 : vector<16x128xf32>
    %c1 = arith.constant 1 : index
    %c0_38 = arith.constant 0 : index
    %c0_39 = arith.constant 0 : index
    %67 = vector.load %arg8[%c1, %c0_38, %c0_39] : memref<3x128x128xbf16, #tpu.memory_space<vmem>>, vector<1x128x128xbf16>
    %68 = vector.shape_cast %67 : vector<1x128x128xbf16> to vector<128x128xbf16>
    %cst_40 = arith.constant dense<0.000000e+00> : vector<16x128xf32>
    %69 = tpu.matmul %9, %68, %cst_40 {dimension_numbers = #tpu.dot_dimension_numbers<[1], [0], [0], [1], [0, 0, 1, 1], [], []>} : vector<16x128xbf16>, vector<128x128xbf16>, vector<16x128xf32> -> vector<16x128xf32>
    %c1_41 = arith.constant 1 : index
    %c0_42 = arith.constant 0 : index
    %c0_43 = arith.constant 0 : index
    %70 = vector.load %arg9[%c1_41, %c0_42, %c0_43] : memref<3x128x128xbf16, #tpu.memory_space<vmem>>, vector<1x128x128xbf16>
    %71 = vector.shape_cast %70 : vector<1x128x128xbf16> to vector<128x128xbf16>
    %cst_44 = arith.constant dense<0.000000e+00> : vector<16x128xf32>
    %72 = tpu.matmul %19, %71, %cst_44 {dimension_numbers = #tpu.dot_dimension_numbers<[1], [0], [0], [1], [0, 0, 1, 1], [], []>} : vector<16x128xbf16>, vector<128x128xbf16>, vector<16x128xf32> -> vector<16x128xf32>
    %73 = arith.addf %69, %72 : vector<16x128xf32>
    %c1_45 = arith.constant 1 : index
    %c0_46 = arith.constant 0 : index
    %c0_47 = arith.constant 0 : index
    %74 = vector.load %arg10[%c1_45, %c0_46, %c0_47] : memref<3x16x128xbf16, #tpu.memory_space<vmem>>, vector<1x16x128xbf16>
    %75 = vector.shape_cast %74 : vector<1x16x128xbf16> to vector<16x128xbf16>
    %cst_48 = arith.constant dense<0.000000e+00> : vector<16x128xf32>
    %76 = tpu.matmul %21, %75, %cst_48 {dimension_numbers = #tpu.dot_dimension_numbers<[1], [0], [0], [1], [0, 0, 1, 1], [], []>} : vector<16x16xbf16>, vector<16x128xbf16>, vector<16x128xf32> -> vector<16x128xf32>
    %77 = arith.addf %73, %76 : vector<16x128xf32>
    %78 = arith.addf %66, %77 : vector<16x128xf32>
    %c2 = arith.constant 2 : index
    %c0_49 = arith.constant 0 : index
    %c0_50 = arith.constant 0 : index
    %79 = vector.load %arg8[%c2, %c0_49, %c0_50] : memref<3x128x128xbf16, #tpu.memory_space<vmem>>, vector<1x128x128xbf16>
    %80 = vector.shape_cast %79 : vector<1x128x128xbf16> to vector<128x128xbf16>
    %cst_51 = arith.constant dense<0.000000e+00> : vector<16x128xf32>
    %81 = tpu.matmul %9, %80, %cst_51 {dimension_numbers = #tpu.dot_dimension_numbers<[1], [0], [0], [1], [0, 0, 1, 1], [], []>} : vector<16x128xbf16>, vector<128x128xbf16>, vector<16x128xf32> -> vector<16x128xf32>
    %c2_52 = arith.constant 2 : index
    %c0_53 = arith.constant 0 : index
    %c0_54 = arith.constant 0 : index
    %82 = vector.load %arg9[%c2_52, %c0_53, %c0_54] : memref<3x128x128xbf16, #tpu.memory_space<vmem>>, vector<1x128x128xbf16>
    %83 = vector.shape_cast %82 : vector<1x128x128xbf16> to vector<128x128xbf16>
    %cst_55 = arith.constant dense<0.000000e+00> : vector<16x128xf32>
    %84 = tpu.matmul %19, %83, %cst_55 {dimension_numbers = #tpu.dot_dimension_numbers<[1], [0], [0], [1], [0, 0, 1, 1], [], []>} : vector<16x128xbf16>, vector<128x128xbf16>, vector<16x128xf32> -> vector<16x128xf32>
    %85 = arith.addf %81, %84 : vector<16x128xf32>
    %c2_56 = arith.constant 2 : index
    %c0_57 = arith.constant 0 : index
    %c0_58 = arith.constant 0 : index
    %86 = vector.load %arg10[%c2_56, %c0_57, %c0_58] : memref<3x16x128xbf16, #tpu.memory_space<vmem>>, vector<1x16x128xbf16>
    %87 = vector.shape_cast %86 : vector<1x16x128xbf16> to vector<16x128xbf16>
    %cst_59 = arith.constant dense<0.000000e+00> : vector<16x128xf32>
    %88 = tpu.matmul %21, %87, %cst_59 {dimension_numbers = #tpu.dot_dimension_numbers<[1], [0], [0], [1], [0, 0, 1, 1], [], []>} : vector<16x16xbf16>, vector<16x128xbf16>, vector<16x128xf32> -> vector<16x128xf32>
    %89 = arith.addf %85, %88 : vector<16x128xf32>
    %cst_60 = arith.constant 0.000000e+00 : f32
    %90 = vector.broadcast %cst_60 : f32 to vector<1x128xf32>
    %91 = vector.extract_strided_slice %89 {offsets = [1, 0], sizes = [15, 128], strides = [1, 1]} : vector<16x128xf32> to vector<15x128xf32>
    %92 = tpu.concatenate %91, %90 in 0 : vector<15x128xf32>, vector<1x128xf32> -> vector<16x128xf32>
    %c1_i32_61 = arith.constant 1 : i32
    %93 = vector.broadcast %c1_i32_61 : i32 to vector<16x128xi32>
    %94 = arith.addi %39, %93 : vector<16x128xi32>
    %c0_i32_62 = arith.constant 0 : i32
    %95 = vector.broadcast %c0_i32_62 : i32 to vector<16x128xi32>
    %96 = arith.cmpi sge, %94, %95 : vector<16x128xi32>
    %c1_i32_63 = arith.constant 1 : i32
    %97 = vector.broadcast %c1_i32_63 : i32 to vector<16x128xi32>
    %98 = arith.addi %39, %97 : vector<16x128xi32>
    %c16_i32_64 = arith.constant 16 : i32
    %99 = vector.broadcast %c16_i32_64 : i32 to vector<16x128xi32>
    %100 = arith.cmpi slt, %98, %99 : vector<16x128xi32>
    %101 = arith.andi %96, %100 : vector<16x128xi1>
    %cst_65 = arith.constant 0.000000e+00 : f32
    %102 = vector.broadcast %cst_65 : f32 to vector<16x128xf32>
    %103 = arith.select %101, %92, %102 : vector<16x128xi1>, vector<16x128xf32>
    %104 = arith.addf %78, %103 : vector<16x128xf32>
    %105 = vector.broadcast %22 : vector<1x128xf32> to vector<16x128xf32>
    %106 = arith.addf %104, %105 : vector<16x128xf32>
    %cst_66 = arith.constant 0.000000e+00 : f32
    %107 = vector.broadcast %cst_66 : f32 to vector<16x128xf32>
    %108 = arith.cmpf oge, %106, %107 : vector<16x128xf32>
    %cst_67 = arith.constant 0.00999999977 : f32
    %109 = vector.broadcast %cst_67 : f32 to vector<16x128xf32>
    %110 = arith.mulf %109, %106 : vector<16x128xf32>
    %111 = arith.select %108, %106, %110 : vector<16x128xi1>, vector<16x128xf32>
    %cst_68 = arith.constant dense<0.000000e+00> : vector<128xf32>
    %112 = vector.multi_reduction <add>, %111, %cst_68 [0] : vector<16x128xf32> to vector<128xf32>
    %113 = vector.shape_cast %112 : vector<128xf32> to vector<1x128xf32>
    %114 = arith.mulf %111, %111 : vector<16x128xf32>
    %cst_69 = arith.constant dense<0.000000e+00> : vector<128xf32>
    %115 = vector.multi_reduction <add>, %114, %cst_69 [0] : vector<16x128xf32> to vector<128xf32>
    %116 = vector.shape_cast %115 : vector<128xf32> to vector<1x128xf32>
    %cst_70 = arith.constant 0.000000e+00 : f32
    %117 = vector.broadcast %cst_70 : f32 to vector<6x128xf32>
    %118 = tpu.concatenate %113, %116, %117 in 0 : vector<1x128xf32>, vector<1x128xf32>, vector<6x128xf32> -> vector<8x128xf32>
    %c0_71 = arith.constant 0 : index
    %c0_72 = arith.constant 0 : index
    %c0_73 = arith.constant 0 : index
    %119 = vector.load %arg13[%c0_71, %c0_72, %c0_73] : memref<1x8x128xf32, #tpu.memory_space<vmem>>, vector<1x8x128xf32>
    %120 = vector.shape_cast %119 : vector<1x8x128xf32> to vector<8x128xf32>
    %121 = vector.shape_cast %118 : vector<8x128xf32> to vector<1x8x128xf32>
    tpu.vector_store %arg13[%c0_71, %c0_72, %c0_73], %121 {strides = array<i32>} : memref<1x8x128xf32, #tpu.memory_space<vmem>>, vector<1x8x128xf32>,
    %122 = vector.shape_cast %111 : vector<16x128xf32> to vector<1x16x128xf32>
    %123 = arith.truncf %122 : vector<1x16x128xf32> to vector<1x16x128xbf16>
    %c0_74 = arith.constant 0 : index
    %c0_75 = arith.constant 0 : index
    %c0_76 = arith.constant 0 : index
    %124 = vector.load %arg12[%c0_74, %c0_75, %c0_76] : memref<1x16x128xbf16, #tpu.memory_space<vmem>>, vector<1x16x128xbf16>
    tpu.vector_store %arg12[%c0_74, %c0_75, %c0_76], %123 {strides = array<i32>} : memref<1x16x128xbf16, #tpu.memory_space<vmem>>, vector<1x16x128xbf16>,
    return
  }
  func.func @transform_0(%arg0: i32) -> (i32, i32, i32) {
    %c0_i32 = arith.constant 0 : i32
    %c0_i32_0 = arith.constant 0 : i32
    %c0_i32_1 = arith.constant 0 : i32
    return %arg0, %c0_i32, %c0_i32_0 : i32, i32, i32
  }
  func.func @transform_1(%arg0: i32) -> (i32, i32) {
    %c0_i32 = arith.constant 0 : i32
    %c0_i32_0 = arith.constant 0 : i32
    %c0_i32_1 = arith.constant 0 : i32
    return %c0_i32, %c0_i32_0 : i32, i32
  }
  func.func @transform_2(%arg0: i32) -> (i32, i32) {
    %c0_i32 = arith.constant 0 : i32
    %c0_i32_0 = arith.constant 0 : i32
    %c0_i32_1 = arith.constant 0 : i32
    return %c0_i32, %c0_i32_0 : i32, i32
  }
  func.func @transform_3(%arg0: i32) -> (i32, i32, i32) {
    %c0_i32 = arith.constant 0 : i32
    %c0_i32_0 = arith.constant 0 : i32
    %c0_i32_1 = arith.constant 0 : i32
    return %arg0, %c0_i32, %c0_i32_0 : i32, i32, i32
  }
  func.func @transform_4(%arg0: i32) -> (i32, i32) {
    %c0_i32 = arith.constant 0 : i32
    %c0_i32_0 = arith.constant 0 : i32
    %c0_i32_1 = arith.constant 0 : i32
    return %c0_i32, %c0_i32_0 : i32, i32
  }
  func.func @transform_5(%arg0: i32) -> (i32, i32) {
    %c0_i32 = arith.constant 0 : i32
    %c0_i32_0 = arith.constant 0 : i32
    %c0_i32_1 = arith.constant 0 : i32
    return %c0_i32, %c0_i32_0 : i32, i32
  }
  func.func @transform_6(%arg0: i32) -> (i32, i32, i32) {
    %c0_i32 = arith.constant 0 : i32
    %c0_i32_0 = arith.constant 0 : i32
    %c0_i32_1 = arith.constant 0 : i32
    return %arg0, %c0_i32, %c0_i32_0 : i32, i32, i32
  }
  func.func @transform_7(%arg0: i32) -> (i32, i32, i32) {
    %c0_i32 = arith.constant 0 : i32
    %c0_i32_0 = arith.constant 0 : i32
    %c0_i32_1 = arith.constant 0 : i32
    %c0_i32_2 = arith.constant 0 : i32
    return %c0_i32, %c0_i32_0, %c0_i32_1 : i32, i32, i32
  }
  func.func @transform_8(%arg0: i32) -> (i32, i32, i32) {
    %c0_i32 = arith.constant 0 : i32
    %c0_i32_0 = arith.constant 0 : i32
    %c0_i32_1 = arith.constant 0 : i32
    %c0_i32_2 = arith.constant 0 : i32
    return %c0_i32, %c0_i32_0, %c0_i32_1 : i32, i32, i32
  }
  func.func @transform_9(%arg0: i32) -> (i32, i32, i32) {
    %c0_i32 = arith.constant 0 : i32
    %c0_i32_0 = arith.constant 0 : i32
    %c0_i32_1 = arith.constant 0 : i32
    %c0_i32_2 = arith.constant 0 : i32
    return %c0_i32, %c0_i32_0, %c0_i32_1 : i32, i32, i32
  }
  func.func @transform_10(%arg0: i32) -> (i32, i32) {
    %c0_i32 = arith.constant 0 : i32
    %c0_i32_0 = arith.constant 0 : i32
    %c0_i32_1 = arith.constant 0 : i32
    return %c0_i32, %c0_i32_0 : i32, i32
  }
  func.func @transform_11(%arg0: i32) -> (i32, i32, i32) {
    %c0_i32 = arith.constant 0 : i32
    %c0_i32_0 = arith.constant 0 : i32
    %c0_i32_1 = arith.constant 0 : i32
    return %arg0, %c0_i32, %c0_i32_0 : i32, i32, i32
  }
  func.func @transform_12(%arg0: i32) -> (i32, i32, i32) {
    %c0_i32 = arith.constant 0 : i32
    %c0_i32_0 = arith.constant 0 : i32
    %c0_i32_1 = arith.constant 0 : i32
    return %arg0, %c0_i32, %c0_i32_0 : i32, i32, i32
  }
}

module attributes {stable_mosaic.version = 11 : i64} {
  func.func @kernel(%arg0: i32, %arg1: memref<1x16x128xbf16, #tpu.memory_space<vmem>>, %arg2: memref<1x128xf32, #tpu.memory_space<vmem>>, %arg3: memref<1x128xf32, #tpu.memory_space<vmem>>, %arg4: memref<1x16x128xbf16, #tpu.memory_space<vmem>>, %arg5: memref<1x128xf32, #tpu.memory_space<vmem>>, %arg6: memref<1x128xf32, #tpu.memory_space<vmem>>, %arg7: memref<1x16x128xbf16, #tpu.memory_space<vmem>>, %arg8: memref<1x128xf32, #tpu.memory_space<vmem>>, %arg9: memref<1x128xf32, #tpu.memory_space<vmem>>, %arg10: memref<1x16x16xbf16, #tpu.memory_space<vmem>>, %arg11: memref<3x128x48xbf16, #tpu.memory_space<vmem>>, %arg12: memref<3x128x48xbf16, #tpu.memory_space<vmem>>, %arg13: memref<3x128x48xbf16, #tpu.memory_space<vmem>>, %arg14: memref<3x16x48xbf16, #tpu.memory_space<vmem>>, %arg15: memref<1x48xf32, #tpu.memory_space<vmem>>, %arg16: memref<1x16x48xf32, #tpu.memory_space<vmem>>, %arg17: memref<1x16x48xf32, #tpu.memory_space<vmem>>) attributes {dimension_semantics = [#tpu.dimension_semantics<parallel>], iteration_bounds = array<i64: 2>, scalar_prefetch = 0 : i64, scratch_operands = 0 : i64, tpu.core_type = #tpu.core_type<tc>, window_params = [{transform_indices = @transform_0, window_bounds = array<i64: 1, 16, 128>}, {pipeline_mode = #tpu.pipeline_mode<synchronous>, transform_indices = @transform_1, window_bounds = array<i64: 1, 128>}, {pipeline_mode = #tpu.pipeline_mode<synchronous>, transform_indices = @transform_2, window_bounds = array<i64: 1, 128>}, {transform_indices = @transform_3, window_bounds = array<i64: 1, 16, 128>}, {pipeline_mode = #tpu.pipeline_mode<synchronous>, transform_indices = @transform_4, window_bounds = array<i64: 1, 128>}, {pipeline_mode = #tpu.pipeline_mode<synchronous>, transform_indices = @transform_5, window_bounds = array<i64: 1, 128>}, {transform_indices = @transform_6, window_bounds = array<i64: 1, 16, 128>}, {pipeline_mode = #tpu.pipeline_mode<synchronous>, transform_indices = @transform_7, window_bounds = array<i64: 1, 128>}, {pipeline_mode = #tpu.pipeline_mode<synchronous>, transform_indices = @transform_8, window_bounds = array<i64: 1, 128>}, {transform_indices = @transform_9, window_bounds = array<i64: 1, 16, 16>}, {pipeline_mode = #tpu.pipeline_mode<synchronous>, transform_indices = @transform_10, window_bounds = array<i64: 3, 128, 48>}, {pipeline_mode = #tpu.pipeline_mode<synchronous>, transform_indices = @transform_11, window_bounds = array<i64: 3, 128, 48>}, {pipeline_mode = #tpu.pipeline_mode<synchronous>, transform_indices = @transform_12, window_bounds = array<i64: 3, 128, 48>}, {pipeline_mode = #tpu.pipeline_mode<synchronous>, transform_indices = @transform_13, window_bounds = array<i64: 3, 16, 48>}, {pipeline_mode = #tpu.pipeline_mode<synchronous>, transform_indices = @transform_14, window_bounds = array<i64: 1, 48>}, {transform_indices = @transform_15, window_bounds = array<i64: 1, 16, 48>}, {transform_indices = @transform_16, window_bounds = array<i64: 1, 16, 48>}]} {
    %c0 = arith.constant 0 : index
    %c0_0 = arith.constant 0 : index
    %c0_1 = arith.constant 0 : index
    %0 = vector.load %arg1[%c0, %c0_0, %c0_1] : memref<1x16x128xbf16, #tpu.memory_space<vmem>>, vector<1x16x128xbf16>
    %1 = vector.shape_cast %0 : vector<1x16x128xbf16> to vector<16x128xbf16>
    %c0_2 = arith.constant 0 : index
    %c0_3 = arith.constant 0 : index
    %2 = vector.load %arg2[%c0_2, %c0_3] : memref<1x128xf32, #tpu.memory_space<vmem>>, vector<1x128xf32>
    %c0_4 = arith.constant 0 : index
    %c0_5 = arith.constant 0 : index
    %3 = vector.load %arg3[%c0_4, %c0_5] : memref<1x128xf32, #tpu.memory_space<vmem>>, vector<1x128xf32>
    %4 = arith.extf %1 : vector<16x128xbf16> to vector<16x128xf32>
    %5 = vector.broadcast %2 : vector<1x128xf32> to vector<16x128xf32>
    %6 = arith.mulf %4, %5 : vector<16x128xf32>
    %7 = vector.broadcast %3 : vector<1x128xf32> to vector<16x128xf32>
    %8 = arith.addf %6, %7 : vector<16x128xf32>
    %9 = arith.truncf %8 : vector<16x128xf32> to vector<16x128xbf16>
    %c0_6 = arith.constant 0 : index
    %c0_7 = arith.constant 0 : index
    %c0_8 = arith.constant 0 : index
    %10 = vector.load %arg4[%c0_6, %c0_7, %c0_8] : memref<1x16x128xbf16, #tpu.memory_space<vmem>>, vector<1x16x128xbf16>
    %11 = vector.shape_cast %10 : vector<1x16x128xbf16> to vector<16x128xbf16>
    %c0_9 = arith.constant 0 : index
    %c0_10 = arith.constant 0 : index
    %12 = vector.load %arg5[%c0_9, %c0_10] : memref<1x128xf32, #tpu.memory_space<vmem>>, vector<1x128xf32>
    %c0_11 = arith.constant 0 : index
    %c0_12 = arith.constant 0 : index
    %13 = vector.load %arg6[%c0_11, %c0_12] : memref<1x128xf32, #tpu.memory_space<vmem>>, vector<1x128xf32>
    %14 = arith.extf %11 : vector<16x128xbf16> to vector<16x128xf32>
    %15 = vector.broadcast %12 : vector<1x128xf32> to vector<16x128xf32>
    %16 = arith.mulf %14, %15 : vector<16x128xf32>
    %17 = vector.broadcast %13 : vector<1x128xf32> to vector<16x128xf32>
    %18 = arith.addf %16, %17 : vector<16x128xf32>
    %19 = arith.truncf %18 : vector<16x128xf32> to vector<16x128xbf16>
    %c0_13 = arith.constant 0 : index
    %c0_14 = arith.constant 0 : index
    %c0_15 = arith.constant 0 : index
    %20 = vector.load %arg7[%c0_13, %c0_14, %c0_15] : memref<1x16x128xbf16, #tpu.memory_space<vmem>>, vector<1x16x128xbf16>
    %21 = vector.shape_cast %20 : vector<1x16x128xbf16> to vector<16x128xbf16>
    %c0_16 = arith.constant 0 : index
    %c0_17 = arith.constant 0 : index
    %22 = vector.load %arg8[%c0_16, %c0_17] : memref<1x128xf32, #tpu.memory_space<vmem>>, vector<1x128xf32>
    %c0_18 = arith.constant 0 : index
    %c0_19 = arith.constant 0 : index
    %23 = vector.load %arg9[%c0_18, %c0_19] : memref<1x128xf32, #tpu.memory_space<vmem>>, vector<1x128xf32>
    %24 = arith.extf %21 : vector<16x128xbf16> to vector<16x128xf32>
    %25 = vector.broadcast %22 : vector<1x128xf32> to vector<16x128xf32>
    %26 = arith.mulf %24, %25 : vector<16x128xf32>
    %27 = vector.broadcast %23 : vector<1x128xf32> to vector<16x128xf32>
    %28 = arith.addf %26, %27 : vector<16x128xf32>
    %29 = arith.truncf %28 : vector<16x128xf32> to vector<16x128xbf16>
    %c0_20 = arith.constant 0 : index
    %c0_21 = arith.constant 0 : index
    %c0_22 = arith.constant 0 : index
    %30 = vector.load %arg10[%c0_20, %c0_21, %c0_22] : memref<1x16x16xbf16, #tpu.memory_space<vmem>>, vector<1x16x16xbf16>
    %31 = vector.shape_cast %30 : vector<1x16x16xbf16> to vector<16x16xbf16>
    %c0_23 = arith.constant 0 : index
    %c0_24 = arith.constant 0 : index
    %32 = vector.load %arg15[%c0_23, %c0_24] : memref<1x48xf32, #tpu.memory_space<vmem>>, vector<1x48xf32>
    %33 = tpu.iota {dimensions = array<i32: 0>} : vector<16x48xi32>
    %c16_i32 = arith.constant 16 : i32
    %c0_i32 = arith.constant 0 : i32
    %34 = arith.cmpi eq, %c16_i32, %c0_i32 : i32
    %c1_i32 = arith.constant 1 : i32
    %35 = arith.select %34, %c1_i32, %c16_i32 : i32
    %36 = vector.broadcast %35 : i32 to vector<16x48xi32>
    %37 = arith.remsi %33, %36 : vector<16x48xi32>
    %c0_i32_25 = arith.constant 0 : i32
    %38 = vector.broadcast %c0_i32_25 : i32 to vector<16x48xi32>
    %39 = arith.cmpi ne, %37, %38 : vector<16x48xi32>
    %c0_i32_26 = arith.constant 0 : i32
    %40 = vector.broadcast %c0_i32_26 : i32 to vector<16x48xi32>
    %41 = arith.cmpi slt, %37, %40 : vector<16x48xi32>
    %c0_i32_27 = arith.constant 0 : i32
    %42 = arith.cmpi slt, %35, %c0_i32_27 : i32
    %43 = vector.broadcast %42 : i1 to vector<16x48xi1>
    %44 = vector.broadcast %43 : vector<16x48xi1> to vector<16x48xi1>
    %45 = arith.xori %41, %44 : vector<16x48xi1>
    %46 = arith.andi %45, %39 : vector<16x48xi1>
    %47 = vector.broadcast %35 : i32 to vector<16x48xi32>
    %48 = arith.addi %37, %47 : vector<16x48xi32>
    %49 = arith.select %46, %48, %37 : vector<16x48xi1>, vector<16x48xi32>
    %cst = arith.constant 0.000000e+00 : f32
    %50 = vector.broadcast %cst : f32 to vector<16x48xf32>
    %c0_28 = arith.constant 0 : index
    %c0_29 = arith.constant 0 : index
    %c0_30 = arith.constant 0 : index
    %51 = vector.load %arg11[%c0_28, %c0_29, %c0_30] : memref<3x128x48xbf16, #tpu.memory_space<vmem>>, vector<1x128x48xbf16>
    %52 = vector.shape_cast %51 : vector<1x128x48xbf16> to vector<128x48xbf16>
    %cst_31 = arith.constant dense<0.000000e+00> : vector<16x48xf32>
    %53 = tpu.matmul %9, %52, %cst_31 {dimension_numbers = #tpu.dot_dimension_numbers<[1], [0], [0], [1], [0, 0, 1, 1], [], []>} : vector<16x128xbf16>, vector<128x48xbf16>, vector<16x48xf32> -> vector<16x48xf32>
    %c0_32 = arith.constant 0 : index
    %c0_33 = arith.constant 0 : index
    %c0_34 = arith.constant 0 : index
    %54 = vector.load %arg12[%c0_32, %c0_33, %c0_34] : memref<3x128x48xbf16, #tpu.memory_space<vmem>>, vector<1x128x48xbf16>
    %55 = vector.shape_cast %54 : vector<1x128x48xbf16> to vector<128x48xbf16>
    %cst_35 = arith.constant dense<0.000000e+00> : vector<16x48xf32>
    %56 = tpu.matmul %19, %55, %cst_35 {dimension_numbers = #tpu.dot_dimension_numbers<[1], [0], [0], [1], [0, 0, 1, 1], [], []>} : vector<16x128xbf16>, vector<128x48xbf16>, vector<16x48xf32> -> vector<16x48xf32>
    %57 = arith.addf %53, %56 : vector<16x48xf32>
    %c0_36 = arith.constant 0 : index
    %c0_37 = arith.constant 0 : index
    %c0_38 = arith.constant 0 : index
    %58 = vector.load %arg13[%c0_36, %c0_37, %c0_38] : memref<3x128x48xbf16, #tpu.memory_space<vmem>>, vector<1x128x48xbf16>
    %59 = vector.shape_cast %58 : vector<1x128x48xbf16> to vector<128x48xbf16>
    %cst_39 = arith.constant dense<0.000000e+00> : vector<16x48xf32>
    %60 = tpu.matmul %29, %59, %cst_39 {dimension_numbers = #tpu.dot_dimension_numbers<[1], [0], [0], [1], [0, 0, 1, 1], [], []>} : vector<16x128xbf16>, vector<128x48xbf16>, vector<16x48xf32> -> vector<16x48xf32>
    %61 = arith.addf %57, %60 : vector<16x48xf32>
    %c0_40 = arith.constant 0 : index
    %c0_41 = arith.constant 0 : index
    %c0_42 = arith.constant 0 : index
    %62 = vector.load %arg14[%c0_40, %c0_41, %c0_42] : memref<3x16x48xbf16, #tpu.memory_space<vmem>>, vector<1x16x48xbf16>
    %63 = vector.shape_cast %62 : vector<1x16x48xbf16> to vector<16x48xbf16>
    %cst_43 = arith.constant dense<0.000000e+00> : vector<16x48xf32>
    %64 = tpu.matmul %31, %63, %cst_43 {dimension_numbers = #tpu.dot_dimension_numbers<[1], [0], [0], [1], [0, 0, 1, 1], [], []>} : vector<16x16xbf16>, vector<16x48xbf16>, vector<16x48xf32> -> vector<16x48xf32>
    %65 = arith.addf %61, %64 : vector<16x48xf32>
    %cst_44 = arith.constant 0.000000e+00 : f32
    %66 = vector.broadcast %cst_44 : f32 to vector<1x48xf32>
    %67 = vector.extract_strided_slice %65 {offsets = [0, 0], sizes = [15, 48], strides = [1, 1]} : vector<16x48xf32> to vector<15x48xf32>
    %68 = tpu.concatenate %66, %67 in 0 : vector<1x48xf32>, vector<15x48xf32> -> vector<16x48xf32>
    %c-1_i32 = arith.constant -1 : i32
    %69 = vector.broadcast %c-1_i32 : i32 to vector<16x48xi32>
    %70 = arith.addi %49, %69 : vector<16x48xi32>
    %c0_i32_45 = arith.constant 0 : i32
    %71 = vector.broadcast %c0_i32_45 : i32 to vector<16x48xi32>
    %72 = arith.cmpi sge, %70, %71 : vector<16x48xi32>
    %c-1_i32_46 = arith.constant -1 : i32
    %73 = vector.broadcast %c-1_i32_46 : i32 to vector<16x48xi32>
    %74 = arith.addi %49, %73 : vector<16x48xi32>
    %c16_i32_47 = arith.constant 16 : i32
    %75 = vector.broadcast %c16_i32_47 : i32 to vector<16x48xi32>
    %76 = arith.cmpi slt, %74, %75 : vector<16x48xi32>
    %77 = arith.andi %72, %76 : vector<16x48xi1>
    %cst_48 = arith.constant 0.000000e+00 : f32
    %78 = vector.broadcast %cst_48 : f32 to vector<16x48xf32>
    %79 = arith.select %77, %68, %78 : vector<16x48xi1>, vector<16x48xf32>
    %80 = arith.addf %50, %79 : vector<16x48xf32>
    %c1 = arith.constant 1 : index
    %c0_49 = arith.constant 0 : index
    %c0_50 = arith.constant 0 : index
    %81 = vector.load %arg11[%c1, %c0_49, %c0_50] : memref<3x128x48xbf16, #tpu.memory_space<vmem>>, vector<1x128x48xbf16>
    %82 = vector.shape_cast %81 : vector<1x128x48xbf16> to vector<128x48xbf16>
    %cst_51 = arith.constant dense<0.000000e+00> : vector<16x48xf32>
    %83 = tpu.matmul %9, %82, %cst_51 {dimension_numbers = #tpu.dot_dimension_numbers<[1], [0], [0], [1], [0, 0, 1, 1], [], []>} : vector<16x128xbf16>, vector<128x48xbf16>, vector<16x48xf32> -> vector<16x48xf32>
    %c1_52 = arith.constant 1 : index
    %c0_53 = arith.constant 0 : index
    %c0_54 = arith.constant 0 : index
    %84 = vector.load %arg12[%c1_52, %c0_53, %c0_54] : memref<3x128x48xbf16, #tpu.memory_space<vmem>>, vector<1x128x48xbf16>
    %85 = vector.shape_cast %84 : vector<1x128x48xbf16> to vector<128x48xbf16>
    %cst_55 = arith.constant dense<0.000000e+00> : vector<16x48xf32>
    %86 = tpu.matmul %19, %85, %cst_55 {dimension_numbers = #tpu.dot_dimension_numbers<[1], [0], [0], [1], [0, 0, 1, 1], [], []>} : vector<16x128xbf16>, vector<128x48xbf16>, vector<16x48xf32> -> vector<16x48xf32>
    %87 = arith.addf %83, %86 : vector<16x48xf32>
    %c1_56 = arith.constant 1 : index
    %c0_57 = arith.constant 0 : index
    %c0_58 = arith.constant 0 : index
    %88 = vector.load %arg13[%c1_56, %c0_57, %c0_58] : memref<3x128x48xbf16, #tpu.memory_space<vmem>>, vector<1x128x48xbf16>
    %89 = vector.shape_cast %88 : vector<1x128x48xbf16> to vector<128x48xbf16>
    %cst_59 = arith.constant dense<0.000000e+00> : vector<16x48xf32>
    %90 = tpu.matmul %29, %89, %cst_59 {dimension_numbers = #tpu.dot_dimension_numbers<[1], [0], [0], [1], [0, 0, 1, 1], [], []>} : vector<16x128xbf16>, vector<128x48xbf16>, vector<16x48xf32> -> vector<16x48xf32>
    %91 = arith.addf %87, %90 : vector<16x48xf32>
    %c1_60 = arith.constant 1 : index
    %c0_61 = arith.constant 0 : index
    %c0_62 = arith.constant 0 : index
    %92 = vector.load %arg14[%c1_60, %c0_61, %c0_62] : memref<3x16x48xbf16, #tpu.memory_space<vmem>>, vector<1x16x48xbf16>
    %93 = vector.shape_cast %92 : vector<1x16x48xbf16> to vector<16x48xbf16>
    %cst_63 = arith.constant dense<0.000000e+00> : vector<16x48xf32>
    %94 = tpu.matmul %31, %93, %cst_63 {dimension_numbers = #tpu.dot_dimension_numbers<[1], [0], [0], [1], [0, 0, 1, 1], [], []>} : vector<16x16xbf16>, vector<16x48xbf16>, vector<16x48xf32> -> vector<16x48xf32>
    %95 = arith.addf %91, %94 : vector<16x48xf32>
    %96 = arith.addf %80, %95 : vector<16x48xf32>
    %c2 = arith.constant 2 : index
    %c0_64 = arith.constant 0 : index
    %c0_65 = arith.constant 0 : index
    %97 = vector.load %arg11[%c2, %c0_64, %c0_65] : memref<3x128x48xbf16, #tpu.memory_space<vmem>>, vector<1x128x48xbf16>
    %98 = vector.shape_cast %97 : vector<1x128x48xbf16> to vector<128x48xbf16>
    %cst_66 = arith.constant dense<0.000000e+00> : vector<16x48xf32>
    %99 = tpu.matmul %9, %98, %cst_66 {dimension_numbers = #tpu.dot_dimension_numbers<[1], [0], [0], [1], [0, 0, 1, 1], [], []>} : vector<16x128xbf16>, vector<128x48xbf16>, vector<16x48xf32> -> vector<16x48xf32>
    %c2_67 = arith.constant 2 : index
    %c0_68 = arith.constant 0 : index
    %c0_69 = arith.constant 0 : index
    %100 = vector.load %arg12[%c2_67, %c0_68, %c0_69] : memref<3x128x48xbf16, #tpu.memory_space<vmem>>, vector<1x128x48xbf16>
    %101 = vector.shape_cast %100 : vector<1x128x48xbf16> to vector<128x48xbf16>
    %cst_70 = arith.constant dense<0.000000e+00> : vector<16x48xf32>
    %102 = tpu.matmul %19, %101, %cst_70 {dimension_numbers = #tpu.dot_dimension_numbers<[1], [0], [0], [1], [0, 0, 1, 1], [], []>} : vector<16x128xbf16>, vector<128x48xbf16>, vector<16x48xf32> -> vector<16x48xf32>
    %103 = arith.addf %99, %102 : vector<16x48xf32>
    %c2_71 = arith.constant 2 : index
    %c0_72 = arith.constant 0 : index
    %c0_73 = arith.constant 0 : index
    %104 = vector.load %arg13[%c2_71, %c0_72, %c0_73] : memref<3x128x48xbf16, #tpu.memory_space<vmem>>, vector<1x128x48xbf16>
    %105 = vector.shape_cast %104 : vector<1x128x48xbf16> to vector<128x48xbf16>
    %cst_74 = arith.constant dense<0.000000e+00> : vector<16x48xf32>
    %106 = tpu.matmul %29, %105, %cst_74 {dimension_numbers = #tpu.dot_dimension_numbers<[1], [0], [0], [1], [0, 0, 1, 1], [], []>} : vector<16x128xbf16>, vector<128x48xbf16>, vector<16x48xf32> -> vector<16x48xf32>
    %107 = arith.addf %103, %106 : vector<16x48xf32>
    %c2_75 = arith.constant 2 : index
    %c0_76 = arith.constant 0 : index
    %c0_77 = arith.constant 0 : index
    %108 = vector.load %arg14[%c2_75, %c0_76, %c0_77] : memref<3x16x48xbf16, #tpu.memory_space<vmem>>, vector<1x16x48xbf16>
    %109 = vector.shape_cast %108 : vector<1x16x48xbf16> to vector<16x48xbf16>
    %cst_78 = arith.constant dense<0.000000e+00> : vector<16x48xf32>
    %110 = tpu.matmul %31, %109, %cst_78 {dimension_numbers = #tpu.dot_dimension_numbers<[1], [0], [0], [1], [0, 0, 1, 1], [], []>} : vector<16x16xbf16>, vector<16x48xbf16>, vector<16x48xf32> -> vector<16x48xf32>
    %111 = arith.addf %107, %110 : vector<16x48xf32>
    %cst_79 = arith.constant 0.000000e+00 : f32
    %112 = vector.broadcast %cst_79 : f32 to vector<1x48xf32>
    %113 = vector.extract_strided_slice %111 {offsets = [1, 0], sizes = [15, 48], strides = [1, 1]} : vector<16x48xf32> to vector<15x48xf32>
    %114 = tpu.concatenate %113, %112 in 0 : vector<15x48xf32>, vector<1x48xf32> -> vector<16x48xf32>
    %c1_i32_80 = arith.constant 1 : i32
    %115 = vector.broadcast %c1_i32_80 : i32 to vector<16x48xi32>
    %116 = arith.addi %49, %115 : vector<16x48xi32>
    %c0_i32_81 = arith.constant 0 : i32
    %117 = vector.broadcast %c0_i32_81 : i32 to vector<16x48xi32>
    %118 = arith.cmpi sge, %116, %117 : vector<16x48xi32>
    %c1_i32_82 = arith.constant 1 : i32
    %119 = vector.broadcast %c1_i32_82 : i32 to vector<16x48xi32>
    %120 = arith.addi %49, %119 : vector<16x48xi32>
    %c16_i32_83 = arith.constant 16 : i32
    %121 = vector.broadcast %c16_i32_83 : i32 to vector<16x48xi32>
    %122 = arith.cmpi slt, %120, %121 : vector<16x48xi32>
    %123 = arith.andi %118, %122 : vector<16x48xi1>
    %cst_84 = arith.constant 0.000000e+00 : f32
    %124 = vector.broadcast %cst_84 : f32 to vector<16x48xf32>
    %125 = arith.select %123, %114, %124 : vector<16x48xi1>, vector<16x48xf32>
    %126 = arith.addf %96, %125 : vector<16x48xf32>
    %127 = vector.broadcast %32 : vector<1x48xf32> to vector<16x48xf32>
    %128 = arith.addf %126, %127 : vector<16x48xf32>
    %c0_85 = arith.constant 0 : index
    %c0_86 = arith.constant 0 : index
    %c0_87 = arith.constant 0 : index
    %129 = vector.load %arg16[%c0_85, %c0_86, %c0_87] : memref<1x16x48xf32, #tpu.memory_space<vmem>>, vector<1x16x48xf32>
    %130 = vector.shape_cast %129 : vector<1x16x48xf32> to vector<16x48xf32>
    %131 = arith.addf %128, %130 : vector<16x48xf32>
    %132 = vector.shape_cast %131 : vector<16x48xf32> to vector<1x16x48xf32>
    %c0_88 = arith.constant 0 : index
    %c0_89 = arith.constant 0 : index
    %c0_90 = arith.constant 0 : index
    %133 = vector.load %arg17[%c0_88, %c0_89, %c0_90] : memref<1x16x48xf32, #tpu.memory_space<vmem>>, vector<1x16x48xf32>
    tpu.vector_store %arg17[%c0_88, %c0_89, %c0_90], %132 {strides = array<i32>} : memref<1x16x48xf32, #tpu.memory_space<vmem>>, vector<1x16x48xf32>,
    return
  }
  func.func @transform_0(%arg0: i32) -> (i32, i32, i32) {
    %c0_i32 = arith.constant 0 : i32
    %c0_i32_0 = arith.constant 0 : i32
    %c0_i32_1 = arith.constant 0 : i32
    return %arg0, %c0_i32, %c0_i32_0 : i32, i32, i32
  }
  func.func @transform_1(%arg0: i32) -> (i32, i32) {
    %c0_i32 = arith.constant 0 : i32
    %c0_i32_0 = arith.constant 0 : i32
    %c0_i32_1 = arith.constant 0 : i32
    return %c0_i32, %c0_i32_0 : i32, i32
  }
  func.func @transform_2(%arg0: i32) -> (i32, i32) {
    %c0_i32 = arith.constant 0 : i32
    %c0_i32_0 = arith.constant 0 : i32
    %c0_i32_1 = arith.constant 0 : i32
    return %c0_i32, %c0_i32_0 : i32, i32
  }
  func.func @transform_3(%arg0: i32) -> (i32, i32, i32) {
    %c0_i32 = arith.constant 0 : i32
    %c0_i32_0 = arith.constant 0 : i32
    %c0_i32_1 = arith.constant 0 : i32
    return %arg0, %c0_i32, %c0_i32_0 : i32, i32, i32
  }
  func.func @transform_4(%arg0: i32) -> (i32, i32) {
    %c0_i32 = arith.constant 0 : i32
    %c0_i32_0 = arith.constant 0 : i32
    %c0_i32_1 = arith.constant 0 : i32
    return %c0_i32, %c0_i32_0 : i32, i32
  }
  func.func @transform_5(%arg0: i32) -> (i32, i32) {
    %c0_i32 = arith.constant 0 : i32
    %c0_i32_0 = arith.constant 0 : i32
    %c0_i32_1 = arith.constant 0 : i32
    return %c0_i32, %c0_i32_0 : i32, i32
  }
  func.func @transform_6(%arg0: i32) -> (i32, i32, i32) {
    %c0_i32 = arith.constant 0 : i32
    %c0_i32_0 = arith.constant 0 : i32
    %c0_i32_1 = arith.constant 0 : i32
    return %arg0, %c0_i32, %c0_i32_0 : i32, i32, i32
  }
  func.func @transform_7(%arg0: i32) -> (i32, i32) {
    %c0_i32 = arith.constant 0 : i32
    %c0_i32_0 = arith.constant 0 : i32
    %c0_i32_1 = arith.constant 0 : i32
    return %c0_i32, %c0_i32_0 : i32, i32
  }
  func.func @transform_8(%arg0: i32) -> (i32, i32) {
    %c0_i32 = arith.constant 0 : i32
    %c0_i32_0 = arith.constant 0 : i32
    %c0_i32_1 = arith.constant 0 : i32
    return %c0_i32, %c0_i32_0 : i32, i32
  }
  func.func @transform_9(%arg0: i32) -> (i32, i32, i32) {
    %c0_i32 = arith.constant 0 : i32
    %c0_i32_0 = arith.constant 0 : i32
    %c0_i32_1 = arith.constant 0 : i32
    return %arg0, %c0_i32, %c0_i32_0 : i32, i32, i32
  }
  func.func @transform_10(%arg0: i32) -> (i32, i32, i32) {
    %c0_i32 = arith.constant 0 : i32
    %c0_i32_0 = arith.constant 0 : i32
    %c0_i32_1 = arith.constant 0 : i32
    %c0_i32_2 = arith.constant 0 : i32
    return %c0_i32, %c0_i32_0, %c0_i32_1 : i32, i32, i32
  }
  func.func @transform_11(%arg0: i32) -> (i32, i32, i32) {
    %c0_i32 = arith.constant 0 : i32
    %c0_i32_0 = arith.constant 0 : i32
    %c0_i32_1 = arith.constant 0 : i32
    %c0_i32_2 = arith.constant 0 : i32
    return %c0_i32, %c0_i32_0, %c0_i32_1 : i32, i32, i32
  }
  func.func @transform_12(%arg0: i32) -> (i32, i32, i32) {
    %c0_i32 = arith.constant 0 : i32
    %c0_i32_0 = arith.constant 0 : i32
    %c0_i32_1 = arith.constant 0 : i32
    %c0_i32_2 = arith.constant 0 : i32
    return %c0_i32, %c0_i32_0, %c0_i32_1 : i32, i32, i32
  }
  func.func @transform_13(%arg0: i32) -> (i32, i32, i32) {
    %c0_i32 = arith.constant 0 : i32
    %c0_i32_0 = arith.constant 0 : i32
    %c0_i32_1 = arith.constant 0 : i32
    %c0_i32_2 = arith.constant 0 : i32
    return %c0_i32, %c0_i32_0, %c0_i32_1 : i32, i32, i32
  }
  func.func @transform_14(%arg0: i32) -> (i32, i32) {
    %c0_i32 = arith.constant 0 : i32
    %c0_i32_0 = arith.constant 0 : i32
    %c0_i32_1 = arith.constant 0 : i32
    return %c0_i32, %c0_i32_0 : i32, i32
  }
  func.func @transform_15(%arg0: i32) -> (i32, i32, i32) {
    %c0_i32 = arith.constant 0 : i32
    %c0_i32_0 = arith.constant 0 : i32
    %c0_i32_1 = arith.constant 0 : i32
    return %arg0, %c0_i32, %c0_i32_0 : i32, i32, i32
  }
  func.func @transform_16(%arg0: i32) -> (i32, i32, i32) {
    %c0_i32 = arith.constant 0 : i32
    %c0_i32_0 = arith.constant 0 : i32
    %c0_i32_1 = arith.constant 0 : i32
    return %arg0, %c0_i32, %c0_i32_0 : i32, i32, i32
  }
}

</mosaic_0001>

<bundles_post_ra>
// kernel: tile.103
= control target key start
LH: loop header
LB: loop body
LE: loop exit
PB: predicated region body
PF: predicated region fallthrough
CT: control target
= control target key end

     0   :  { %s28_s0 = inlined_call_operand.vmem [shape: f32[8], index: 0, kind: input, shape index: {}]   ;;  %s29_s1 = inlined_call_operand.vmem [shape: f32[16,8], index: 1, kind: output, shape index: {}]  }
   0x1   :  { %v4_v0 = vld [vmem:[%s28_s0] ss:$0 sm:$0xff] }
   0x2   :  { %5 = vst [vmem:[%s29_s1] sm:$0xff] %v4_v0 }
   0x3   :  { %8 = vst [vmem:[%s29_s1 + $0x8] sm:$0xff] %v4_v0 }

// kernel: tile.104
= control target key start
LH: loop header
LB: loop body
LE: loop exit
PB: predicated region body
PF: predicated region fallthrough
CT: control target
= control target key end

     0   :  { %s131_s10 = smov 120   ;;  %s132_s11 = smov 104   ;;  %vm3_vm0 = vcmask 64512   ;;  %vm9_vm1 = vcmask 1048512   ;;  %vm15_vm2 = vcmask 982912   ;;  %vm21_vm3 = vcmask 917312   ;;  %s207_s0 = inlined_call_operand.vmem [shape: f32[16,8], index: 0, kind: input, shape index: {}]   ;;  %s208_s1 = inlined_call_operand.vmem [shape: f32[1,128], index: 1, kind: output, shape index: {}]  }
   0x1   :  { %v101_v0 = vld [vmem:[%s207_s0 + $0xf] sm:$0x1]   ;;  %v103_v1 = vld [vmem:[%s207_s0 + $0xd] sm:$0x1]   ;;  %v105_v2 = vld [vmem:[%s207_s0 + $0xb] sm:$0x1]  }
   0x2   :  { %7 = vrot.lane.b32.xlu0 %v101_v0, %s131_s10  ;;  %19 = vrot.lane.b32.xlu1 %v103_v1, %s132_s11  ;;  %s133_s14 = smov 88   ;;  %v102_v3 = vld [vmem:[%s207_s0 + $0xe] sm:$0x1]   ;;  %v104_v4 = vld [vmem:[%s207_s0 + $0xc] sm:$0x1]   ;;  %s134_s19 = smov 112  }
   0x3   :  { %31 = vrot.lane.b32.xlu2 %v105_v2, %s133_s14  ;;  %s135_s20 = smov 96   ;;  %v106_v5 = vld [vmem:[%s207_s0 + $0xa] sm:$0x1]   ;;  %s136_s23 = smov 80   ;;  %v107_v6 = vld [vmem:[%s207_s0 + $0x9] sm:$0x1]  }
   0x4   :  { %v108_v7 = vld [vmem:[%s207_s0 + $0x8] sm:$0x1]   ;;  %s137_s28 = smov 72   ;;  %s138_s29 = smov 64   ;;  %v109_v8 = vld [vmem:[%s207_s0 + $0x7] sm:$0x1]  }
   0x5   :  { %s139_s3 = smov 56   ;;  %v110_v9 = vld [vmem:[%s207_s0 + $0x6] sm:$0x1]   ;;  %v111_v10 = vld [vmem:[%s207_s0 + $0x5] sm:$0x1]   ;;  %s140_s8 = smov 48  }
   0x6   :  { %s141_s9 = smov 40   ;;  %v112_v11 = vld [vmem:[%s207_s0 + $0x4] sm:$0x1]   ;;  %s142_s12 = smov 32   ;;  %v113_v12 = vld [vmem:[%s207_s0 + $0x3] sm:$0x1]  }
   0x7   :  { %v114_v13 = vld [vmem:[%s207_s0 + $0x2] sm:$0x1]   ;;  %s143_s17 = smov 24   ;;  %s144_s18 = smov 16   ;;  %v115_v14 = vld [vmem:[%s207_s0 + $0x1] sm:$0x1]  }
   0x8   :  { %s145_s21 = smov 8   ;;  %v2_v15 = vld [vmem:[%s207_s0] sm:$0x1]   ;;  %vm27_vm4 = vcmask 851712   ;;  %vm33_vm5 = vcmask 786112   ;;  %vm39_vm6 = vcmask 720512  }
   0x9   :  { %4 = vst.msk [vmem:[#allocation0] sm:$0x1] %vm3_vm0, %v2_v15   ;;  %vm45_vm7 = vcmask 654912   ;;  %vm51_vm8 = vcmask 589312   ;;  %vm57_vm9 = vcmask 523712   ;;  %vm63_vm10 = vcmask 458112  }
   0xa   :  { %13 = vrot.lane.b32.xlu0 %v102_v3, %s134_s19  ;;  %25 = vrot.lane.b32.xlu1 %v104_v4, %s135_s20  ;;  %vm69_vm11 = vcmask 392512   ;;  %vm75_vm12 = vcmask 326912   ;;  %vm81_vm13 = vcmask 261312   ;;  %vm87_vm14 = vcmask 195712  }
   0xb   :  { %37 = vrot.lane.b32.xlu2 %v106_v5, %s136_s23  ;;  %vm93_vm15 = vcmask 130112  }
  0x12   :  { %43 = vrot.lane.b32.xlu0 %v107_v6, %s137_s28  ;;  %49 = vrot.lane.b32.xlu1 %v108_v7, %s138_s29 }
  0x13   :  { %55 = vrot.lane.b32.xlu2 %v109_v8, %s139_s3 }
  0x1a   :  { %61 = vrot.lane.b32.xlu0 %v110_v9, %s140_s8  ;;  %67 = vrot.lane.b32.xlu1 %v111_v10, %s141_s9 }
  0x1b   :  { %73 = vrot.lane.b32.xlu2 %v112_v11, %s142_s12 }
  0x22   :  { %79 = vrot.lane.b32.xlu0 %v113_v12, %s143_s17  ;;  %85 = vrot.lane.b32.xlu1 %v114_v13, %s144_s18 }
  0x23   :  { %91 = vrot.lane.b32.xlu2 %v115_v14, %s145_s21 }
  0x5d   :  { %v32_v16 = vpop.permute.xlu2 %31  }
  0x65   :  { %v38_v17 = vpop.permute.xlu2 %37  }
  0x6d   :  { %v56_v18 = vpop.permute.xlu2 %55  }
  0x74   :  { %v8_v19 = vpop.permute.xlu0 %7   ;;  %v20_v20 = vpop.permute.xlu1 %19  }
  0x75   :  { %10 = vst.msk [vmem:[#allocation0] sm:$0x1] %vm9_vm1, %v8_v19   ;;  %v74_v21 = vpop.permute.xlu2 %73  }
  0x7c   :  { %v14_v22 = vpop.permute.xlu0 %13   ;;  %v26_v23 = vpop.permute.xlu1 %25  }
  0x7d   :  { %16 = vst.msk [vmem:[#allocation0] sm:$0x1] %vm15_vm2, %v14_v22   ;;  %v92_v24 = vpop.permute.xlu2 %91  }
  0x7e   :  { %22 = vst.msk [vmem:[#allocation0] sm:$0x1] %vm21_vm3, %v20_v20  }
  0x7f   :  { %28 = vst.msk [vmem:[#allocation0] sm:$0x1] %vm27_vm4, %v26_v23  }
  0x80   :  { %34 = vst.msk [vmem:[#allocation0] sm:$0x1] %vm33_vm5, %v32_v16  }
  0x81   :  { %40 = vst.msk [vmem:[#allocation0] sm:$0x1] %vm39_vm6, %v38_v17  }
  0x84   :  { %v44_v25 = vpop.permute.xlu0 %43   ;;  %v50_v26 = vpop.permute.xlu1 %49  }
  0x85   :  { %46 = vst.msk [vmem:[#allocation0] sm:$0x1] %vm45_vm7, %v44_v25  }
  0x86   :  { %52 = vst.msk [vmem:[#allocation0] sm:$0x1] %vm51_vm8, %v50_v26  }
  0x87   :  { %58 = vst.msk [vmem:[#allocation0] sm:$0x1] %vm57_vm9, %v56_v18  }
  0x8c   :  { %v62_v27 = vpop.permute.xlu0 %61   ;;  %v68_v28 = vpop.permute.xlu1 %67  }
  0x8d   :  { %64 = vst.msk [vmem:[#allocation0] sm:$0x1] %vm63_vm10, %v62_v27  }
  0x8e   :  { %70 = vst.msk [vmem:[#allocation0] sm:$0x1] %vm69_vm11, %v68_v28  }
  0x8f   :  { %76 = vst.msk [vmem:[#allocation0] sm:$0x1] %vm75_vm12, %v74_v21  }
  0x94   :  { %v80_v29 = vpop.permute.xlu0 %79   ;;  %v86_v30 = vpop.permute.xlu1 %85  }
  0x95   :  { %82 = vst.msk [vmem:[#allocation0] sm:$0x1] %vm81_vm13, %v80_v29  }
  0x96   :  { %88 = vst.msk [vmem:[#allocation0] sm:$0x1] %vm87_vm14, %v86_v30  }
  0x97   :  { %94 = vst.msk [vmem:[#allocation0] sm:$0x1] %vm93_vm15, %v92_v24  }
  0x9e   :  { %v97_v31 = vld [vmem:[#allocation0] sm:$0x1] }
  0x9f   :  { %100 = vst [vmem:[%s208_s1] sm:$0x1] %v97_v31 }

// kernel: tile.93
= control target key start
LH: loop header
LB: loop body
LE: loop exit
PB: predicated region body
PF: predicated region fallthrough
CT: control target
= control target key end

     0   :  { %s28_s0 = inlined_call_operand.vmem [shape: f32[4], index: 0, kind: input, shape index: {}]   ;;  %s29_s1 = inlined_call_operand.vmem [shape: f32[16,4], index: 1, kind: output, shape index: {}]  }
   0x1   :  { %v4_v0 = vld [vmem:[%s28_s0] ss:$0 sm:$0xff] }
   0x2   :  { %5 = vst [vmem:[%s29_s1] sm:$0xff] %v4_v0 }
   0x3   :  { %8 = vst [vmem:[%s29_s1 + $0x8] sm:$0xff] %v4_v0 }

// kernel: tile.94
= control target key start
LH: loop header
LB: loop body
LE: loop exit
PB: predicated region body
PF: predicated region fallthrough
CT: control target
= control target key end

     0   :  { %s131_s10 = smov 60   ;;  %s132_s11 = smov 52   ;;  %vm3_vm0 = vcmask 31744   ;;  %vm9_vm1 = vcmask 523744   ;;  %vm15_vm2 = vcmask 490944   ;;  %vm21_vm3 = vcmask 458144   ;;  %s207_s0 = inlined_call_operand.vmem [shape: f32[16,4], index: 0, kind: input, shape index: {}]   ;;  %s208_s1 = inlined_call_operand.vmem [shape: f32[1,64], index: 1, kind: output, shape index: {}]  }
   0x1   :  { %v101_v0 = vld [vmem:[%s207_s0 + $0xf] sm:$0x1]   ;;  %v103_v1 = vld [vmem:[%s207_s0 + $0xd] sm:$0x1]   ;;  %v105_v2 = vld [vmem:[%s207_s0 + $0xb] sm:$0x1]  }
   0x2   :  { %7 = vrot.lane.b32.xlu0 %v101_v0, %s131_s10  ;;  %19 = vrot.lane.b32.xlu1 %v103_v1, %s132_s11  ;;  %s133_s14 = smov 44   ;;  %v102_v3 = vld [vmem:[%s207_s0 + $0xe] sm:$0x1]   ;;  %v104_v4 = vld [vmem:[%s207_s0 + $0xc] sm:$0x1]   ;;  %s134_s19 = smov 56  }
   0x3   :  { %31 = vrot.lane.b32.xlu2 %v105_v2, %s133_s14  ;;  %s135_s20 = smov 48   ;;  %v106_v5 = vld [vmem:[%s207_s0 + $0xa] sm:$0x1]   ;;  %s136_s23 = smov 40   ;;  %v107_v6 = vld [vmem:[%s207_s0 + $0x9] sm:$0x1]  }
   0x4   :  { %v108_v7 = vld [vmem:[%s207_s0 + $0x8] sm:$0x1]   ;;  %s137_s28 = smov 36   ;;  %s138_s29 = smov 32   ;;  %v109_v8 = vld [vmem:[%s207_s0 + $0x7] sm:$0x1]  }
   0x5   :  { %s139_s3 = smov 28   ;;  %v110_v9 = vld [vmem:[%s207_s0 + $0x6] sm:$0x1]   ;;  %v111_v10 = vld [vmem:[%s207_s0 + $0x5] sm:$0x1]   ;;  %s140_s8 = smov 24  }
   0x6   :  { %s141_s9 = smov 20   ;;  %v112_v11 = vld [vmem:[%s207_s0 + $0x4] sm:$0x1]   ;;  %s142_s12 = smov 16   ;;  %v113_v12 = vld [vmem:[%s207_s0 + $0x3] sm:$0x1]  }
   0x7   :  { %v114_v13 = vld [vmem:[%s207_s0 + $0x2] sm:$0x1]   ;;  %s143_s17 = smov 12   ;;  %s144_s18 = smov 8   ;;  %v115_v14 = vld [vmem:[%s207_s0 + $0x1] sm:$0x1]  }
   0x8   :  { %s145_s21 = smov 4   ;;  %v2_v15 = vld [vmem:[%s207_s0] sm:$0x1]   ;;  %vm27_vm4 = vcmask 425344   ;;  %vm33_vm5 = vcmask 392544   ;;  %vm39_vm6 = vcmask 359744  }
   0x9   :  { %4 = vst.msk [vmem:[#allocation0] sm:$0x1] %vm3_vm0, %v2_v15   ;;  %vm45_vm7 = vcmask 326944   ;;  %vm51_vm8 = vcmask 294144   ;;  %vm57_vm9 = vcmask 261344   ;;  %vm63_vm10 = vcmask 228544  }
   0xa   :  { %13 = vrot.lane.b32.xlu0 %v102_v3, %s134_s19  ;;  %25 = vrot.lane.b32.xlu1 %v104_v4, %s135_s20  ;;  %vm69_vm11 = vcmask 195744   ;;  %vm75_vm12 = vcmask 162944   ;;  %vm81_vm13 = vcmask 130144   ;;  %vm87_vm14 = vcmask 97344  }
   0xb   :  { %37 = vrot.lane.b32.xlu2 %v106_v5, %s136_s23  ;;  %vm93_vm15 = vcmask 64544  }
  0x12   :  { %43 = vrot.lane.b32.xlu0 %v107_v6, %s137_s28  ;;  %49 = vrot.lane.b32.xlu1 %v108_v7, %s138_s29 }
  0x13   :  { %55 = vrot.lane.b32.xlu2 %v109_v8, %s139_s3 }
  0x1a   :  { %61 = vrot.lane.b32.xlu0 %v110_v9, %s140_s8  ;;  %67 = vrot.lane.b32.xlu1 %v111_v10, %s141_s9 }
  0x1b   :  { %73 = vrot.lane.b32.xlu2 %v112_v11, %s142_s12 }
  0x22   :  { %79 = vrot.lane.b32.xlu0 %v113_v12, %s143_s17  ;;  %85 = vrot.lane.b32.xlu1 %v114_v13, %s144_s18 }
  0x23   :  { %91 = vrot.lane.b32.xlu2 %v115_v14, %s145_s21 }
  0x5d   :  { %v32_v16 = vpop.permute.xlu2 %31  }
  0x65   :  { %v38_v17 = vpop.permute.xlu2 %37  }
  0x6d   :  { %v56_v18 = vpop.permute.xlu2 %55  }
  0x74   :  { %v8_v19 = vpop.permute.xlu0 %7   ;;  %v20_v20 = vpop.permute.xlu1 %19  }
  0x75   :  { %10 = vst.msk [vmem:[#allocation0] sm:$0x1] %vm9_vm1, %v8_v19   ;;  %v74_v21 = vpop.permute.xlu2 %73  }
  0x7c   :  { %v14_v22 = vpop.permute.xlu0 %13   ;;  %v26_v23 = vpop.permute.xlu1 %25  }
  0x7d   :  { %16 = vst.msk [vmem:[#allocation0] sm:$0x1] %vm15_vm2, %v14_v22   ;;  %v92_v24 = vpop.permute.xlu2 %91  }
  0x7e   :  { %22 = vst.msk [vmem:[#allocation0] sm:$0x1] %vm21_vm3, %v20_v20  }
  0x7f   :  { %28 = vst.msk [vmem:[#allocation0] sm:$0x1] %vm27_vm4, %v26_v23  }
  0x80   :  { %34 = vst.msk [vmem:[#allocation0] sm:$0x1] %vm33_vm5, %v32_v16  }
  0x81   :  { %40 = vst.msk [vmem:[#allocation0] sm:$0x1] %vm39_vm6, %v38_v17  }
  0x84   :  { %v44_v25 = vpop.permute.xlu0 %43   ;;  %v50_v26 = vpop.permute.xlu1 %49  }
  0x85   :  { %46 = vst.msk [vmem:[#allocation0] sm:$0x1] %vm45_vm7, %v44_v25  }
  0x86   :  { %52 = vst.msk [vmem:[#allocation0] sm:$0x1] %vm51_vm8, %v50_v26  }
  0x87   :  { %58 = vst.msk [vmem:[#allocation0] sm:$0x1] %vm57_vm9, %v56_v18  }
  0x8c   :  { %v62_v27 = vpop.permute.xlu0 %61   ;;  %v68_v28 = vpop.permute.xlu1 %67  }
  0x8d   :  { %64 = vst.msk [vmem:[#allocation0] sm:$0x1] %vm63_vm10, %v62_v27  }
  0x8e   :  { %70 = vst.msk [vmem:[#allocation0] sm:$0x1] %vm69_vm11, %v68_v28  }
  0x8f   :  { %76 = vst.msk [vmem:[#allocation0] sm:$0x1] %vm75_vm12, %v74_v21  }
  0x94   :  { %v80_v29 = vpop.permute.xlu0 %79   ;;  %v86_v30 = vpop.permute.xlu1 %85  }
  0x95   :  { %82 = vst.msk [vmem:[#allocation0] sm:$0x1] %vm81_vm13, %v80_v29  }
  0x96   :  { %88 = vst.msk [vmem:[#allocation0] sm:$0x1] %vm87_vm14, %v86_v30  }
  0x97   :  { %94 = vst.msk [vmem:[#allocation0] sm:$0x1] %vm93_vm15, %v92_v24  }
  0x9e   :  { %v97_v31 = vld [vmem:[#allocation0] sm:$0x1] }
  0x9f   :  { %100 = vst [vmem:[%s208_s1] sm:$0x1] %v97_v31 }

// kernel: dense_encoder_forward.6
= control target key start
LH: loop header
LB: loop body
LE: loop exit
PB: predicated region body
PF: predicated region fallthrough
CT: control target
= control target key end

     0   :  { %s647_s15 = smov 0   ;;  %s704_s0 = inlined_call_operand.vmem [shape: f32[2,16,48], index: 0, kind: input, shape index: {}]   ;;  %s705_s1 = inlined_call_operand.vmem [shape: bf16[3,48,128], index: 1, kind: input, shape index: {}]   ;;  %s706_s2 = inlined_call_operand.vmem [shape: f32[1,128], index: 2, kind: input, shape index: {}]   ;;  %s707_s3 = inlined_call_operand.vmem [shape: bf16[2,16,128], index: 3, kind: output, shape index: {0}]   ;;  %s708_s4 = inlined_call_operand.vmem [shape: f32[2,8,128], index: 4, kind: output, shape index: {1}]  }
   0x1 LB: > { %s526_s16 = sadd.s32 4294967295, %s620_s15   ;;  %p530_p0 = scmp.ge.s32.totalorder %s620_s15, 1  ;;  %s620_s15 = sphi %s647_s15, %s15_s15  }
   0x2   : > { %p165_p1 = scmp.lt.s32.totalorder %s620_s15, 3 }
   0x4   : > { %p166_p2 = pnand %p530_p0, %p165_p1 }
   0x5   : > { %p195_p3 = scmp.lt.s32.totalorder (!%p166_p2), %s526_s16, 1 }
   0x6   : > { %169 = sbr.rel (%p166_p2) target bundleno = 194 (0xc2), region = 32 }
   0xb   : > { %v593_v0 = vld [vmem:[%s705_s1 + $0x10] sm:$0xff]  ;;  %v596_v1 = vld [vmem:[%s705_s1 + $0x28] sm:$0xff]  ;;  %v599_v2 = vld [vmem:[%s705_s1 + $0x40] sm:$0xff]  ;;  %s710_s16 = smov (!%p195_p3, %s526_s16), 1  ;;  %vm265_vm0 = vcmask 392192   ;;  %v214_v12 = vlaneseq  ;;  %vm285_vm1 = vcmask 1040384  }
   0xc   : > { %274 = vmatpush.bf16.msra.mxu0 %v593_v0  ;;  %334 = vmatpush.bf16.msra.mxu1 %v596_v1  ;;  %v592_v3 = vld [vmem:[%s705_s1 + $0x8] sm:$0xff]  ;;  %v595_v4 = vld [vmem:[%s705_s1 + $0x20] sm:$0xff]  ;;  %v598_v5 = vld [vmem:[%s705_s1 + $0x38] sm:$0xff]  ;;  %s589_s29 = sshll.u32 %s710_s16, 4  ;;  %vm386_vm3 = vcmask 1046528   ;;  %s590_s17 = sshll.u32 %s710_s16, 3 }
   0xd   : > { %375 = vmatpush.bf16.msra.mxu2 %v599_v2  ;;  %v591_v6 = vld [vmem:[%s705_s1] sm:$0xff]  ;;  %s199_s8 = scalar_lea.vmem %s704_s0, %s589_s29  ;;  %v594_v7 = vld [vmem:[%s705_s1 + $0x18] sm:$0xff]  ;;  %v597_v10 = vld [vmem:[%s705_s1 + $0x30] sm:$0xff]  ;;  %v215_v13 = vshrl.u32 %v214_v12, 7  ;;  %s204_s20 = scalar_lea.vmem %s707_s3, %s590_s17  ;;  %vm433_vm7 = vcmask 1041408  }
   0xe   : > { %v210_v8 = vld [vmem:[%s199_s8] sm:$0xff]  ;;  %v211_v9 = vld [vmem:[%s199_s8 + $0x8] sm:$0xff]  ;;  %s208_s22 = scalar_lea.vmem %s708_s4, %s590_s17 }
   0xf   : > { %v212_v11 = vpack.c.bf16 %v211_v9, %v210_v8  ;;  %v221_v15 = vand.u32 15, %v215_v13  ;;  %v216_v16 = vadd.s32 8, %v215_v13  ;;  %v613_v33 = vld [vmem:[%s706_s2] ss:$0 sm:$0xff] }
  0x10   : > { %275 = vmatpush.bf16.msra.mxu0 %v592_v3  ;;  %335 = vmatpush.bf16.msra.mxu1 %v595_v4 }
  0x11   : > { %376 = vmatpush.bf16.msra.mxu2 %v598_v5  ;;  %v292_v18 = vadd.s32 4294967295, %v221_v15  ;;  %v228_v22 = vand.u32 15, %v216_v16 }
  0x13   : > { %vm294_vm2 = vcmp.ge.s32.totalorder %v292_v18, 0  ;;  %v394_v25 = vadd.s32 1, %v228_v22 }
  0x14   : > { %276 = vmatpush.bf16.msra.mxu0 %v591_v6  ;;  %336 = vmatpush.bf16.msra.mxu1 %v594_v7 }
  0x15   : > { %377 = vmatpush.bf16.msra.mxu2 %v597_v10  ;;  %vm398_vm4 = vcmp.lt.s32.totalorder %v394_v25, 16 }
  0x17   : > { %548 = vmatmul.msk.bf16.vlgmr.msra.gmra.mxu0 %vm265_vm0, %v212_v11  ;;  %567 = vmatmul.msk.bf16.vlgmr.msra.gmra.mxu1 %vm265_vm0, %v212_v11 }
  0x18   : > { %586 = vmatmul.msk.bf16.vlgmr.msra.gmra.mxu2 %vm265_vm0, %v212_v11 }
  0x94   : > { %v278_v14 = vpop.f32.mrf.mxu0  ;;  %v338_v19 = vpop.f32.mrf.mxu1 }
  0x95   : > { %v286_v17 = vrot.slane %v278_v14, 7 }
  0x97   : > { %v291_v23 = vsel %vm285_vm1, 0.0, %v286_v17 }
  0x98   : > { %v300_v26 = vsel %vm294_vm2, %v291_v23, 0.0 }
  0x99   : > { %v343_v31 = vadd.f32 %v338_v19, %v300_v26 }
  0x9b   : > { %v379_v20 = vpop.f32.mrf.mxu2 }
  0x9c   : > { %v280_v21 = vpop.f32.mrf.mxu0  ;;  %v387_v29 = vrot.slane %v379_v20, 1  ;;  %v340_v32 = vpop.f32.mrf.mxu1 }
  0x9d   : > { %v287_v24 = vrot.slane %v280_v21, 7 }
  0x9f   : > { %v288_v27 = vsel %vm285_vm1, %v286_v17, %v287_v24 }
  0xa0   : > { %v344_v34 = vadd.f32 %v340_v32, %v288_v27 }
  0xa3   : > { %v381_v28 = vpop.f32.mrf.mxu2 }
  0xa4   : > { %v388_v30 = vrot.slane %v381_v28, 1 }
  0xa6   : > { %v389_v35 = vsel %vm386_vm3, %v387_v29, %v388_v30  ;;  %v392_v36 = vsel %vm386_vm3, %v388_v30, 0.0 }
  0xa7   : > { %v402_v37 = vsel %vm398_vm4, %v392_v36, 0.0  ;;  %v403_v38 = vadd.f32 %v389_v35, %v343_v31 }
  0xa8   : > { %v404_v39 = vadd.f32 %v402_v37, %v344_v34 }
  0xa9   : > { %v408_v40 = vadd.f32 %v613_v33, %v403_v38 }
  0xaa   : > { %v409_v41 = vadd.f32 %v613_v33, %v404_v39 }
  0xab   : > { %vm410_vm5 = vcmp.ge.f32.partialorder %v408_v40, 0.0  ;;  %v412_v42 = vmul.f32 0.01, %v408_v40 }
  0xac   : > { %vm411_vm6 = vcmp.ge.f32.partialorder %v409_v41, 0.0  ;;  %v413_v43 = vmul.f32 0.01, %v409_v41 }
  0xad   : > { %v414_v44 = vsel %vm410_vm5, %v408_v40, %v412_v42 }
  0xae   : > { %v415_v45 = vsel %vm411_vm6, %v409_v41, %v413_v43  ;;  %v423_v46 = vmul.f32 %v414_v44, %v414_v44 }
  0xaf   : > { %v416_v47 = vadd.f32 %v415_v45, %v414_v44  ;;  %v424_v48 = vmul.f32 %v415_v45, %v415_v45  ;;  %v603_v49 = vpack.c.bf16 %v415_v45, %v414_v44 }
  0xb1   : > { %v417_v50 = vrot.slane %v416_v47, 4  ;;  %v425_v51 = vadd.f32 %v424_v48, %v423_v46  ;;  %604 = vst [vmem:[%s204_s20] sm:$0xff] %v603_v49  }
  0xb3   : > { %v418_v52 = vadd.f32 %v417_v50, %v416_v47  ;;  %v426_v53 = vrot.slane %v425_v51, 4 }
  0xb5   : > { %v419_v54 = vrot.slane %v418_v52, 2  ;;  %v427_v55 = vadd.f32 %v426_v53, %v425_v51 }
  0xb7   : > { %v420_v56 = vadd.f32 %v419_v54, %v418_v52  ;;  %v428_v57 = vrot.slane %v427_v55, 2 }
  0xb9   : > { %v421_v58 = vrot.slane %v420_v56, 1  ;;  %v429_v59 = vadd.f32 %v428_v57, %v427_v55 }
  0xbb   : > { %v430_v60 = vrot.slane %v429_v59, 1  ;;  %v422_v61 = vadd.f32 %v421_v58, %v420_v56 }
  0xbd   : > { %v431_v62 = vadd.f32 %v430_v60, %v429_v59 }
  0xbf   : > { %v432_v63 = vsel %vm285_vm1, %v422_v61, %v431_v62 }
  0xc0   : > { %v434_v0 = vsel %vm433_vm7, %v432_v63, 0.0 }
  0xc1   : > { %435 = vst [vmem:[%s208_s22] sm:$0xff] %v434_v0 }
  0xc2 PF: > { %s15_s15 = sadd.s32 1, %s620_s15  }
  0xc3   : > { %p12_p4 = scmp.ge.s32.totalorder %s15_s15, 4  }
  0xc5   :  { %14 = sbr.rel (!%p12_p4) target bundleno = 1 (0x1), region = 76 }

// kernel: dense_encoder_forward.5
= control target key start
LH: loop header
LB: loop body
LE: loop exit
PB: predicated region body
PF: predicated region fallthrough
CT: control target
= control target key end

     0   :  { %s777_s18 = smov 0   ;;  %s861_s0 = inlined_call_operand.vmem [shape: f32[2,16,16], index: 0, kind: input, shape index: {}]   ;;  %s862_s1 = inlined_call_operand.vmem [shape: bf16[3,16,64], index: 1, kind: input, shape index: {}]   ;;  %s863_s2 = inlined_call_operand.vmem [shape: f32[1,64], index: 2, kind: input, shape index: {}]   ;;  %s864_s3 = inlined_call_operand.vmem [shape: bf16[3,64,16], index: 3, kind: input, shape index: {}]   ;;  %s865_s4 = inlined_call_operand.vmem [shape: f32[1,16], index: 4, kind: input, shape index: {}]   ;;  %s866_s5 = inlined_call_operand.vmem [shape: bf16[2,16,16], index: 5, kind: output, shape index: {}]  }
   0x1 LB: > { %s615_s19 = sadd.s32 4294967295, %s745_s18   ;;  %p619_p0 = scmp.ge.s32.totalorder %s745_s18, 1  ;;  %s745_s18 = sphi %s777_s18, %s15_s18  }
   0x2   : > { %p187_p1 = scmp.lt.s32.totalorder %s745_s18, 3 }
   0x4   : > { %p188_p2 = pnand %p619_p0, %p187_p1 }
   0x5   : > { %p215_p3 = scmp.lt.s32.totalorder (!%p188_p2), %s615_s19, 1 }
   0x6   : > { %191 = sbr.rel (%p188_p2) target bundleno = 320 (0x140), region = 40 }
   0xb   : > { %v714_v0 = vld [vmem:[%s862_s1] sm:$0xff]  ;;  %v715_v1 = vld [vmem:[%s862_s1 + $0x8] sm:$0xff]  ;;  %v716_v2 = vld [vmem:[%s862_s1 + $0x10] sm:$0xff]  ;;  %s868_s19 = smov (!%p215_p3, %s615_s19), 1  ;;  %vm265_vm0 = vcmask 130048   ;;  %v230_v18 = vlaneseq  ;;  %vm285_vm1 = vcmask 1040384  }
   0xc   : > { %276 = vmatpush.bf16.msra.mxu0 %v714_v0  ;;  %320 = vmatpush.bf16.msra.mxu1 %v715_v1  ;;  %s712_s26 = sshll.u32 %s868_s19, 4  ;;  %v720_v6 = vld [vmem:[%s864_s3 + $0x18] sm:$0xff]  ;;  %v719_v9 = vld [vmem:[%s864_s3 + $0x10] sm:$0xff]  ;;  %v718_v12 = vld [vmem:[%s864_s3 + $0x8] sm:$0xff]  ;;  %vm354_vm3 = vcmask 1046528   ;;  %vm412_vm5 = vcmask 523264  }
   0xd   : > { %345 = vmatpush.bf16.msra.mxu2 %v716_v2  ;;  %s219_s29 = scalar_lea.vmem %s861_s0, %s712_s26  ;;  %v724_v7 = vld [vmem:[%s864_s3 + $0x38] sm:$0xff]  ;;  %420 = vmatpush.bf16.msra.mxu3 %v720_v6  ;;  %v723_v10 = vld [vmem:[%s864_s3 + $0x30] sm:$0xff]  ;;  %v722_v13 = vld [vmem:[%s864_s3 + $0x28] sm:$0xff]  ;;  %v231_v19 = vshrl.u32 %v230_v18, 7  ;;  %s713_s10 = sshll.u32 %s868_s19, 3  ;;  %vm557_vm6 = vcmask 125952  }
   0xe   : > { %v226_v3 = vld [vmem:[%s219_s29] sm:$0xff]  ;;  %v227_v4 = vld [vmem:[%s219_s29 + $0x8] sm:$0xff]  ;;  %v728_v8 = vld [vmem:[%s864_s3 + $0x58] sm:$0xff]  ;;  %s224_s13 = scalar_lea.vmem %s866_s5, %s713_s10 }
   0xf   : > { %v228_v5 = vpack.c.bf16 %v227_v4, %v226_v3  ;;  %v727_v11 = vld [vmem:[%s864_s3 + $0x50] sm:$0xff]  ;;  %v726_v14 = vld [vmem:[%s864_s3 + $0x48] sm:$0xff]  ;;  %v717_v15 = vld [vmem:[%s864_s3] sm:$0xff]  ;;  %v237_v21 = vand.u32 15, %v231_v19  ;;  %v232_v22 = vadd.s32 8, %v231_v19 }
  0x10   : > { %479 = vmatpush.bf16.msrb.mxu0 %v724_v7  ;;  %528 = vmatpush.bf16.msrb.mxu1 %v728_v8  ;;  %v721_v16 = vld [vmem:[%s864_s3 + $0x20] sm:$0xff] }
  0x11   : > { %628 = vmatmul.msk.bf16.vlgmr.msra.gmra.mxu0 %vm265_vm0, %v228_v5  ;;  %635 = vmatmul.msk.bf16.vlgmr.msra.gmra.mxu1 %vm265_vm0, %v228_v5  ;;  %v725_v17 = vld [vmem:[%s864_s3 + $0x40] sm:$0xff]  ;;  %v292_v24 = vadd.s32 4294967295, %v237_v21  ;;  %v244_v28 = vand.u32 15, %v232_v22 }
  0x12   : > { %642 = vmatmul.msk.bf16.vlgmr.msra.gmra.mxu2 %vm265_vm0, %v228_v5  ;;  %421 = vmatpush.bf16.msra.mxu3 %v719_v9  ;;  %v737_v39 = vld [vmem:[%s863_s2] ss:$0 sm:$0xff] }
  0x13   : > { %vm294_vm2 = vcmp.ge.s32.totalorder %v292_v24, 0  ;;  %v362_v31 = vadd.s32 1, %v244_v28  ;;  %v738_v59 = vld [vmem:[%s865_s4] ss:$0 sm:$0xff] }
  0x14   : > { %480 = vmatpush.bf16.msrb.mxu0 %v723_v10  ;;  %529 = vmatpush.bf16.msrb.mxu1 %v727_v11 }
  0x15   : > { %vm366_vm4 = vcmp.lt.s32.totalorder %v362_v31, 16 }
  0x16   : > { %422 = vmatpush.bf16.msra.mxu3 %v718_v12 }
  0x18   : > { %481 = vmatpush.bf16.msrb.mxu0 %v722_v13  ;;  %530 = vmatpush.bf16.msrb.mxu1 %v726_v14 }
  0x1a   : > { %423 = vmatpush.bf16.msra.mxu3 %v717_v15 }
  0x1c   : > { %482 = vmatpush.bf16.msrb.mxu0 %v721_v16  ;;  %531 = vmatpush.bf16.msrb.mxu1 %v725_v17 }
  0x8e   : > { %v278_v20 = vpop.f32.mrf.mxu0  ;;  %v322_v25 = vpop.f32.mrf.mxu1 }
  0x8f   : > { %v286_v23 = vrot.slane %v278_v20, 7 }
  0x91   : > { %v291_v29 = vsel %vm285_vm1, 0.0, %v286_v23 }
  0x92   : > { %v300_v32 = vsel %vm294_vm2, %v291_v29, 0.0 }
  0x93   : > { %v327_v37 = vadd.f32 %v322_v25, %v300_v32 }
  0x95   : > { %v347_v26 = vpop.f32.mrf.mxu2 }
  0x96   : > { %v280_v27 = vpop.f32.mrf.mxu0  ;;  %v355_v35 = vrot.slane %v347_v26, 1  ;;  %v324_v38 = vpop.f32.mrf.mxu1 }
  0x97   : > { %v287_v30 = vrot.slane %v280_v27, 7 }
  0x99   : > { %v288_v33 = vsel %vm285_vm1, %v286_v23, %v287_v30 }
  0x9a   : > { %v328_v40 = vadd.f32 %v324_v38, %v288_v33 }
  0x9d   : > { %v349_v34 = vpop.f32.mrf.mxu2 }
  0x9e   : > { %v356_v36 = vrot.slane %v349_v34, 1 }
  0xa0   : > { %v357_v41 = vsel %vm354_vm3, %v355_v35, %v356_v36  ;;  %v360_v42 = vsel %vm354_vm3, %v356_v36, 0.0 }
  0xa1   : > { %v370_v43 = vsel %vm366_vm4, %v360_v42, 0.0  ;;  %v371_v44 = vadd.f32 %v357_v41, %v327_v37 }
  0xa2   : > { %v372_v45 = vadd.f32 %v370_v43, %v328_v40 }
  0xa3   : > { %v376_v46 = vadd.f32 %v737_v39, %v371_v44 }
  0xa4   : > { %v377_v47 = vadd.f32 %v737_v39, %v372_v45 }
  0xa6   : > { %v378_v48 = vpack.c.bf16 %v377_v47, %v376_v46 }
  0xa8   : > { %659 = vmatmul.msk.bf16.vlgmr.msra.gmra.mxu3 %vm412_vm5, %v378_v48  ;;  %684 = vmatmul.msk.bf16.vlgmr.msrb.gmra.mxu0 %vm412_vm5, %v378_v48 }
  0xa9   : > { %709 = vmatmul.msk.bf16.vlgmr.msrb.gmra.mxu1 %vm412_vm5, %v378_v48 }
 0x125   : > { %v484_v51 = vpop.f32.mrf.mxu0 }
 0x126   : > { %v533_v49 = vpop.f32.mrf.mxu1 }
 0x127   : > { %v540_v55 = vrot.slane %v533_v49, 1 }
 0x12b   : > { %v425_v50 = vpop.f32.mrf.mxu3 }
 0x12c   : > { %v432_v52 = vrot.slane %v425_v50, 7 }
 0x12d   : > { %v486_v2 = vpop.f32.mrf.mxu0 }
 0x12e   : > { %v437_v53 = vsel %vm285_vm1, 0.0, %v432_v52  ;;  %v535_v54 = vpop.f32.mrf.mxu1 }
 0x12f   : > { %v438_v56 = vsel %vm294_vm2, %v437_v53, 0.0  ;;  %v541_v57 = vrot.slane %v535_v54, 1 }
 0x130   : > { %v489_v58 = vadd.f32 %v484_v51, %v438_v56 }
 0x131   : > { %v542_v60 = vsel %vm354_vm3, %v540_v55, %v541_v57  ;;  %v545_v1 = vsel %vm354_vm3, %v541_v57, 0.0 }
 0x132   : > { %v548_v61 = vadd.f32 %v542_v60, %v489_v58  ;;  %v547_v6 = vsel %vm366_vm4, %v545_v1, 0.0 }
 0x133   : > { %v427_v62 = vpop.f32.mrf.mxu3 }
 0x134   : > { %v553_v63 = vadd.f32 %v738_v59, %v548_v61  ;;  %v433_v0 = vrot.slane %v427_v62, 7 }
 0x136   : > { %v555_v3 = vpack.c.bf16 %v553_v63, %v553_v63  ;;  %v434_v4 = vsel %vm285_vm1, %v432_v52, %v433_v0 }
 0x137   : > { %v490_v5 = vadd.f32 %v486_v2, %v434_v4 }
 0x138   : > { %558 = vst.msk [vmem:[%s224_s13] sm:$0xf] %vm557_vm6, %v555_v3 }
 0x139   : > { %v549_v7 = vadd.f32 %v547_v6, %v490_v5 }
 0x13b   : > { %v554_v8 = vadd.f32 %v738_v59, %v549_v7 }
 0x13d   : > { %v556_v9 = vpack.c.bf16 %v554_v8, %v554_v8 }
 0x13f   : > { %559 = vst.msk [vmem:[%s224_s13 + $0x4] sm:$0xf] %vm557_vm6, %v556_v9 }
 0x140 PF: > { %s15_s18 = sadd.s32 1, %s745_s18  }
 0x141   : > { %p12_p4 = scmp.ge.s32.totalorder %s15_s18, 4  }
 0x143   :  { %14 = sbr.rel (!%p12_p4) target bundleno = 1 (0x1), region = 74 }

// kernel: dense_encoder_forward.7
= control target key start
LH: loop header
LB: loop body
LE: loop exit
PB: predicated region body
PF: predicated region fallthrough
CT: control target
= control target key end

     0   :  { %s1144_s27 = smov 0   ;;  %s1269_s0 = inlined_call_operand.vmem [shape: bf16[2,16,128], index: 0, kind: input, shape index: {}]   ;;  %s1270_s1 = inlined_call_operand.vmem [shape: f32[1,128], index: 1, kind: input, shape index: {}]   ;;  %s1271_s2 = inlined_call_operand.vmem [shape: f32[1,128], index: 2, kind: input, shape index: {}]   ;;  %s1272_s3 = inlined_call_operand.vmem [shape: bf16[2,16,16], index: 3, kind: input, shape index: {}]   ;;  %s1273_s4 = inlined_call_operand.vmem [shape: bf16[3,128,128], index: 4, kind: input, shape index: {}]   ;;  %s1274_s5 = inlined_call_operand.vmem [shape: bf16[3,16,128], index: 5, kind: input, shape index: {}]   ;;  %s1275_s6 = inlined_call_operand.vmem [shape: f32[1,128], index: 6, kind: input, shape index: {}]   ;;  %s1276_s7 = inlined_call_operand.vmem [shape: bf16[2,16,128], index: 7, kind: output, shape index: {0}]   ;;  %s1277_s8 = inlined_call_operand.vmem [shape: f32[2,8,128], index: 8, kind: output, shape index: {1}]  }
   0x1 LB: > { %s875_s28 = sadd.s32 4294967295, %s1097_s27   ;;  %p879_p0 = scmp.ge.s32.totalorder %s1097_s27, 1  ;;  %s1097_s27 = sphi %s1144_s27, %s19_s27  }
   0x2   : > { %p275_p1 = scmp.lt.s32.totalorder %s1097_s27, 3 }
   0x4   : > { %p276_p2 = pnand %p879_p0, %p275_p1 }
   0x5   : > { %p318_p3 = scmp.lt.s32.totalorder (!%p276_p2), %s875_s28, 1 }
   0x6   : > { %279 = sbr.rel (%p276_p2) target bundleno = 219 (0xdb), region = 48 }
   0xb   : > { %v1051_v0 = vld [vmem:[%s1273_s4 + $0x38] sm:$0xff]  ;;  %v1061_v1 = vld [vmem:[%s1274_s5 + $0x8] sm:$0xff]  ;;  %v1050_v4 = vld [vmem:[%s1273_s4 + $0x30] sm:$0xff]  ;;  %s1279_s28 = smov (!%p318_p3, %s875_s28), 1  ;;  %vm414_vm0 = vcmask 130048   ;;  %v358_v42 = vlaneseq  ;;  %vm496_vm1 = vcmask 1040384  }
   0xc   : > { %v1060_v2 = vld [vmem:[%s1273_s4 + $0x78] sm:$0xff]  ;;  %480 = vmatpush.bf16.msra.mxu1 %v1051_v0  ;;  %548 = vmatpush.bf16.msra.mxu2 %v1061_v1  ;;  %v1059_v5 = vld [vmem:[%s1273_s4 + $0x70] sm:$0xff]  ;;  %v1052_v7 = vld [vmem:[%s1274_s5] sm:$0xff]  ;;  %s1176_s23 = sshll.u32 %s1279_s28, 3  ;;  %vm723_vm3 = vcmask 1046528   ;;  %vm770_vm7 = vcmask 1041408  }
   0xd   : > { %v1069_v3 = vld [vmem:[%s1273_s4 + $0xb8] sm:$0xff]  ;;  %603 = vmatpush.bf16.msra.mxu3 %v1060_v2  ;;  %v1068_v6 = vld [vmem:[%s1273_s4 + $0xb0] sm:$0xff]  ;;  %s327_s26 = scalar_lea.vmem %s1272_s3, %s1176_s23  ;;  %425 = vmatpush.bf16.msra.mxu0 %v1052_v7  ;;  %v1049_v8 = vld [vmem:[%s1273_s4 + $0x28] sm:$0xff]  ;;  %s322_s22 = scalar_lea.vmem %s1269_s0, %s1176_s23  ;;  %v359_v44 = vshrl.u32 %v358_v42, 7 }
   0xe   : > { %v1043_v9 = vld [vmem:[%s327_s26] sm:$0xff]  ;;  %v1058_v10 = vld [vmem:[%s1273_s4 + $0x68] sm:$0xff]  ;;  %v1070_v12 = vld [vmem:[%s1274_s5 + $0x10] sm:$0xff]  ;;  %s332_s15 = scalar_lea.vmem %s1276_s7, %s1176_s23  ;;  %s336_s18 = scalar_lea.vmem %s1277_s8, %s1176_s23 }
   0xf   : > { %v1067_v11 = vld [vmem:[%s1273_s4 + $0xa8] sm:$0xff]  ;;  %950 = vmatmul.msk.bf16.vlgmr.msra.gmra.mxu2 %vm414_vm0, %v1043_v9  ;;  %v1048_v13 = vld [vmem:[%s1273_s4 + $0x20] sm:$0xff]  ;;  %v1047_v16 = vld [vmem:[%s1273_s4 + $0x18] sm:$0xff]  ;;  %v360_v46 = vadd.s32 8, %v359_v44  ;;  %v365_v48 = vand.u32 15, %v359_v44 }
  0x10   : > { %707 = vmatpush.bf16.msrb.mxu2 %v1069_v3  ;;  %481 = vmatpush.bf16.msra.mxu1 %v1050_v4  ;;  %v1057_v14 = vld [vmem:[%s1273_s4 + $0x60] sm:$0xff]  ;;  %v1056_v18 = vld [vmem:[%s1273_s4 + $0x58] sm:$0xff]  ;;  %v1046_v23 = vld [vmem:[%s1273_s4 + $0x10] sm:$0xff] }
  0x11   : > { %604 = vmatpush.bf16.msra.mxu3 %v1059_v5  ;;  %895 = vmatmul.msk.bf16.vlgmr.msra.gmra.mxu0 %vm414_vm0, %v1043_v9  ;;  %v1066_v15 = vld [vmem:[%s1273_s4 + $0xa0] sm:$0xff]  ;;  %v1065_v19 = vld [vmem:[%s1273_s4 + $0x98] sm:$0xff]  ;;  %v1055_v24 = vld [vmem:[%s1273_s4 + $0x50] sm:$0xff]  ;;  %v372_v52 = vand.u32 15, %v360_v46  ;;  %v503_v54 = vadd.s32 4294967295, %v365_v48 }
  0x12   : > { %652 = vmatpush.bf16.msrb.mxu0 %v1070_v12  ;;  %v1072_v17 = vld [vmem:[%s322_s22] sm:$0xff]   ;;  %v1064_v25 = vld [vmem:[%s1273_s4 + $0x90] sm:$0xff]  ;;  %v1045_v29 = vld [vmem:[%s1273_s4 + $0x8] sm:$0xff] }
  0x13   : > { %v1073_v20 = vunpack.c.l.bf16 %v1072_v17  ;;  %v1074_v21 = vunpack.c.h.bf16 %v1072_v17  ;;  %v1088_v22 = vld [vmem:[%s1270_s1] ss:$0 sm:$0xff]  ;;  %v1054_v30 = vld [vmem:[%s1273_s4 + $0x48] sm:$0xff]  ;;  %v731_v58 = vadd.s32 1, %v372_v52  ;;  %vm505_vm2 = vcmp.ge.s32.totalorder %v503_v54, 0 }
  0x14   : > { %708 = vmatpush.bf16.msrb.mxu2 %v1068_v6  ;;  %482 = vmatpush.bf16.msra.mxu1 %v1049_v8  ;;  %v1089_v28 = vld [vmem:[%s1271_s2] ss:$0 sm:$0xff]  ;;  %v1063_v31 = vld [vmem:[%s1273_s4 + $0x88] sm:$0xff] }
  0x15   : > { %605 = vmatpush.bf16.msra.mxu3 %v1058_v10  ;;  %v347_v26 = vmul.f32 %v1088_v22, %v1073_v20  ;;  %v348_v27 = vmul.f32 %v1088_v22, %v1074_v21  ;;  %v1044_v34 = vld [vmem:[%s1273_s4] sm:$0xff]  ;;  %vm735_vm4 = vcmp.lt.s32.totalorder %v731_v58, 16 }
  0x16   : > { %v1053_v35 = vld [vmem:[%s1273_s4 + $0x40] sm:$0xff] }
  0x17   : > { %v352_v32 = vadd.f32 %v1089_v28, %v347_v26  ;;  %v353_v33 = vadd.f32 %v1089_v28, %v348_v27  ;;  %v1062_v36 = vld [vmem:[%s1273_s4 + $0x80] sm:$0xff] }
  0x18   : > { %709 = vmatpush.bf16.msrb.mxu2 %v1067_v11  ;;  %483 = vmatpush.bf16.msra.mxu1 %v1048_v13  ;;  %v1090_v7 = vld [vmem:[%s1275_s6] ss:$0 sm:$0xff] }
  0x19   : > { %606 = vmatpush.bf16.msra.mxu3 %v1057_v14  ;;  %v354_v37 = vpack.c.bf16 %v353_v33, %v352_v32 }
  0x1c   : > { %710 = vmatpush.bf16.msrb.mxu2 %v1066_v15  ;;  %484 = vmatpush.bf16.msra.mxu1 %v1047_v16 }
  0x1d   : > { %607 = vmatpush.bf16.msra.mxu3 %v1056_v18 }
  0x20   : > { %711 = vmatpush.bf16.msrb.mxu2 %v1065_v19  ;;  %485 = vmatpush.bf16.msra.mxu1 %v1046_v23 }
  0x21   : > { %608 = vmatpush.bf16.msra.mxu3 %v1055_v24  ;;  %1005 = vmatmul.msk.bf16.vlgmr.msrb.gmra.mxu0 %vm414_vm0, %v1043_v9 }
  0x24   : > { %712 = vmatpush.bf16.msrb.mxu2 %v1064_v25  ;;  %486 = vmatpush.bf16.msra.mxu1 %v1045_v29 }
  0x25   : > { %609 = vmatpush.bf16.msra.mxu3 %v1054_v30 }
  0x28   : > { %713 = vmatpush.bf16.msrb.mxu2 %v1063_v31  ;;  %487 = vmatpush.bf16.msra.mxu1 %v1044_v34 }
  0x29   : > { %610 = vmatpush.bf16.msra.mxu3 %v1053_v35 }
  0x2b   : > { %488 = vmatmul.bf16.vlgmr.msra.gmra.mxu1 %v354_v37 }
  0x2c   : > { %714 = vmatpush.bf16.msrb.mxu2 %v1062_v36  ;;  %611 = vmatmul.bf16.vlgmr.msra.gmra.mxu3 %v354_v37 }
  0x2f   : > { %715 = vmatmul.bf16.vlgmr.msrb.gmra.mxu2 %v354_v37 }
  0x8e   : > { %v427_v38 = vpop.f32.mrf.mxu0 }
  0x92   : > { %v550_v39 = vpop.f32.mrf.mxu2 }
  0x96   : > { %v429_v40 = vpop.f32.mrf.mxu0 }
  0x9a   : > { %v552_v41 = vpop.f32.mrf.mxu2 }
  0x9e   : > { %v654_v45 = vpop.f32.mrf.mxu0 }
  0xa6   : > { %v656_v56 = vpop.f32.mrf.mxu0 }
  0xa8   : > { %v489_v43 = vpop.f32.mrf.mxu1 }
  0xa9   : > { %v490_v47 = vadd.f32 %v489_v43, %v427_v38 }
  0xab   : > { %v497_v53 = vrot.slane %v490_v47, 7 }
  0xad   : > { %v502_v59 = vsel %vm496_vm1, 0.0, %v497_v53 }
  0xae   : > { %v511_v2 = vsel %vm505_vm2, %v502_v59, 0.0 }
  0xaf   : > { %v612_v49 = vpop.f32.mrf.mxu3 }
  0xb0   : > { %v491_v51 = vpop.f32.mrf.mxu1  ;;  %v613_v60 = vadd.f32 %v612_v49, %v550_v39 }
  0xb1   : > { %v492_v55 = vadd.f32 %v491_v51, %v429_v40 }
  0xb2   : > { %v716_v50 = vpop.f32.mrf.mxu2  ;;  %v617_v5 = vadd.f32 %v613_v60, %v511_v2 }
  0xb3   : > { %v717_v57 = vadd.f32 %v716_v50, %v654_v45  ;;  %v498_v61 = vrot.slane %v492_v55, 7 }
  0xb5   : > { %v724_v3 = vrot.slane %v717_v57, 1  ;;  %v499_v6 = vsel %vm496_vm1, %v497_v53, %v498_v61 }
  0xb7   : > { %v614_v62 = vpop.f32.mrf.mxu3 }
  0xb8   : > { %v615_v0 = vadd.f32 %v614_v62, %v552_v41 }
  0xba   : > { %v718_v63 = vpop.f32.mrf.mxu2  ;;  %v618_v8 = vadd.f32 %v615_v0, %v499_v6 }
  0xbb   : > { %v719_v1 = vadd.f32 %v718_v63, %v656_v56 }
  0xbd   : > { %v725_v4 = vrot.slane %v719_v1, 1 }
  0xbf   : > { %v726_v9 = vsel %vm723_vm3, %v724_v3, %v725_v4  ;;  %v729_v10 = vsel %vm723_vm3, %v725_v4, 0.0 }
  0xc0   : > { %v739_v11 = vsel %vm735_vm4, %v729_v10, 0.0  ;;  %v740_v12 = vadd.f32 %v726_v9, %v617_v5 }
  0xc1   : > { %v741_v13 = vadd.f32 %v739_v11, %v618_v8 }
  0xc2   : > { %v745_v14 = vadd.f32 %v1090_v7, %v740_v12 }
  0xc3   : > { %v746_v15 = vadd.f32 %v1090_v7, %v741_v13 }
  0xc4   : > { %vm747_vm5 = vcmp.ge.f32.partialorder %v745_v14, 0.0  ;;  %v749_v16 = vmul.f32 0.01, %v745_v14 }
  0xc5   : > { %vm748_vm6 = vcmp.ge.f32.partialorder %v746_v15, 0.0  ;;  %v750_v17 = vmul.f32 0.01, %v746_v15 }
  0xc6   : > { %v751_v18 = vsel %vm747_vm5, %v745_v14, %v749_v16 }
  0xc7   : > { %v752_v19 = vsel %vm748_vm6, %v746_v15, %v750_v17  ;;  %v760_v20 = vmul.f32 %v751_v18, %v751_v18 }
  0xc8   : > { %v753_v21 = vadd.f32 %v752_v19, %v751_v18  ;;  %v761_v22 = vmul.f32 %v752_v19, %v752_v19  ;;  %v1078_v23 = vpack.c.bf16 %v752_v19, %v751_v18 }
  0xca   : > { %v754_v24 = vrot.slane %v753_v21, 4  ;;  %v762_v25 = vadd.f32 %v761_v22, %v760_v20  ;;  %1079 = vst [vmem:[%s332_s15] sm:$0xff] %v1078_v23  }
  0xcc   : > { %v755_v26 = vadd.f32 %v754_v24, %v753_v21  ;;  %v763_v27 = vrot.slane %v762_v25, 4 }
  0xce   : > { %v756_v28 = vrot.slane %v755_v26, 2  ;;  %v764_v29 = vadd.f32 %v763_v27, %v762_v25 }
  0xd0   : > { %v757_v30 = vadd.f32 %v756_v28, %v755_v26  ;;  %v765_v31 = vrot.slane %v764_v29, 2 }
  0xd2   : > { %v758_v32 = vrot.slane %v757_v30, 1  ;;  %v766_v33 = vadd.f32 %v765_v31, %v764_v29 }
  0xd4   : > { %v767_v34 = vrot.slane %v766_v33, 1  ;;  %v759_v35 = vadd.f32 %v758_v32, %v757_v30 }
  0xd6   : > { %v768_v36 = vadd.f32 %v767_v34, %v766_v33 }
  0xd8   : > { %v769_v37 = vsel %vm496_vm1, %v759_v35, %v768_v36 }
  0xd9   : > { %v771_v38 = vsel %vm770_vm7, %v769_v37, 0.0 }
  0xda   : > { %772 = vst [vmem:[%s336_s18] sm:$0xff] %v771_v38 }
  0xdb PF: > { %s19_s27 = sadd.s32 1, %s1097_s27  }
  0xdc   : > { %p16_p4 = scmp.ge.s32.totalorder %s19_s27, 4  }
  0xde   :  { %18 = sbr.rel (!%p16_p4) target bundleno = 1 (0x1), region = 97 }

// kernel: dense_encoder_forward.8
= control target key start
LH: loop header
LB: loop body
LE: loop exit
PB: predicated region body
PF: predicated region fallthrough
CT: control target
= control target key end

     0   :  { %s1724_s21 = smov 0   ;;  %s1936_s0 = inlined_call_operand.vmem [shape: bf16[2,16,128], index: 0, kind: input, shape index: {}]   ;;  %s1937_s1 = inlined_call_operand.vmem [shape: f32[1,128], index: 1, kind: input, shape index: {}]   ;;  %s1938_s2 = inlined_call_operand.vmem [shape: f32[1,128], index: 2, kind: input, shape index: {}]   ;;  %s1939_s3 = inlined_call_operand.vmem [shape: bf16[2,16,128], index: 3, kind: input, shape index: {}]   ;;  %s1940_s4 = inlined_call_operand.vmem [shape: f32[1,128], index: 4, kind: input, shape index: {}]   ;;  %s1941_s5 = inlined_call_operand.vmem [shape: f32[1,128], index: 5, kind: input, shape index: {}]   ;;  %s1942_s6 = inlined_call_operand.vmem [shape: bf16[2,16,16], index: 6, kind: input, shape index: {}]   ;;  %s1943_s7 = inlined_call_operand.vmem [shape: bf16[3,128,128], index: 7, kind: input, shape index: {}]   ;;  %s1944_s8 = inlined_call_operand.vmem [shape: bf16[3,128,128], index: 8, kind: input, shape index: {}]   ;;  %s1945_s9 = inlined_call_operand.vmem [shape: bf16[3,16,128], index: 9, kind: input, shape index: {}]   ;;  %s1946_s10 = inlined_call_operand.vmem [shape: f32[1,128], index: 10, kind: input, shape index: {}]   ;;  %s1947_s11 = inlined_call_operand.vmem [shape: bf16[2,16,128], index: 11, kind: output, shape index: {0}]   ;;  %s1948_s12 = inlined_call_operand.vmem [shape: f32[2,8,128], index: 12, kind: output, shape index: {1}]  }
   0x1 LB: > { %s1274_s22 = sadd.s32 4294967295, %s1657_s21   ;;  %p1278_p0 = scmp.ge.s32.totalorder %s1657_s21, 1  ;;  %s1657_s21 = sphi %s1724_s21, %s23_s21  }
   0x2   : > { %p385_p1 = scmp.lt.s32.totalorder %s1657_s21, 3 }
   0x4   : > { %p386_p2 = pnand %p1278_p0, %p385_p1 }
   0x5   : > { %p441_p3 = scmp.lt.s32.totalorder (!%p386_p2), %s1274_s22, 1 }
   0x6   : > { %389 = sbr.rel (%p386_p2) target bundleno = 251 (0xfb), region = 64 }
   0xb   : > { %v1589_v0 = vld [vmem:[%s1944_s8 + $0x38] sm:$0xff]  ;;  %v1590_v3 = vld [vmem:[%s1945_s9] sm:$0xff]  ;;  %v1588_v4 = vld [vmem:[%s1944_s8 + $0x30] sm:$0xff]  ;;  %s1950_s22 = smov (!%p441_p3, %s1274_s22), 1  ;;  %vm699_vm0 = vcmask 130048   ;;  %vm721_vm1 = vcmask 1040384  }
   0xc   : > { %v1581_v1 = vld [vmem:[%s1943_s7 + $0x38] sm:$0xff]  ;;  %610 = vmatpush.bf16.msra.mxu0 %v1589_v0  ;;  %v1580_v5 = vld [vmem:[%s1943_s7 + $0x30] sm:$0xff]  ;;  %710 = vmatpush.bf16.msra.mxu2 %v1590_v3  ;;  %s1759_s25 = sshll.u32 %s1950_s22, 3  ;;  %v1587_v9 = vld [vmem:[%s1944_s8 + $0x28] sm:$0xff]  ;;  %vm1110_vm3 = vcmask 1046528   ;;  %vm1157_vm7 = vcmask 1041408  }
   0xd   : > { %v1606_v2 = vld [vmem:[%s1944_s8 + $0x78] sm:$0xff]  ;;  %672 = vmatpush.bf16.msra.mxu1 %v1581_v1  ;;  %v1605_v7 = vld [vmem:[%s1944_s8 + $0x70] sm:$0xff]  ;;  %s455_s28 = scalar_lea.vmem %s1942_s6, %s1759_s25  ;;  %v1579_v10 = vld [vmem:[%s1943_s7 + $0x28] sm:$0xff]  ;;  %s450_s29 = scalar_lea.vmem %s1939_s3, %s1759_s25 }
   0xe   : > { %v1598_v6 = vld [vmem:[%s1943_s7 + $0x78] sm:$0xff]  ;;  %822 = vmatpush.bf16.msra.mxu3 %v1606_v2  ;;  %v1597_v8 = vld [vmem:[%s1943_s7 + $0x70] sm:$0xff]  ;;  %v1604_v11 = vld [vmem:[%s1944_s8 + $0x68] sm:$0xff]  ;;  %s445_s14 = scalar_lea.vmem %s1936_s0, %s1759_s25  ;;  %s460_s16 = scalar_lea.vmem %s1947_s11, %s1759_s25 }
   0xf   : > { %v1774_v12 = vld [vmem:[%s455_s28] sm:$0xff]  ;;  %v1596_v13 = vld [vmem:[%s1943_s7 + $0x68] sm:$0xff]  ;;  %v1585_v18 = vld [vmem:[%s1944_s8 + $0x18] sm:$0xff]  ;;  %s464_s19 = scalar_lea.vmem %s1948_s12, %s1759_s25 }
  0x10   : > { %884 = vmatpush.bf16.msrb.mxu2 %v1598_v6  ;;  %611 = vmatpush.bf16.msra.mxu0 %v1588_v4  ;;  %v1586_v14 = vld [vmem:[%s1944_s8 + $0x20] sm:$0xff]  ;;  %v1577_v19 = vld [vmem:[%s1943_s7 + $0x18] sm:$0xff]  ;;  %v1584_v30 = vld [vmem:[%s1944_s8 + $0x10] sm:$0xff] }
  0x11   : > { %673 = vmatpush.bf16.msra.mxu1 %v1580_v5  ;;  %1360 = vmatmul.msk.bf16.vlgmr.msra.gmra.mxu2 %vm699_vm0, %v1774_v12  ;;  %v1578_v15 = vld [vmem:[%s1943_s7 + $0x20] sm:$0xff]  ;;  %v1602_v22 = vld [vmem:[%s1944_s8 + $0x58] sm:$0xff]  ;;  %v1576_v31 = vld [vmem:[%s1943_s7 + $0x10] sm:$0xff] }
  0x12   : > { %823 = vmatpush.bf16.msra.mxu3 %v1605_v7  ;;  %v1603_v16 = vld [vmem:[%s1944_s8 + $0x60] sm:$0xff]  ;;  %v1594_v23 = vld [vmem:[%s1943_s7 + $0x58] sm:$0xff]  ;;  %v1601_v32 = vld [vmem:[%s1944_s8 + $0x50] sm:$0xff] }
  0x13   : > { %v1595_v17 = vld [vmem:[%s1943_s7 + $0x60] sm:$0xff]  ;;  %v1593_v33 = vld [vmem:[%s1943_s7 + $0x50] sm:$0xff]  ;;  %v1583_v40 = vld [vmem:[%s1944_s8 + $0x8] sm:$0xff] }
  0x14   : > { %885 = vmatpush.bf16.msrb.mxu2 %v1597_v8  ;;  %612 = vmatpush.bf16.msra.mxu0 %v1587_v9  ;;  %v1630_v20 = vld [vmem:[%s450_s29] sm:$0xff]   ;;  %v1575_v41 = vld [vmem:[%s1943_s7 + $0x8] sm:$0xff]  ;;  %v1623_v51 = vld [vmem:[%s1944_s8 + $0xb8] sm:$0xff] }
  0x15   : > { %674 = vmatpush.bf16.msra.mxu1 %v1579_v10  ;;  %v1626_v21 = vld [vmem:[%s445_s14] sm:$0xff]   ;;  %v1631_v24 = vunpack.c.l.bf16 %v1630_v20  ;;  %v1632_v25 = vunpack.c.h.bf16 %v1630_v20  ;;  %v1600_v42 = vld [vmem:[%s1944_s8 + $0x48] sm:$0xff]  ;;  %v1615_v52 = vld [vmem:[%s1943_s7 + $0xb8] sm:$0xff] }
  0x16   : > { %824 = vmatpush.bf16.msra.mxu3 %v1604_v11  ;;  %v1646_v26 = vld [vmem:[%s1940_s4] ss:$0 sm:$0xff]  ;;  %v1627_v27 = vunpack.c.l.bf16 %v1626_v21  ;;  %v1628_v28 = vunpack.c.h.bf16 %v1626_v21  ;;  %v1592_v43 = vld [vmem:[%s1943_s7 + $0x48] sm:$0xff]  ;;  %v1622_v57 = vld [vmem:[%s1944_s8 + $0xb0] sm:$0xff] }
  0x17   : > { %v1648_v29 = vld [vmem:[%s1937_s1] ss:$0 sm:$0xff]  ;;  %v492_v34 = vmul.f32 %v1646_v26, %v1631_v24  ;;  %v493_v35 = vmul.f32 %v1646_v26, %v1632_v25  ;;  %v1607_v56 = vld [vmem:[%s1945_s9 + $0x8] sm:$0xff]  ;;  %v1614_v58 = vld [vmem:[%s1943_s7 + $0xb0] sm:$0xff] }
  0x18   : > { %886 = vmatpush.bf16.msrb.mxu2 %v1596_v13  ;;  %613 = vmatpush.bf16.msra.mxu0 %v1586_v14  ;;  %v1647_v36 = vld [vmem:[%s1941_s5] ss:$0 sm:$0xff]  ;;  %v475_v37 = vmul.f32 %v1648_v29, %v1627_v27  ;;  %v476_v38 = vmul.f32 %v1648_v29, %v1628_v28  ;;  %v1624_v59 = vld [vmem:[%s1945_s9 + $0x10] sm:$0xff]  ;;  %v1621_v60 = vld [vmem:[%s1944_s8 + $0xa8] sm:$0xff] }
  0x19   : > { %675 = vmatpush.bf16.msra.mxu1 %v1578_v15  ;;  %v1649_v39 = vld [vmem:[%s1938_s2] ss:$0 sm:$0xff]  ;;  %v497_v44 = vadd.f32 %v1647_v36, %v492_v34  ;;  %v498_v45 = vadd.f32 %v1647_v36, %v493_v35  ;;  %v1613_v61 = vld [vmem:[%s1943_s7 + $0xa8] sm:$0xff]  ;;  %v1619_v0 = vld [vmem:[%s1944_s8 + $0x98] sm:$0xff] }
  0x1a   : > { %825 = vmatpush.bf16.msra.mxu3 %v1603_v16  ;;  %v480_v46 = vadd.f32 %v1649_v39, %v475_v37  ;;  %v481_v47 = vadd.f32 %v1649_v39, %v476_v38  ;;  %v1582_v48 = vld [vmem:[%s1944_s8] sm:$0xff]  ;;  %v1611_v1 = vld [vmem:[%s1943_s7 + $0x98] sm:$0xff]  ;;  %v1618_v2 = vld [vmem:[%s1944_s8 + $0x90] sm:$0xff] }
  0x1b   : > { %v1574_v49 = vld [vmem:[%s1943_s7] sm:$0xff]  ;;  %v499_v54 = vpack.c.bf16 %v498_v45, %v497_v44  ;;  %v1610_v3 = vld [vmem:[%s1943_s7 + $0x90] sm:$0xff]  ;;  %v1617_v4 = vld [vmem:[%s1944_s8 + $0x88] sm:$0xff] }
  0x1c   : > { %887 = vmatpush.bf16.msrb.mxu2 %v1595_v17  ;;  %614 = vmatpush.bf16.msra.mxu0 %v1585_v18  ;;  %v1599_v50 = vld [vmem:[%s1944_s8 + $0x40] sm:$0xff]  ;;  %v482_v55 = vpack.c.bf16 %v481_v47, %v480_v46  ;;  %v1609_v5 = vld [vmem:[%s1943_s7 + $0x88] sm:$0xff]  ;;  %v503_v18 = vlaneseq }
  0x1d   : > { %676 = vmatpush.bf16.msra.mxu1 %v1577_v19  ;;  %v1591_v53 = vld [vmem:[%s1943_s7 + $0x40] sm:$0xff] }
  0x1e   : > { %826 = vmatpush.bf16.msra.mxu3 %v1602_v22  ;;  %v1620_v62 = vld [vmem:[%s1944_s8 + $0xa0] sm:$0xff]  ;;  %v504_v21 = vshrl.u32 %v503_v18, 7 }
  0x1f   : > { %v1612_v63 = vld [vmem:[%s1943_s7 + $0xa0] sm:$0xff] }
  0x20   : > { %888 = vmatpush.bf16.msrb.mxu2 %v1594_v23  ;;  %615 = vmatpush.bf16.msra.mxu0 %v1584_v30  ;;  %v1616_v6 = vld [vmem:[%s1944_s8 + $0x80] sm:$0xff]  ;;  %v505_v25 = vadd.s32 8, %v504_v21  ;;  %v510_v28 = vand.u32 15, %v504_v21 }
  0x21   : > { %677 = vmatpush.bf16.msra.mxu1 %v1576_v31  ;;  %v1608_v7 = vld [vmem:[%s1943_s7 + $0x80] sm:$0xff] }
  0x22   : > { %827 = vmatpush.bf16.msra.mxu3 %v1601_v32  ;;  %v517_v30 = vand.u32 15, %v505_v25  ;;  %v728_v34 = vadd.s32 4294967295, %v510_v28 }
  0x24   : > { %889 = vmatpush.bf16.msrb.mxu2 %v1593_v33  ;;  %616 = vmatpush.bf16.msra.mxu0 %v1583_v40  ;;  %vm730_vm2 = vcmp.ge.s32.totalorder %v728_v34, 0 }
  0x25   : > { %678 = vmatpush.bf16.msra.mxu1 %v1575_v41  ;;  %v1118_v41 = vadd.s32 1, %v517_v30 }
  0x26   : > { %828 = vmatpush.bf16.msra.mxu3 %v1600_v42 }
  0x27   : > { %vm1122_vm4 = vcmp.lt.s32.totalorder %v1118_v41, 16 }
  0x28   : > { %890 = vmatpush.bf16.msrb.mxu2 %v1592_v43  ;;  %617 = vmatpush.bf16.msra.mxu0 %v1582_v48 }
  0x29   : > { %679 = vmatpush.bf16.msra.mxu1 %v1574_v49 }
  0x2a   : > { %829 = vmatpush.bf16.msra.mxu3 %v1599_v50 }
  0x2b   : > { %618 = vmatmul.bf16.vlgmr.msra.gmra.mxu0 %v499_v54 }
  0x2c   : > { %891 = vmatpush.bf16.msrb.mxu2 %v1591_v53  ;;  %680 = vmatmul.bf16.vlgmr.msra.gmra.mxu1 %v482_v55  ;;  %v1650_v53 = vld [vmem:[%s1946_s10] ss:$0 sm:$0xff] }
  0x2d   : > { %1007 = vmatpush.bf16.msrb.mxu1 %v1623_v51  ;;  %830 = vmatmul.bf16.vlgmr.msra.gmra.mxu3 %v499_v54 }
  0x2e   : > { %1069 = vmatpush.bf16.msrb.mxu3 %v1615_v52  ;;  %914 = vmatpush.bf16.msrb.mxu0 %v1607_v56 }
  0x2f   : > { %892 = vmatmul.bf16.vlgmr.msrb.gmra.mxu2 %v482_v55 }
  0x30   : > { %1099 = vmatpush.bf16.msra.mxu2 %v1624_v59 }
  0x31   : > { %1008 = vmatpush.bf16.msrb.mxu1 %v1622_v57 }
  0x32   : > { %1070 = vmatpush.bf16.msrb.mxu3 %v1614_v58 }
  0x35   : > { %1009 = vmatpush.bf16.msrb.mxu1 %v1621_v60 }
  0x36   : > { %1071 = vmatpush.bf16.msrb.mxu3 %v1613_v61 }
  0x39   : > { %1010 = vmatpush.bf16.msrb.mxu1 %v1620_v62 }
  0x3a   : > { %1072 = vmatpush.bf16.msrb.mxu3 %v1612_v63 }
  0x3b   : > { %1463 = vmatmul.msk.bf16.vlgmr.msrb.gmra.mxu0 %vm699_vm0, %v1774_v12 }
  0x3d   : > { %1011 = vmatpush.bf16.msrb.mxu1 %v1619_v0 }
  0x3e   : > { %1073 = vmatpush.bf16.msrb.mxu3 %v1611_v1 }
  0x3f   : > { %1566 = vmatmul.msk.bf16.vlgmr.msra.gmra.mxu2 %vm699_vm0, %v1774_v12 }
  0x41   : > { %1012 = vmatpush.bf16.msrb.mxu1 %v1618_v2 }
  0x42   : > { %1074 = vmatpush.bf16.msrb.mxu3 %v1610_v3 }
  0x45   : > { %1013 = vmatpush.bf16.msrb.mxu1 %v1617_v4 }
  0x46   : > { %1075 = vmatpush.bf16.msrb.mxu3 %v1609_v5 }
  0x49   : > { %1014 = vmatpush.bf16.msrb.mxu1 %v1616_v6 }
  0x4a   : > { %1076 = vmatpush.bf16.msrb.mxu3 %v1608_v7 }
  0x4c   : > { %1015 = vmatmul.bf16.vlgmr.msrb.gmra.mxu1 %v499_v54 }
  0x4d   : > { %1077 = vmatmul.bf16.vlgmr.msrb.gmra.mxu3 %v482_v55 }
  0x94   : > { %v712_v8 = vpop.f32.mrf.mxu2 }
  0x9c   : > { %v714_v9 = vpop.f32.mrf.mxu2 }
  0xa8   : > { %v619_v10 = vpop.f32.mrf.mxu0 }
  0xa9   : > { %v681_v11 = vpop.f32.mrf.mxu1 }
  0xaa   : > { %v682_v20 = vadd.f32 %v681_v11, %v619_v10 }
  0xac   : > { %v717_v26 = vadd.f32 %v712_v8, %v682_v20 }
  0xae   : > { %v722_v31 = vrot.slane %v717_v26, 7 }
  0xb0   : > { %v831_v12 = vpop.f32.mrf.mxu3  ;;  %v621_v14 = vpop.f32.mrf.mxu0  ;;  %v727_v43 = vsel %vm721_vm1, 0.0, %v722_v31 }
  0xb1   : > { %v683_v15 = vpop.f32.mrf.mxu1  ;;  %v736_v48 = vsel %vm730_vm2, %v727_v43, 0.0 }
  0xb2   : > { %v893_v13 = vpop.f32.mrf.mxu2  ;;  %v684_v27 = vadd.f32 %v683_v15, %v621_v14 }
  0xb3   : > { %v894_v33 = vadd.f32 %v893_v13, %v831_v12 }
  0xb4   : > { %v718_v32 = vadd.f32 %v714_v9, %v684_v27 }
  0xb6   : > { %v723_v42 = vrot.slane %v718_v32, 7 }
  0xb8   : > { %v833_v16 = vpop.f32.mrf.mxu3  ;;  %v916_v19 = vpop.f32.mrf.mxu0  ;;  %v724_v52 = vsel %vm721_vm1, %v722_v31, %v723_v42 }
  0xb9   : > { %v921_v44 = vadd.f32 %v916_v19, %v894_v33 }
  0xba   : > { %v895_v17 = vpop.f32.mrf.mxu2 }
  0xbb   : > { %v896_v38 = vadd.f32 %v895_v17, %v833_v16  ;;  %v923_v51 = vadd.f32 %v921_v44, %v736_v48 }
  0xc0   : > { %v918_v35 = vpop.f32.mrf.mxu0 }
  0xc1   : > { %v922_v46 = vadd.f32 %v918_v35, %v896_v38 }
  0xc2   : > { %v1101_v23 = vpop.f32.mrf.mxu2 }
  0xc3   : > { %v924_v54 = vadd.f32 %v922_v46, %v724_v52 }
  0xc9   : > { %v1016_v22 = vpop.f32.mrf.mxu1 }
  0xca   : > { %v1103_v45 = vpop.f32.mrf.mxu2 }
  0xd0   : > { %v1078_v24 = vpop.f32.mrf.mxu3 }
  0xd1   : > { %v1079_v29 = vadd.f32 %v1078_v24, %v1016_v22  ;;  %v1018_v36 = vpop.f32.mrf.mxu1 }
  0xd3   : > { %v1106_v39 = vadd.f32 %v1101_v23, %v1079_v29 }
  0xd5   : > { %v1111_v49 = vrot.slane %v1106_v39, 1 }
  0xd8   : > { %v1080_v37 = vpop.f32.mrf.mxu3 }
  0xd9   : > { %v1081_v40 = vadd.f32 %v1080_v37, %v1018_v36 }
  0xdb   : > { %v1107_v47 = vadd.f32 %v1103_v45, %v1081_v40 }
  0xdd   : > { %v1112_v50 = vrot.slane %v1107_v47, 1 }
  0xdf   : > { %v1113_v55 = vsel %vm1110_vm3, %v1111_v49, %v1112_v50  ;;  %v1116_v56 = vsel %vm1110_vm3, %v1112_v50, 0.0 }
  0xe0   : > { %v1126_v57 = vsel %vm1122_vm4, %v1116_v56, 0.0  ;;  %v1127_v58 = vadd.f32 %v1113_v55, %v923_v51 }
  0xe1   : > { %v1128_v59 = vadd.f32 %v1126_v57, %v924_v54 }
  0xe2   : > { %v1132_v60 = vadd.f32 %v1650_v53, %v1127_v58 }
  0xe3   : > { %v1133_v61 = vadd.f32 %v1650_v53, %v1128_v59 }
  0xe4   : > { %vm1134_vm5 = vcmp.ge.f32.partialorder %v1132_v60, 0.0  ;;  %v1136_v62 = vmul.f32 0.01, %v1132_v60 }
  0xe5   : > { %vm1135_vm6 = vcmp.ge.f32.partialorder %v1133_v61, 0.0  ;;  %v1137_v63 = vmul.f32 0.01, %v1133_v61 }
  0xe6   : > { %v1138_v0 = vsel %vm1134_vm5, %v1132_v60, %v1136_v62 }
  0xe7   : > { %v1139_v1 = vsel %vm1135_vm6, %v1133_v61, %v1137_v63  ;;  %v1147_v2 = vmul.f32 %v1138_v0, %v1138_v0 }
  0xe8   : > { %v1140_v3 = vadd.f32 %v1139_v1, %v1138_v0  ;;  %v1148_v4 = vmul.f32 %v1139_v1, %v1139_v1  ;;  %v1636_v5 = vpack.c.bf16 %v1139_v1, %v1138_v0 }
  0xea   : > { %v1141_v6 = vrot.slane %v1140_v3, 4  ;;  %v1149_v7 = vadd.f32 %v1148_v4, %v1147_v2  ;;  %1637 = vst [vmem:[%s460_s16] sm:$0xff] %v1636_v5  }
  0xec   : > { %v1142_v8 = vadd.f32 %v1141_v6, %v1140_v3  ;;  %v1150_v9 = vrot.slane %v1149_v7, 4 }
  0xee   : > { %v1143_v10 = vrot.slane %v1142_v8, 2  ;;  %v1151_v11 = vadd.f32 %v1150_v9, %v1149_v7 }
  0xf0   : > { %v1144_v12 = vadd.f32 %v1143_v10, %v1142_v8  ;;  %v1152_v13 = vrot.slane %v1151_v11, 2 }
  0xf2   : > { %v1145_v14 = vrot.slane %v1144_v12, 1  ;;  %v1153_v15 = vadd.f32 %v1152_v13, %v1151_v11 }
  0xf4   : > { %v1154_v16 = vrot.slane %v1153_v15, 1  ;;  %v1146_v17 = vadd.f32 %v1145_v14, %v1144_v12 }
  0xf6   : > { %v1155_v18 = vadd.f32 %v1154_v16, %v1153_v15 }
  0xf8   : > { %v1156_v19 = vsel %vm721_vm1, %v1146_v17, %v1155_v18 }
  0xf9   : > { %v1158_v20 = vsel %vm1157_vm7, %v1156_v19, 0.0 }
  0xfa   : > { %1159 = vst [vmem:[%s464_s19] sm:$0xff] %v1158_v20 }
  0xfb PF: > { %s23_s21 = sadd.s32 1, %s1657_s21  }
  0xfc   : > { %p20_p4 = scmp.ge.s32.totalorder %s23_s21, 4  }
  0xfe   :  { %22 = sbr.rel (!%p20_p4) target bundleno = 1 (0x1), region = 118 }

// kernel: tile.148
= control target key start
LH: loop header
LB: loop body
LE: loop exit
PB: predicated region body
PF: predicated region fallthrough
CT: control target
= control target key end

     0   :  { %s28_s0 = inlined_call_operand.vmem [shape: f32[3], index: 0, kind: input, shape index: {}]   ;;  %s29_s1 = inlined_call_operand.vmem [shape: f32[16,3], index: 1, kind: output, shape index: {}]  }
   0x1   :  { %v4_v0 = vld [vmem:[%s28_s0] ss:$0 sm:$0xff] }
   0x2   :  { %5 = vst [vmem:[%s29_s1] sm:$0xff] %v4_v0 }
   0x3   :  { %8 = vst [vmem:[%s29_s1 + $0x8] sm:$0xff] %v4_v0 }

// kernel: tile.149
= control target key start
LH: loop header
LB: loop body
LE: loop exit
PB: predicated region body
PF: predicated region fallthrough
CT: control target
= control target key end

     0   :  { %s131_s10 = smov 45   ;;  %s132_s11 = smov 39   ;;  %vm3_vm0 = vcmask 23552   ;;  %vm9_vm1 = vcmask 392552   ;;  %vm15_vm2 = vcmask 367952   ;;  %vm21_vm3 = vcmask 343352   ;;  %s207_s0 = inlined_call_operand.vmem [shape: f32[16,3], index: 0, kind: input, shape index: {}]   ;;  %s208_s1 = inlined_call_operand.vmem [shape: f32[1,48], index: 1, kind: output, shape index: {}]  }
   0x1   :  { %v101_v0 = vld [vmem:[%s207_s0 + $0xf] sm:$0x1]   ;;  %v103_v1 = vld [vmem:[%s207_s0 + $0xd] sm:$0x1]   ;;  %v105_v2 = vld [vmem:[%s207_s0 + $0xb] sm:$0x1]  }
   0x2   :  { %7 = vrot.lane.b32.xlu0 %v101_v0, %s131_s10  ;;  %19 = vrot.lane.b32.xlu1 %v103_v1, %s132_s11  ;;  %s133_s14 = smov 33   ;;  %v102_v3 = vld [vmem:[%s207_s0 + $0xe] sm:$0x1]   ;;  %v104_v4 = vld [vmem:[%s207_s0 + $0xc] sm:$0x1]   ;;  %s134_s19 = smov 42  }
   0x3   :  { %31 = vrot.lane.b32.xlu2 %v105_v2, %s133_s14  ;;  %s135_s20 = smov 36   ;;  %v106_v5 = vld [vmem:[%s207_s0 + $0xa] sm:$0x1]   ;;  %s136_s23 = smov 30   ;;  %v107_v6 = vld [vmem:[%s207_s0 + $0x9] sm:$0x1]  }
   0x4   :  { %v108_v7 = vld [vmem:[%s207_s0 + $0x8] sm:$0x1]   ;;  %s137_s28 = smov 27   ;;  %s138_s29 = smov 24   ;;  %v109_v8 = vld [vmem:[%s207_s0 + $0x7] sm:$0x1]  }
   0x5   :  { %s139_s3 = smov 21   ;;  %v110_v9 = vld [vmem:[%s207_s0 + $0x6] sm:$0x1]   ;;  %v111_v10 = vld [vmem:[%s207_s0 + $0x5] sm:$0x1]   ;;  %s140_s8 = smov 18  }
   0x6   :  { %s141_s9 = smov 15   ;;  %v112_v11 = vld [vmem:[%s207_s0 + $0x4] sm:$0x1]   ;;  %s142_s12 = smov 12   ;;  %v113_v12 = vld [vmem:[%s207_s0 + $0x3] sm:$0x1]  }
   0x7   :  { %v114_v13 = vld [vmem:[%s207_s0 + $0x2] sm:$0x1]   ;;  %s143_s17 = smov 9   ;;  %s144_s18 = smov 6   ;;  %v115_v14 = vld [vmem:[%s207_s0 + $0x1] sm:$0x1]  }
   0x8   :  { %s145_s21 = smov 3   ;;  %v2_v15 = vld [vmem:[%s207_s0] sm:$0x1]   ;;  %vm27_vm4 = vcmask 318752   ;;  %vm33_vm5 = vcmask 294152   ;;  %vm39_vm6 = vcmask 269552  }
   0x9   :  { %4 = vst.msk [vmem:[#allocation0] sm:$0x1] %vm3_vm0, %v2_v15   ;;  %vm45_vm7 = vcmask 244952   ;;  %vm51_vm8 = vcmask 220352   ;;  %vm57_vm9 = vcmask 195752   ;;  %vm63_vm10 = vcmask 171152  }
   0xa   :  { %13 = vrot.lane.b32.xlu0 %v102_v3, %s134_s19  ;;  %25 = vrot.lane.b32.xlu1 %v104_v4, %s135_s20  ;;  %vm69_vm11 = vcmask 146552   ;;  %vm75_vm12 = vcmask 121952   ;;  %vm81_vm13 = vcmask 97352   ;;  %vm87_vm14 = vcmask 72752  }
   0xb   :  { %37 = vrot.lane.b32.xlu2 %v106_v5, %s136_s23  ;;  %vm93_vm15 = vcmask 48152  }
  0x12   :  { %43 = vrot.lane.b32.xlu0 %v107_v6, %s137_s28  ;;  %49 = vrot.lane.b32.xlu1 %v108_v7, %s138_s29 }
  0x13   :  { %55 = vrot.lane.b32.xlu2 %v109_v8, %s139_s3 }
  0x1a   :  { %61 = vrot.lane.b32.xlu0 %v110_v9, %s140_s8  ;;  %67 = vrot.lane.b32.xlu1 %v111_v10, %s141_s9 }
  0x1b   :  { %73 = vrot.lane.b32.xlu2 %v112_v11, %s142_s12 }
  0x22   :  { %79 = vrot.lane.b32.xlu0 %v113_v12, %s143_s17  ;;  %85 = vrot.lane.b32.xlu1 %v114_v13, %s144_s18 }
  0x23   :  { %91 = vrot.lane.b32.xlu2 %v115_v14, %s145_s21 }
  0x5d   :  { %v32_v16 = vpop.permute.xlu2 %31  }
  0x65   :  { %v38_v17 = vpop.permute.xlu2 %37  }
  0x6d   :  { %v56_v18 = vpop.permute.xlu2 %55  }
  0x74   :  { %v8_v19 = vpop.permute.xlu0 %7   ;;  %v20_v20 = vpop.permute.xlu1 %19  }
  0x75   :  { %10 = vst.msk [vmem:[#allocation0] sm:$0x1] %vm9_vm1, %v8_v19   ;;  %v74_v21 = vpop.permute.xlu2 %73  }
  0x7c   :  { %v14_v22 = vpop.permute.xlu0 %13   ;;  %v26_v23 = vpop.permute.xlu1 %25  }
  0x7d   :  { %16 = vst.msk [vmem:[#allocation0] sm:$0x1] %vm15_vm2, %v14_v22   ;;  %v92_v24 = vpop.permute.xlu2 %91  }
  0x7e   :  { %22 = vst.msk [vmem:[#allocation0] sm:$0x1] %vm21_vm3, %v20_v20  }
  0x7f   :  { %28 = vst.msk [vmem:[#allocation0] sm:$0x1] %vm27_vm4, %v26_v23  }
  0x80   :  { %34 = vst.msk [vmem:[#allocation0] sm:$0x1] %vm33_vm5, %v32_v16  }
  0x81   :  { %40 = vst.msk [vmem:[#allocation0] sm:$0x1] %vm39_vm6, %v38_v17  }
  0x84   :  { %v44_v25 = vpop.permute.xlu0 %43   ;;  %v50_v26 = vpop.permute.xlu1 %49  }
  0x85   :  { %46 = vst.msk [vmem:[#allocation0] sm:$0x1] %vm45_vm7, %v44_v25  }
  0x86   :  { %52 = vst.msk [vmem:[#allocation0] sm:$0x1] %vm51_vm8, %v50_v26  }
  0x87   :  { %58 = vst.msk [vmem:[#allocation0] sm:$0x1] %vm57_vm9, %v56_v18  }
  0x8c   :  { %v62_v27 = vpop.permute.xlu0 %61   ;;  %v68_v28 = vpop.permute.xlu1 %67  }
  0x8d   :  { %64 = vst.msk [vmem:[#allocation0] sm:$0x1] %vm63_vm10, %v62_v27  }
  0x8e   :  { %70 = vst.msk [vmem:[#allocation0] sm:$0x1] %vm69_vm11, %v68_v28  }
  0x8f   :  { %76 = vst.msk [vmem:[#allocation0] sm:$0x1] %vm75_vm12, %v74_v21  }
  0x94   :  { %v80_v29 = vpop.permute.xlu0 %79   ;;  %v86_v30 = vpop.permute.xlu1 %85  }
  0x95   :  { %82 = vst.msk [vmem:[#allocation0] sm:$0x1] %vm81_vm13, %v80_v29  }
  0x96   :  { %88 = vst.msk [vmem:[#allocation0] sm:$0x1] %vm87_vm14, %v86_v30  }
  0x97   :  { %94 = vst.msk [vmem:[#allocation0] sm:$0x1] %vm93_vm15, %v92_v24  }
  0x9e   :  { %v97_v31 = vld [vmem:[#allocation0] sm:$0x1] }
  0x9f   :  { %100 = vst [vmem:[%s208_s1] sm:$0x1] %v97_v31 }

// kernel: dense_encoder_forward.9
= control target key start
LH: loop header
LB: loop body
LE: loop exit
PB: predicated region body
PF: predicated region fallthrough
CT: control target
= control target key end

     0   :  { %s2268_s21 = smov 0   ;;  %s2578_s0 = inlined_call_operand.vmem [shape: bf16[2,16,128], index: 0, kind: input, shape index: {}]   ;;  %s2579_s1 = inlined_call_operand.vmem [shape: f32[1,128], index: 1, kind: input, shape index: {}]   ;;  %s2580_s2 = inlined_call_operand.vmem [shape: f32[1,128], index: 2, kind: input, shape index: {}]   ;;  %s2581_s3 = inlined_call_operand.vmem [shape: bf16[2,16,128], index: 3, kind: input, shape index: {}]   ;;  %s2582_s4 = inlined_call_operand.vmem [shape: f32[1,128], index: 4, kind: input, shape index: {}]   ;;  %s2583_s5 = inlined_call_operand.vmem [shape: f32[1,128], index: 5, kind: input, shape index: {}]   ;;  %s2584_s6 = inlined_call_operand.vmem [shape: bf16[2,16,128], index: 6, kind: input, shape index: {}]   ;;  %s2585_s7 = inlined_call_operand.vmem [shape: f32[1,128], index: 7, kind: input, shape index: {}]   ;;  %s2586_s8 = inlined_call_operand.vmem [shape: f32[1,128], index: 8, kind: input, shape index: {}]   ;;  %s2587_s9 = inlined_call_operand.vmem [shape: bf16[2,16,16], index: 9, kind: input, shape index: {}]   ;;  %s2588_s10 = inlined_call_operand.vmem [shape: bf16[3,128,48], index: 10, kind: input, shape index: {}]   ;;  %s2589_s11 = inlined_call_operand.vmem [shape: bf16[3,128,48], index: 11, kind: input, shape index: {}]   ;;  %s2590_s12 = inlined_call_operand.vmem [shape: bf16[3,128,48], index: 12, kind: input, shape index: {}]   ;;  %s2591_s13 = inlined_call_operand.vmem [shape: bf16[3,16,48], index: 13, kind: input, shape index: {}]   ;;  %s2592_s14 = inlined_call_operand.vmem [shape: f32[1,48], index: 14, kind: input, shape index: {}]   ;;  %s2593_s15 = inlined_call_operand.vmem [shape: f32[2,16,48], index: 15, kind: input, shape index: {}]   ;;  %s2594_s16 = inlined_call_operand.vmem [shape: f32[2,16,48], index: 16, kind: output, shape index: {}]  }
   0x1   :  { %2595 = sst [smem:[#allocation2_spill]] %s2578_s0 }
   0x2   :  { %2596 = sst [smem:[#allocation3_spill]] %s2581_s3 }
   0x3   :  { %2597 = sst [smem:[#allocation4_spill]] %s2587_s9 }
   0x4 LB: > { %s1640_s22 = sadd.s32 4294967295, %s2181_s21   ;;  %p1644_p0 = scmp.ge.s32.totalorder %s2181_s21, 1  ;;  %s2181_s21 = sphi %s2268_s21, %s26_s21  }
   0x5   : > { %p502_p1 = scmp.lt.s32.totalorder %s2181_s21, 3 }
   0x7   : > { %p503_p2 = pnand %p1644_p0, %p502_p1 }
   0x8   : > { %p572_p3 = scmp.lt.s32.totalorder (!%p503_p2), %s1640_s22, 1  ;;  %s2598_s9 = sld [smem:[#allocation4_spill]] (!%p503_p2) }
   0x9   : > { %506 = sbr.rel (%p503_p2) target bundleno = 259 (0x103), region = 84  ;;  %s2599_s3 = sld [smem:[#allocation3_spill]] (!%p503_p2) }
   0xe   : > { %v2088_v0 = vld [vmem:[%s2589_s11 + $0x38] sm:$0xff]  ;;  %v2087_v3 = vld [vmem:[%s2589_s11 + $0x30] sm:$0xff]  ;;  %v2097_v6 = vld [vmem:[%s2591_s13] sm:$0xff]  ;;  %s2602_s22 = smov (!%p572_p3, %s1640_s22), 1  ;;  %vm933_vm0 = vcmask 130048   ;;  %vm955_vm1 = vcmask 1040384  }
   0xf   : > { %v2080_v1 = vld [vmem:[%s2588_s10 + $0x38] sm:$0xff]  ;;  %764 = vmatpush.bf16.msra.mxu0 %v2088_v0  ;;  %v2079_v4 = vld [vmem:[%s2588_s10 + $0x30] sm:$0xff]  ;;  %944 = vmatpush.bf16.msra.mxu3 %v2097_v6  ;;  %v2086_v8 = vld [vmem:[%s2589_s11 + $0x28] sm:$0xff]  ;;  %s2315_s19 = sshll.u32 %s2602_s22, 3  ;;  %s2070_s29 = sshll.u32 %s2602_s22, 4  ;;  %vm1506_vm3 = vcmask 1046528  }
  0x10   : > { %v2096_v2 = vld [vmem:[%s2590_s12 + $0x38] sm:$0xff]  ;;  %826 = vmatpush.bf16.msra.mxu1 %v2080_v1  ;;  %v2095_v5 = vld [vmem:[%s2590_s12 + $0x30] sm:$0xff]  ;;  %v2078_v9 = vld [vmem:[%s2588_s10 + $0x28] sm:$0xff]  ;;  %s591_s24 = scalar_lea.vmem %s2598_s9, %s2315_s19  ;;  %s581_s23 = scalar_lea.vmem %s2599_s3, %s2315_s19  ;;  %vm1534_vm5 = vcmask 392192  }
  0x11   : > { %904 = vmatpush.bf16.msra.mxu2 %v2096_v2  ;;  %v2113_v7 = vld [vmem:[%s2589_s11 + $0x78] sm:$0xff]  ;;  %v2094_v10 = vld [vmem:[%s2590_s12 + $0x28] sm:$0xff]  ;;  %v2112_v11 = vld [vmem:[%s2589_s11 + $0x70] sm:$0xff]  ;;  %s2600_s3 = sld [smem:[#allocation2_spill]]  ;;  %s596_s17 = scalar_lea.vmem %s2593_s15, %s2070_s29 }
  0x12   : > { %v2085_v12 = vld [vmem:[%s2589_s11 + $0x20] sm:$0xff]  ;;  %v2111_v15 = vld [vmem:[%s2589_s11 + $0x68] sm:$0xff]  ;;  %v2084_v17 = vld [vmem:[%s2589_s11 + $0x18] sm:$0xff]  ;;  %s601_s20 = scalar_lea.vmem %s2594_s16, %s2070_s29 }
  0x13   : > { %765 = vmatpush.bf16.msra.mxu0 %v2087_v3  ;;  %1056 = vmatpush.bf16.msrb.mxu3 %v2113_v7  ;;  %v2077_v13 = vld [vmem:[%s2588_s10 + $0x20] sm:$0xff]  ;;  %v2076_v18 = vld [vmem:[%s2588_s10 + $0x18] sm:$0xff]  ;;  %v2083_v21 = vld [vmem:[%s2589_s11 + $0x10] sm:$0xff] }
  0x14   : > { %827 = vmatpush.bf16.msra.mxu1 %v2079_v4  ;;  %v2093_v14 = vld [vmem:[%s2590_s12 + $0x20] sm:$0xff]  ;;  %v2092_v19 = vld [vmem:[%s2590_s12 + $0x18] sm:$0xff]  ;;  %v2075_v22 = vld [vmem:[%s2588_s10 + $0x10] sm:$0xff] }
  0x15   : > { %905 = vmatpush.bf16.msra.mxu2 %v2095_v5  ;;  %v2333_v16 = vld [vmem:[%s591_s24] sm:$0xff]  ;;  %s586_s24 = scalar_lea.vmem %s2584_s6, %s2315_s19  ;;  %v2091_v29 = vld [vmem:[%s2590_s12 + $0x10] sm:$0xff]  ;;  %v2109_v30 = vld [vmem:[%s2589_s11 + $0x58] sm:$0xff] }
  0x16   : > { %v2110_v20 = vld [vmem:[%s2589_s11 + $0x60] sm:$0xff]  ;;  %1761 = vmatmul.msk.bf16.vlgmr.msra.gmra.mxu3 %vm933_vm0, %v2333_v16  ;;  %v2082_v40 = vld [vmem:[%s2589_s11 + $0x8] sm:$0xff]  ;;  %v2108_v46 = vld [vmem:[%s2589_s11 + $0x50] sm:$0xff] }
  0x17   : > { %766 = vmatpush.bf16.msra.mxu0 %v2086_v8  ;;  %1057 = vmatpush.bf16.msrb.mxu3 %v2112_v11  ;;  %s576_s9 = scalar_lea.vmem %s2600_s3, %s2315_s19  ;;  %v2153_v23 = vld [vmem:[%s581_s23] sm:$0xff]   ;;  %v2074_v41 = vld [vmem:[%s2588_s10 + $0x8] sm:$0xff]  ;;  %v2105_v56 = vld [vmem:[%s2588_s10 + $0x78] sm:$0xff] }
  0x18   : > { %828 = vmatpush.bf16.msra.mxu1 %v2078_v9  ;;  %v2157_v24 = vld [vmem:[%s586_s24] sm:$0xff]   ;;  %v2154_v25 = vunpack.c.l.bf16 %v2153_v23  ;;  %v2155_v26 = vunpack.c.h.bf16 %v2153_v23  ;;  %v2090_v45 = vld [vmem:[%s2590_s12 + $0x8] sm:$0xff]  ;;  %v2121_v57 = vld [vmem:[%s2590_s12 + $0x78] sm:$0xff] }
  0x19   : > { %906 = vmatpush.bf16.msra.mxu2 %v2094_v10  ;;  %v2170_v27 = vld [vmem:[%s2582_s4] ss:$0 sm:$0xff]  ;;  %v2158_v33 = vunpack.c.l.bf16 %v2157_v24  ;;  %v2159_v34 = vunpack.c.h.bf16 %v2157_v24  ;;  %v2107_v59 = vld [vmem:[%s2589_s11 + $0x48] sm:$0xff]  ;;  %v2104_v1 = vld [vmem:[%s2588_s10 + $0x70] sm:$0xff] }
  0x1a   : > { %v2149_v28 = vld [vmem:[%s576_s9] sm:$0xff]   ;;  %v629_v37 = vmul.f32 %v2170_v27, %v2154_v25  ;;  %v630_v38 = vmul.f32 %v2170_v27, %v2155_v26  ;;  %v2122_v62 = vld [vmem:[%s2591_s13 + $0x8] sm:$0xff]  ;;  %v2120_v2 = vld [vmem:[%s2590_s12 + $0x70] sm:$0xff] }
  0x1b   : > { %767 = vmatpush.bf16.msra.mxu0 %v2085_v12  ;;  %1058 = vmatpush.bf16.msrb.mxu3 %v2111_v15  ;;  %v2150_v31 = vunpack.c.l.bf16 %v2149_v28  ;;  %v2172_v32 = vld [vmem:[%s2579_s1] ss:$0 sm:$0xff]  ;;  %v2151_v36 = vunpack.c.h.bf16 %v2149_v28  ;;  %v2138_v5 = vld [vmem:[%s2589_s11 + $0xb8] sm:$0xff]  ;;  %v2103_v7 = vld [vmem:[%s2588_s10 + $0x68] sm:$0xff] }
  0x1c   : > { %829 = vmatpush.bf16.msra.mxu1 %v2077_v13  ;;  %v2168_v35 = vld [vmem:[%s2585_s7] ss:$0 sm:$0xff]  ;;  %v2130_v6 = vld [vmem:[%s2588_s10 + $0xb8] sm:$0xff]  ;;  %v2119_v8 = vld [vmem:[%s2590_s12 + $0x68] sm:$0xff] }
  0x1d   : > { %907 = vmatpush.bf16.msra.mxu2 %v2093_v14  ;;  %v2171_v39 = vld [vmem:[%s2583_s5] ss:$0 sm:$0xff]  ;;  %v612_v42 = vmul.f32 %v2172_v32, %v2150_v31  ;;  %v613_v43 = vmul.f32 %v2172_v32, %v2151_v36  ;;  %v646_v47 = vmul.f32 %v2168_v35, %v2158_v33  ;;  %v647_v48 = vmul.f32 %v2168_v35, %v2159_v34  ;;  %v2137_v9 = vld [vmem:[%s2589_s11 + $0xb0] sm:$0xff]  ;;  %v2136_v13 = vld [vmem:[%s2589_s11 + $0xa8] sm:$0xff] }
  0x1e   : > { %v2173_v44 = vld [vmem:[%s2580_s2] ss:$0 sm:$0xff]  ;;  %v634_v50 = vadd.f32 %v2171_v39, %v629_v37  ;;  %v635_v51 = vadd.f32 %v2171_v39, %v630_v38  ;;  %v2129_v10 = vld [vmem:[%s2588_s10 + $0xb0] sm:$0xff]  ;;  %v2128_v14 = vld [vmem:[%s2588_s10 + $0xa8] sm:$0xff] }
  0x1f   : > { %768 = vmatpush.bf16.msra.mxu0 %v2084_v17  ;;  %1059 = vmatpush.bf16.msrb.mxu3 %v2110_v20  ;;  %v2169_v49 = vld [vmem:[%s2586_s8] ss:$0 sm:$0xff]  ;;  %v617_v54 = vadd.f32 %v2173_v44, %v612_v42  ;;  %v618_v55 = vadd.f32 %v2173_v44, %v613_v43  ;;  %v2101_v15 = vld [vmem:[%s2588_s10 + $0x58] sm:$0xff]  ;;  %v2100_v20 = vld [vmem:[%s2588_s10 + $0x50] sm:$0xff] }
  0x20   : > { %830 = vmatpush.bf16.msra.mxu1 %v2076_v18  ;;  %v2081_v52 = vld [vmem:[%s2589_s11] sm:$0xff]  ;;  %v651_v60 = vadd.f32 %v2169_v49, %v646_v47  ;;  %v652_v61 = vadd.f32 %v2169_v49, %v647_v48  ;;  %v2424_v63 = vpack.c.bf16 %v635_v51, %v634_v50  ;;  %v2117_v17 = vld [vmem:[%s2590_s12 + $0x58] sm:$0xff]  ;;  %v2099_v24 = vld [vmem:[%s2588_s10 + $0x48] sm:$0xff] }
  0x21   : > { %908 = vmatpush.bf16.msra.mxu2 %v2092_v19  ;;  %v2073_v53 = vld [vmem:[%s2588_s10] sm:$0xff]  ;;  %v2426_v0 = vpack.c.bf16 %v618_v55, %v617_v54  ;;  %v2126_v23 = vld [vmem:[%s2588_s10 + $0x98] sm:$0xff]  ;;  %v2115_v25 = vld [vmem:[%s2590_s12 + $0x48] sm:$0xff] }
  0x22   : > { %v2089_v58 = vld [vmem:[%s2590_s12] sm:$0xff]  ;;  %v2434_v3 = vpack.c.bf16 %v652_v61, %v651_v60  ;;  %v2133_v26 = vld [vmem:[%s2589_s11 + $0x90] sm:$0xff]  ;;  %v2132_v32 = vld [vmem:[%s2589_s11 + $0x88] sm:$0xff] }
  0x23   : > { %769 = vmatpush.bf16.msra.mxu0 %v2083_v21  ;;  %1060 = vmatpush.bf16.msrb.mxu3 %v2109_v30  ;;  %v2106_v4 = vld [vmem:[%s2589_s11 + $0x40] sm:$0xff]  ;;  %v2116_v21 = vld [vmem:[%s2590_s12 + $0x50] sm:$0xff]  ;;  %v2146_v30 = vld [vmem:[%s2590_s12 + $0xb8] sm:$0xff] }
  0x24   : > { %831 = vmatpush.bf16.msra.mxu1 %v2075_v22  ;;  %v2102_v11 = vld [vmem:[%s2588_s10 + $0x60] sm:$0xff]  ;;  %v2134_v22 = vld [vmem:[%s2589_s11 + $0x98] sm:$0xff]  ;;  %v2125_v27 = vld [vmem:[%s2588_s10 + $0x90] sm:$0xff] }
  0x25   : > { %909 = vmatpush.bf16.msra.mxu2 %v2091_v29  ;;  %v2118_v12 = vld [vmem:[%s2590_s12 + $0x60] sm:$0xff]  ;;  %v2147_v31 = vld [vmem:[%s2591_s13 + $0x10] sm:$0xff]  ;;  %v2124_v33 = vld [vmem:[%s2588_s10 + $0x88] sm:$0xff] }
  0x26   : > { %v2135_v18 = vld [vmem:[%s2589_s11 + $0xa0] sm:$0xff]  ;;  %v2145_v34 = vld [vmem:[%s2590_s12 + $0xb0] sm:$0xff]  ;;  %v2144_v37 = vld [vmem:[%s2590_s12 + $0xa8] sm:$0xff] }
  0x27   : > { %770 = vmatpush.bf16.msra.mxu0 %v2082_v40  ;;  %1061 = vmatpush.bf16.msrb.mxu3 %v2108_v46  ;;  %v2127_v19 = vld [vmem:[%s2588_s10 + $0xa0] sm:$0xff]  ;;  %v2142_v39 = vld [vmem:[%s2590_s12 + $0x98] sm:$0xff]  ;;  %v2141_v40 = vld [vmem:[%s2590_s12 + $0x90] sm:$0xff] }
  0x28   : > { %832 = vmatpush.bf16.msra.mxu1 %v2074_v41  ;;  %v2098_v28 = vld [vmem:[%s2588_s10 + $0x40] sm:$0xff]  ;;  %v2140_v41 = vld [vmem:[%s2590_s12 + $0x88] sm:$0xff] }
  0x29   : > { %910 = vmatpush.bf16.msra.mxu2 %v2090_v45  ;;  %v2114_v29 = vld [vmem:[%s2590_s12 + $0x40] sm:$0xff] }
  0x2a   : > { %v2131_v35 = vld [vmem:[%s2589_s11 + $0x80] sm:$0xff] }
  0x2b   : > { %771 = vmatpush.bf16.msra.mxu0 %v2081_v52  ;;  %1062 = vmatpush.bf16.msrb.mxu3 %v2107_v59  ;;  %v2123_v36 = vld [vmem:[%s2588_s10 + $0x80] sm:$0xff]  ;;  %v657_v59 = vlaneseq }
  0x2c   : > { %833 = vmatpush.bf16.msra.mxu1 %v2073_v53  ;;  %v2143_v38 = vld [vmem:[%s2590_s12 + $0xa0] sm:$0xff] }
  0x2d   : > { %911 = vmatpush.bf16.msra.mxu2 %v2089_v58  ;;  %v2139_v42 = vld [vmem:[%s2590_s12 + $0x80] sm:$0xff] }
  0x2e   : > { %772 = vmatmul.bf16.vlgmr.msra.gmra.mxu0 %v2424_v63 }
  0x2f   : > { %1118 = vmatpush.bf16.msrb.mxu0 %v2105_v56  ;;  %834 = vmatmul.bf16.vlgmr.msra.gmra.mxu1 %v2426_v0 }
  0x30   : > { %1197 = vmatpush.bf16.msrb.mxu1 %v2121_v57  ;;  %912 = vmatmul.bf16.vlgmr.msra.gmra.mxu2 %v2434_v3 }
  0x31   : > { %1229 = vmatpush.bf16.msrb.mxu2 %v2122_v62  ;;  %1063 = vmatpush.bf16.msrb.mxu3 %v2106_v4 }
  0x33   : > { %1119 = vmatpush.bf16.msrb.mxu0 %v2104_v1 }
  0x34   : > { %1198 = vmatpush.bf16.msrb.mxu1 %v2120_v2  ;;  %1064 = vmatmul.bf16.vlgmr.msrb.gmra.mxu3 %v2424_v63 }
  0x35   : > { %1322 = vmatpush.bf16.msra.mxu3 %v2138_v5  ;;  %1384 = vmatpush.bf16.msra.mxu2 %v2130_v6 }
  0x37   : > { %1120 = vmatpush.bf16.msrb.mxu0 %v2103_v7 }
  0x38   : > { %1199 = vmatpush.bf16.msrb.mxu1 %v2119_v8 }
  0x39   : > { %1323 = vmatpush.bf16.msra.mxu3 %v2137_v9  ;;  %1385 = vmatpush.bf16.msra.mxu2 %v2129_v10 }
  0x3b   : > { %1121 = vmatpush.bf16.msrb.mxu0 %v2102_v11 }
  0x3c   : > { %1200 = vmatpush.bf16.msrb.mxu1 %v2118_v12 }
  0x3d   : > { %1324 = vmatpush.bf16.msra.mxu3 %v2136_v13  ;;  %1386 = vmatpush.bf16.msra.mxu2 %v2128_v14 }
  0x3f   : > { %1122 = vmatpush.bf16.msrb.mxu0 %v2101_v15 }
  0x40   : > { %1201 = vmatpush.bf16.msrb.mxu1 %v2117_v17  ;;  %1912 = vmatmul.msk.bf16.vlgmr.msrb.gmra.mxu2 %vm933_vm0, %v2333_v16 }
  0x41   : > { %1325 = vmatpush.bf16.msra.mxu3 %v2135_v18  ;;  %1387 = vmatpush.bf16.msra.mxu2 %v2127_v19 }
  0x43   : > { %1123 = vmatpush.bf16.msrb.mxu0 %v2100_v20 }
  0x44   : > { %1202 = vmatpush.bf16.msrb.mxu1 %v2116_v21 }
  0x45   : > { %1326 = vmatpush.bf16.msra.mxu3 %v2134_v22  ;;  %1388 = vmatpush.bf16.msra.mxu2 %v2126_v23 }
  0x47   : > { %1124 = vmatpush.bf16.msrb.mxu0 %v2099_v24 }
  0x48   : > { %1203 = vmatpush.bf16.msrb.mxu1 %v2115_v25 }
  0x49   : > { %1327 = vmatpush.bf16.msra.mxu3 %v2133_v26  ;;  %1389 = vmatpush.bf16.msra.mxu2 %v2125_v27 }
  0x4b   : > { %1125 = vmatpush.bf16.msrb.mxu0 %v2098_v28 }
  0x4c   : > { %1204 = vmatpush.bf16.msrb.mxu1 %v2114_v29 }
  0x4d   : > { %1328 = vmatpush.bf16.msra.mxu3 %v2132_v32  ;;  %1390 = vmatpush.bf16.msra.mxu2 %v2124_v33 }
  0x4e   : > { %1126 = vmatmul.bf16.vlgmr.msrb.gmra.mxu0 %v2426_v0 }
  0x4f   : > { %1463 = vmatpush.bf16.msra.mxu0 %v2146_v30  ;;  %1205 = vmatmul.bf16.vlgmr.msrb.gmra.mxu1 %v2434_v3 }
  0x50   : > { %1495 = vmatpush.bf16.msra.mxu1 %v2147_v31 }
  0x51   : > { %1329 = vmatpush.bf16.msra.mxu3 %v2131_v35  ;;  %1391 = vmatpush.bf16.msra.mxu2 %v2123_v36  ;;  %v2174_v36 = vld [vmem:[%s2592_s14] ss:$0 sm:$0xff] }
  0x53   : > { %1464 = vmatpush.bf16.msra.mxu0 %v2145_v34 }
  0x54   : > { %1330 = vmatmul.bf16.vlgmr.msra.gmra.mxu3 %v2424_v63  ;;  %1392 = vmatmul.bf16.vlgmr.msra.gmra.mxu2 %v2426_v0  ;;  %v658_v0 = vshrl.u32 %v657_v59, 7 }
  0x56   : > { %v659_v4 = vadd.s32 8, %v658_v0  ;;  %v664_v8 = vand.u32 15, %v658_v0 }
  0x57   : > { %1465 = vmatpush.bf16.msra.mxu0 %v2144_v37 }
  0x58   : > { %v671_v13 = vand.u32 15, %v659_v4  ;;  %v962_v18 = vadd.s32 4294967295, %v664_v8 }
  0x5a   : > { %v1514_v24 = vadd.s32 1, %v671_v13  ;;  %vm964_vm2 = vcmp.ge.s32.totalorder %v962_v18, 0 }
  0x5b   : > { %1466 = vmatpush.bf16.msra.mxu0 %v2143_v38 }
  0x5c   : > { %vm1518_vm4 = vcmp.lt.s32.totalorder %v1514_v24, 16 }
  0x5f   : > { %1467 = vmatpush.bf16.msra.mxu0 %v2142_v39  ;;  %2063 = vmatmul.msk.bf16.vlgmr.msra.gmra.mxu1 %vm933_vm0, %v2333_v16 }
  0x63   : > { %1468 = vmatpush.bf16.msra.mxu0 %v2141_v40 }
  0x67   : > { %1469 = vmatpush.bf16.msra.mxu0 %v2140_v41 }
  0x6b   : > { %1470 = vmatpush.bf16.msra.mxu0 %v2139_v42 }
  0x6e   : > { %1471 = vmatmul.bf16.vlgmr.msra.gmra.mxu0 %v2434_v3 }
  0x99   : > { %v946_v43 = vpop.f32.mrf.mxu3 }
  0xa1   : > { %v948_v47 = vpop.f32.mrf.mxu3 }
  0xab   : > { %v773_v45 = vpop.f32.mrf.mxu0 }
  0xac   : > { %v835_v46 = vpop.f32.mrf.mxu1 }
  0xad   : > { %v836_v58 = vadd.f32 %v835_v46, %v773_v45  ;;  %v1531_v45 = vld [vmem:[%s596_s17 + $0x8] sm:$0xff] }
  0xb3   : > { %v913_v44 = vpop.f32.mrf.mxu2  ;;  %v775_v16 = vpop.f32.mrf.mxu0 }
  0xb4   : > { %v837_v49 = vpop.f32.mrf.mxu1  ;;  %v918_v62 = vadd.f32 %v913_v44, %v836_v58 }
  0xb5   : > { %v838_v63 = vadd.f32 %v837_v49, %v775_v16 }
  0xb6   : > { %v951_v5 = vadd.f32 %v946_v43, %v918_v62  ;;  %v1530_v43 = vld [vmem:[%s596_s17] sm:$0xff] }
  0xb7   : > { %v1065_v51 = vpop.f32.mrf.mxu3 }
  0xb8   : > { %v956_v14 = vrot.slane %v951_v5, 7 }
  0xba   : > { %v961_v26 = vsel %vm955_vm1, 0.0, %v956_v14 }
  0xbb   : > { %v915_v48 = vpop.f32.mrf.mxu2  ;;  %v970_v31 = vsel %vm964_vm2, %v961_v26, 0.0 }
  0xbc   : > { %v919_v6 = vadd.f32 %v915_v48, %v838_v63 }
  0xbe   : > { %v952_v15 = vadd.f32 %v948_v47, %v919_v6 }
  0xbf   : > { %v1067_v55 = vpop.f32.mrf.mxu3 }
  0xc0   : > { %v957_v25 = vrot.slane %v952_v15, 7 }
  0xc2   : > { %v958_v35 = vsel %vm955_vm1, %v956_v14, %v957_v25 }
  0xc3   : > { %v1231_v50 = vpop.f32.mrf.mxu2 }
  0xcb   : > { %v1127_v52 = vpop.f32.mrf.mxu0  ;;  %v1233_v54 = vpop.f32.mrf.mxu2 }
  0xcc   : > { %v1206_v53 = vpop.f32.mrf.mxu1  ;;  %v1128_v7 = vadd.f32 %v1127_v52, %v1065_v51 }
  0xce   : > { %v1211_v17 = vadd.f32 %v1206_v53, %v1128_v7 }
  0xd0   : > { %v1236_v27 = vadd.f32 %v1231_v50, %v1211_v17 }
  0xd2   : > { %v1238_v34 = vadd.f32 %v1236_v27, %v970_v31 }
  0xd3   : > { %v1129_v56 = vpop.f32.mrf.mxu0 }
  0xd4   : > { %v1208_v57 = vpop.f32.mrf.mxu1  ;;  %v1130_v9 = vadd.f32 %v1129_v56, %v1067_v55 }
  0xd6   : > { %v1212_v19 = vadd.f32 %v1208_v57, %v1130_v9 }
  0xd7   : > { %v1331_v60 = vpop.f32.mrf.mxu3  ;;  %v1393_v61 = vpop.f32.mrf.mxu2 }
  0xd8   : > { %v1394_v3 = vadd.f32 %v1393_v61, %v1331_v60  ;;  %v1237_v29 = vadd.f32 %v1233_v54, %v1212_v19 }
  0xda   : > { %v1239_v37 = vadd.f32 %v1237_v29, %v958_v35 }
  0xdc   : > { %v1497_v1 = vpop.f32.mrf.mxu1 }
  0xdf   : > { %v1333_v10 = vpop.f32.mrf.mxu3  ;;  %v1395_v11 = vpop.f32.mrf.mxu2 }
  0xe0   : > { %v1396_v20 = vadd.f32 %v1395_v11, %v1333_v10 }
  0xe4   : > { %v1499_v28 = vpop.f32.mrf.mxu1 }
  0xeb   : > { %v1472_v2 = vpop.f32.mrf.mxu0 }
  0xec   : > { %v1477_v12 = vadd.f32 %v1472_v2, %v1394_v3 }
  0xee   : > { %v1502_v22 = vadd.f32 %v1497_v1, %v1477_v12 }
  0xf0   : > { %v1507_v32 = vrot.slane %v1502_v22, 1 }
  0xf3   : > { %v1474_v21 = vpop.f32.mrf.mxu0 }
  0xf4   : > { %v1478_v23 = vadd.f32 %v1474_v21, %v1396_v20 }
  0xf6   : > { %v1503_v30 = vadd.f32 %v1499_v28, %v1478_v23 }
  0xf8   : > { %v1508_v33 = vrot.slane %v1503_v30, 1 }
  0xfa   : > { %v1509_v38 = vsel %vm1506_vm3, %v1507_v32, %v1508_v33  ;;  %v1512_v39 = vsel %vm1506_vm3, %v1508_v33, 0.0 }
  0xfb   : > { %v1522_v40 = vsel %vm1518_vm4, %v1512_v39, 0.0  ;;  %v1523_v41 = vadd.f32 %v1509_v38, %v1238_v34 }
  0xfc   : > { %v1524_v42 = vadd.f32 %v1522_v40, %v1239_v37 }
  0xfd   : > { %v1528_v44 = vadd.f32 %v2174_v36, %v1523_v41 }
  0xfe   : > { %v1529_v46 = vadd.f32 %v2174_v36, %v1524_v42 }
  0xff   : > { %v1532_v47 = vadd.f32 %v1530_v43, %v1528_v44 }
 0x100   : > { %v1533_v48 = vadd.f32 %v1531_v45, %v1529_v46 }
 0x101   : > { %1535 = vst.msk [vmem:[%s601_s20] sm:$0xff] %vm1534_vm5, %v1532_v47 }
 0x102   : > { %1536 = vst.msk [vmem:[%s601_s20 + $0x8] sm:$0xff] %vm1534_vm5, %v1533_v48 }
 0x103 PF: > { %s26_s21 = sadd.s32 1, %s2181_s21  }
 0x104   : > { %p23_p4 = scmp.ge.s32.totalorder %s26_s21, 4  }
 0x106   :  { %25 = sbr.rel (!%p23_p4) target bundleno = 4 (0x4), region = 134 }

</bundles_post_ra>
